<compile_context>
chip_gen: v5e
topology: v5e:2x2
jax: 0.10.0
libtpu: 0.0.40
codegen_flags: <defaults>
</compile_context>

<pallas_src>
import math
import functools

import jax
import jax.numpy as jnp
from jax.experimental import pallas as pl
from jax.experimental.pallas import tpu as pltpu


# ----------------------------------------------------------------- utilities --

def _round_up(x, m):
    return (x + m - 1) // m * m


def _pad2(a, rows, cols):
    r, c = a.shape
    return jnp.pad(a, ((0, rows - r), (0, cols - c)))


def _slab_layout(d_model, nhead, num_layers, dim_feedforward):
    """Static layout (offsets/sizes) of the two parameter slabs."""
    Dp = _round_up(d_model, 128)          # padded model width (lane dense)
    Fp = _round_up(dim_feedforward, 128)  # padded ffn width
    Dh = d_model // nhead                 # real head dim
    HB = _round_up(Dh, 128)               # per-head lane block

    w_entries = [("in_w", Dp, Dp)]
    for li in range(num_layers):
        w_entries += [
            (f"qkv_w_{li}", Dp, 3 * nhead * HB),   # [q_h0..q_hH, k_h0.., v_h0..]
            (f"ow_{li}", HB, nhead * Dp),          # per-head attn out-proj blocks
            (f"l1_w_{li}", Dp, Fp),
            (f"l2_w_{li}", Fp, Dp),
        ]
    w_entries.append(("out_w", Dp, Dp))

    w_rows = max(r for _, r, _ in w_entries)
    w_off, col = {}, 0
    for name, r, c in w_entries:
        w_off[name] = (r, col, c)
        col += c
    w_cols = col

    v_entries = [("out_b", Dp)]
    for li in range(num_layers):
        v_entries += [
            (f"qkv_b_{li}", 3 * nhead * HB),
            (f"op_b_{li}", Dp),
            (f"l1_b_{li}", Fp),
            (f"l2_b_{li}", Dp),
            (f"ln1_g_{li}", Dp), (f"ln1_b_{li}", Dp),
            (f"ln2_g_{li}", Dp), (f"ln2_b_{li}", Dp),
        ]
    v_off, off = {}, 0
    for name, c in v_entries:
        v_off[name] = (off, c)
        off += c
    v_cols = off

    dims = dict(Dp=Dp, Fp=Fp, Dh=Dh, HB=HB,
                w_rows=w_rows, w_cols=w_cols, v_cols=v_cols)
    return dims, w_entries, w_off, v_entries, v_off


# -------------------------------------------------------------------- kernel --

def _make_kernel(d_model, nhead, num_layers, B, S, dims, w_off, v_off):
    Dp, HB = dims["Dp"], dims["HB"]
    H = nhead
    BS = B * S

    def kernel(x_ref, pos_ref, w_ref, v_ref, o_ref):
        # ---- slab accessors (all offsets are multiples of 128 lanes) --------
        def wmat(name):
            rows, off, width = w_off[name]
            return w_ref[0:rows, off:off + width]          # bf16 (rows, width)

        def vvec(name):
            off, width = v_off[name]
            return v_ref[:, off:off + width]               # f32 (1, width)

        def mm(a_bf16, name):
            return jnp.dot(a_bf16, wmat(name),
                           preferred_element_type=jnp.float32)

        # mask of the real d_model columns inside the padded 128-lane block
        col_mask = (jax.lax.broadcasted_iota(jnp.int32, (1, Dp), 1)
                    < d_model).astype(jnp.float32)
        inv_d = 1.0 / float(d_model)

        def layernorm(h, g, b):                            # masked, eps=1e-5
            mu = jnp.sum(h * col_mask, axis=-1, keepdims=True) * inv_d
            diff = (h - mu) * col_mask
            var = jnp.sum(diff * diff, axis=-1, keepdims=True) * inv_d
            return diff * jax.lax.rsqrt(var + 1e-5) * g + b

        # ---- input projection + positional encoding -------------------------
        x = x_ref[...]                                     # (BS, Dp) f32
        pos = pos_ref[...]                                 # (S, Dp)  f32 (+in_b folded)
        pos_all = jnp.concatenate([pos] * B, axis=0) if B > 1 else pos
        h = mm(x.astype(jnp.bfloat16), "in_w") + pos_all   # (BS, Dp) f32

        # ---- encoder layers --------------------------------------------------
        for li in range(num_layers):
            hb = h.astype(jnp.bfloat16)
            qkv = mm(hb, f"qkv_w_{li}") + vvec(f"qkv_b_{li}")   # (BS, 3*H*HB) f32
            ow = wmat(f"ow_{li}")                                # (HB, H*Dp) bf16
            attn = vvec(f"op_b_{li}")                            # (1, Dp) f32

            # static head loop; each head's q/k/v lives in its own 128-lane block
            for hh in range(H):
                q = qkv[:, hh * HB:(hh + 1) * HB]
                k = qkv[:, (H + hh) * HB:(H + hh + 1) * HB]
                v = qkv[:, (2 * H + hh) * HB:(2 * H + hh + 1) * HB]
                q3 = q.reshape(B, S, HB).astype(jnp.bfloat16)
                k3 = k.reshape(B, S, HB).astype(jnp.bfloat16)
                v3 = v.reshape(B, S, HB).astype(jnp.bfloat16)

                # 1/sqrt(Dh) is pre-folded into the Q weights/bias
                s = jnp.einsum('bqd,bkd->bqk', q3, k3,
                               preferred_element_type=jnp.float32)  # (B,S,S)
                m = jnp.max(s, axis=-1, keepdims=True)
                p = jnp.exp(s - m)
                p = p * pl.reciprocal(jnp.sum(p, axis=-1, keepdims=True),
                                      approx=True)
                ctx = jnp.einsum('bqk,bkd->bqd', p.astype(jnp.bfloat16), v3,
                                 preferred_element_type=jnp.float32)  # (B,S,HB)
                ctx2 = ctx.reshape(BS, HB).astype(jnp.bfloat16)
                attn = attn + jnp.dot(ctx2, ow[:, hh * Dp:(hh + 1) * Dp],
                                      preferred_element_type=jnp.float32)

            h = layernorm(h + attn, vvec(f"ln1_g_{li}"), vvec(f"ln1_b_{li}"))

            # feed-forward (ReLU); dropout = identity
            hb2 = h.astype(jnp.bfloat16)
            ff = jnp.maximum(mm(hb2, f"l1_w_{li}") + vvec(f"l1_b_{li}"), 0.0)
            ff = mm(ff.astype(jnp.bfloat16), f"l2_w_{li}") + vvec(f"l2_b_{li}")
            h = layernorm(h + ff, vvec(f"ln2_g_{li}"), vvec(f"ln2_b_{li}"))

        # ---- output projection (lane-dense (BS, 128) store) -----------------
        o_ref[...] = mm(h.astype(jnp.bfloat16), "out_w") + vvec("out_b")

    return kernel


# ------------------------------------------------------------- param handling --

def init_params(key, d_model, nhead, num_layers, dim_feedforward, max_len=1000):
    """Raw f32 parameters, torch-like (weights stored as (in, out) = W^T)."""
    def dense(k, fan_in, fan_out):
        bound = 1.0 / math.sqrt(fan_in)
        return jax.random.uniform(k, (fan_in, fan_out), jnp.float32, -bound, bound)

    keys = jax.random.split(key, 3 + num_layers)
    params = {
        "pos": jax.random.normal(keys[0], (max_len, d_model), jnp.float32),
        "in_w": dense(keys[1], d_model, d_model),
        "in_b": jnp.zeros((d_model,), jnp.float32),
        "out_w": dense(keys[2], d_model, d_model),
        "out_b": jnp.zeros((d_model,), jnp.float32),
        "layers": [],
    }
    for li in range(num_layers):
        lk = jax.random.split(keys[3 + li], 6)
        params["layers"].append({
            "qkv_w": dense(lk[0], d_model, 3 * d_model),
            "qkv_b": 0.02 * jax.random.normal(lk[1], (3 * d_model,), jnp.float32),
            "op_w": dense(lk[2], d_model, d_model),
            "op_b": jnp.zeros((d_model,), jnp.float32),
            "l1_w": dense(lk[3], d_model, dim_feedforward),
            "l1_b": jnp.zeros((dim_feedforward,), jnp.float32),
            "l2_w": dense(lk[4], dim_feedforward, d_model),
            "l2_b": jnp.zeros((d_model,), jnp.float32),
            "ln1_g": jnp.ones((d_model,), jnp.float32),
            "ln1_b": jnp.zeros((d_model,), jnp.float32),
            "ln2_g": jnp.ones((d_model,), jnp.float32),
            "ln2_b": jnp.zeros((d_model,), jnp.float32),
        })
    return params


def prepare_params(params, *, d_model, nhead, num_layers, dim_feedforward):
    """ONE-TIME weight prep (outside the jitted forward): pad to 128 lanes,
    fold 1/sqrt(Dh) into Q, re-layout heads into 128-lane blocks, fold in_b
    into the positional table, and pack everything into two slabs."""
    dims, w_entries, _, v_entries, _ = _slab_layout(
        d_model, nhead, num_layers, dim_feedforward)
    Dp, Fp, Dh, HB = dims["Dp"], dims["Fp"], dims["Dh"], dims["HB"]
    scale = 1.0 / math.sqrt(Dh)

    wmats, vvecs = {}, {}
    wmats["in_w"] = _pad2(params["in_w"], Dp, Dp)
    wmats["out_w"] = _pad2(params["out_w"], Dp, Dp)
    vvecs["out_b"] = jnp.pad(params["out_b"], (0, Dp - d_model))

    for li, lp in enumerate(params["layers"]):
        qw = lp["qkv_w"][:, 0 * d_model:1 * d_model] * scale
        kw = lp["qkv_w"][:, 1 * d_model:2 * d_model]
        vw = lp["qkv_w"][:, 2 * d_model:3 * d_model]
        qb = lp["qkv_b"][0 * d_model:1 * d_model] * scale
        kb = lp["qkv_b"][1 * d_model:2 * d_model]
        vb = lp["qkv_b"][2 * d_model:3 * d_model]

        blocks, bias_blocks = [], []
        for mat, bias in ((qw, qb), (kw, kb), (vw, vb)):
            for h in range(nhead):
                blocks.append(_pad2(mat[:, h * Dh:(h + 1) * Dh], Dp, HB))
                bias_blocks.append(jnp.pad(bias[h * Dh:(h + 1) * Dh], (0, HB - Dh)))
        wmats[f"qkv_w_{li}"] = jnp.concatenate(blocks, axis=1)
        vvecs[f"qkv_b_{li}"] = jnp.concatenate(bias_blocks)

        ow_blocks = [_pad2(lp["op_w"][h * Dh:(h + 1) * Dh, :], HB, Dp)
                     for h in range(nhead)]
        wmats[f"ow_{li}"] = jnp.concatenate(ow_blocks, axis=1)
        vvecs[f"op_b_{li}"] = jnp.pad(lp["op_b"], (0, Dp - d_model))

        wmats[f"l1_w_{li}"] = _pad2(lp["l1_w"], Dp, Fp)
        vvecs[f"l1_b_{li}"] = jnp.pad(lp["l1_b"], (0, Fp - dim_feedforward))
        wmats[f"l2_w_{li}"] = _pad2(lp["l2_w"], Fp, Dp)
        vvecs[f"l2_b_{li}"] = jnp.pad(lp["l2_b"], (0, Dp - d_model))
        for nm in ("ln1_g", "ln1_b", "ln2_g", "ln2_b"):
            vvecs[f"{nm}_{li}"] = jnp.pad(lp[nm], (0, Dp - d_model))

    w_slab = jnp.concatenate(
        [_pad2(wmats[name], dims["w_rows"], c) for name, _, c in w_entries],
        axis=1).astype(jnp.bfloat16)
    v_slab = jnp.concatenate(
        [vvecs[name] for name, _ in v_entries]).reshape(1, -1).astype(jnp.float32)
    posb = (jnp.pad(params["pos"], ((0, 0), (0, Dp - d_model)))
            + jnp.pad(params["in_b"], (0, Dp - d_model))[None, :]
            ).astype(jnp.float32)
    return {"w_slab": w_slab, "v_slab": v_slab, "posb": posb}


# ------------------------------------------------------------------- forward --

@functools.partial(jax.jit,
                   static_argnames=("d_model", "nhead", "num_layers",
                                    "dim_feedforward"))
def simple_transformer_forward(x, w_slab, v_slab, posb, *,
                               d_model, nhead, num_layers, dim_feedforward):
    B, S, D = x.shape
    assert D == d_model
    dims, _, w_off, _, v_off = _slab_layout(d_model, nhead, num_layers,
                                            dim_feedforward)
    Dp, Fp, HB = dims["Dp"], dims["Fp"], dims["HB"]
    BS = B * S

    x_flat = jnp.pad(x.reshape(BS, D).astype(jnp.float32),
                     ((0, 0), (0, Dp - D)))
    pos = posb[:S]

    kernel = _make_kernel(d_model, nhead, num_layers, B, S, dims, w_off, v_off)

    # Advisory cost estimate for XLA scheduling around the custom call.
    H = nhead
    flops = 2 * BS * Dp * Dp                                   # input proj
    flops += num_layers * (
        2 * BS * Dp * (3 * H * HB)                             # qkv proj
        + H * (4 * B * S * S * HB + 2 * BS * HB * Dp)          # scores+ctx+oproj
        + 2 * BS * Dp * Fp + 2 * BS * Fp * Dp)                 # ffn
    flops += 2 * BS * Dp * Dp                                  # output proj
    transcendentals = num_layers * H * B * S * S               # exp in softmax
    bytes_accessed = (BS * Dp * 4 + S * Dp * 4                 # x, pos
                      + dims["w_rows"] * dims["w_cols"] * 2    # bf16 weights
                      + dims["v_cols"] * 4                     # f32 vectors
                      + BS * Dp * 4)                           # output

    out = pl.pallas_call(
        kernel,
        out_shape=jax.ShapeDtypeStruct((BS, Dp), jnp.float32),
        in_specs=[pl.BlockSpec(memory_space=pltpu.MemorySpace.VMEM)] * 4,
        out_specs=pl.BlockSpec(memory_space=pltpu.MemorySpace.VMEM),
        cost_estimate=pl.CostEstimate(flops=flops,
                                      transcendentals=transcendentals,
                                      bytes_accessed=bytes_accessed),
    )(x_flat, pos, w_slab, v_slab)

    return out[:, :D].reshape(B, S, D)


# -------------------------------------------------------------------- driver --

if __name__ == "__main__":
    d_model = 32
    nhead = 4
    num_layers = 2
    dim_feedforward = 64
    batch, seq = 2, 8

    key = jax.random.PRNGKey(0)
    k_param, k_x = jax.random.split(key)

    params = init_params(k_param, d_model, nhead, num_layers, dim_feedforward)
    prepped = prepare_params(params, d_model=d_model, nhead=nhead,
                             num_layers=num_layers,
                             dim_feedforward=dim_feedforward)
    x = jax.random.normal(k_x, (batch, seq, d_model), dtype=jnp.float32)

    out = simple_transformer_forward(
        x, prepped["w_slab"], prepped["v_slab"], prepped["posb"],
        d_model=d_model, nhead=nhead, num_layers=num_layers,
        dim_feedforward=dim_feedforward)
    out = jax.block_until_ready(out)

    assert out.shape == (batch, seq, d_model)
    assert bool(jnp.all(jnp.isfinite(out)))
    print("KERNEL_OK")
</pallas_src>

<mosaic_0001>
module attributes {stable_mosaic.version = 11 : i64} {
  func.func @kernel(%arg0: memref<16x128xf32, #tpu.memory_space<vmem>>, %arg1: memref<8x128xf32, #tpu.memory_space<vmem>>, %arg2: memref<128x4864xbf16, #tpu.memory_space<vmem>>, %arg3: memref<1x4992xf32, #tpu.memory_space<vmem>>, %arg4: memref<16x128xf32, #tpu.memory_space<vmem>>) attributes {dimension_semantics = [], scalar_prefetch = 0 : i64, scratch_operands = 0 : i64, tpu.core_type = #tpu.core_type<tc>} {
    %0 = tpu.iota {dimensions = array<i32: 1>} : vector<1x128xi32>
    %c32_i32 = arith.constant 32 : i32
    %1 = vector.broadcast %c32_i32 : i32 to vector<1x128xi32>
    %2 = arith.cmpi slt, %0, %1 : vector<1x128xi32>
    %3 = arith.extui %2 : vector<1x128xi1> to vector<1x128xi32>
    %4 = arith.sitofp %3 : vector<1x128xi32> to vector<1x128xf32>
    %c0 = arith.constant 0 : index
    %c0_0 = arith.constant 0 : index
    %5 = vector.load %arg0[%c0, %c0_0] : memref<16x128xf32, #tpu.memory_space<vmem>>, vector<16x128xf32>
    %c0_1 = arith.constant 0 : index
    %c0_2 = arith.constant 0 : index
    %6 = vector.load %arg1[%c0_1, %c0_2] : memref<8x128xf32, #tpu.memory_space<vmem>>, vector<8x128xf32>
    %7 = tpu.concatenate %6, %6 in 0 : vector<8x128xf32>, vector<8x128xf32> -> vector<16x128xf32>
    %8 = arith.truncf %5 : vector<16x128xf32> to vector<16x128xbf16>
    %c0_3 = arith.constant 0 : index
    %c0_4 = arith.constant 0 : index
    %9 = vector.load %arg2[%c0_3, %c0_4] : memref<128x4864xbf16, #tpu.memory_space<vmem>>, vector<128x128xbf16>
    %cst = arith.constant dense<0.000000e+00> : vector<16x128xf32>
    %10 = tpu.matmul %8, %9, %cst {dimension_numbers = #tpu.dot_dimension_numbers<[1], [0], [0], [1], [0, 0, 1, 1], [], []>} : vector<16x128xbf16>, vector<128x128xbf16>, vector<16x128xf32> -> vector<16x128xf32>
    %11 = arith.addf %10, %7 : vector<16x128xf32>
    %12 = arith.truncf %11 : vector<16x128xf32> to vector<16x128xbf16>
    %c0_5 = arith.constant 0 : index
    %c128 = arith.constant 128 : index
    %13 = vector.load %arg2[%c0_5, %c128] : memref<128x4864xbf16, #tpu.memory_space<vmem>>, vector<128x1536xbf16>
    %cst_6 = arith.constant dense<0.000000e+00> : vector<16x1536xf32>
    %14 = tpu.matmul %12, %13, %cst_6 {dimension_numbers = #tpu.dot_dimension_numbers<[1], [0], [0], [1], [0, 0, 1, 1], [], []>} : vector<16x128xbf16>, vector<128x1536xbf16>, vector<16x1536xf32> -> vector<16x1536xf32>
    %c0_7 = arith.constant 0 : index
    %c128_8 = arith.constant 128 : index
    %15 = vector.load %arg3[%c0_7, %c128_8] : memref<1x4992xf32, #tpu.memory_space<vmem>>, vector<1x1536xf32>
    %16 = vector.broadcast %15 : vector<1x1536xf32> to vector<16x1536xf32>
    %17 = arith.addf %14, %16 : vector<16x1536xf32>
    %c0_9 = arith.constant 0 : index
    %c1664 = arith.constant 1664 : index
    %18 = vector.load %arg2[%c0_9, %c1664] : memref<128x4864xbf16, #tpu.memory_space<vmem>>, vector<128x512xbf16>
    %c0_10 = arith.constant 0 : index
    %c1664_11 = arith.constant 1664 : index
    %19 = vector.load %arg3[%c0_10, %c1664_11] : memref<1x4992xf32, #tpu.memory_space<vmem>>, vector<1x128xf32>
    %20 = vector.extract_strided_slice %17 {offsets = [0, 0], sizes = [16, 128], strides = [1, 1]} : vector<16x1536xf32> to vector<16x128xf32>
    %21 = vector.extract_strided_slice %17 {offsets = [0, 512], sizes = [16, 128], strides = [1, 1]} : vector<16x1536xf32> to vector<16x128xf32>
    %22 = vector.extract_strided_slice %17 {offsets = [0, 1024], sizes = [16, 128], strides = [1, 1]} : vector<16x1536xf32> to vector<16x128xf32>
    %23 = vector.shape_cast %20 : vector<16x128xf32> to vector<2x8x128xf32>
    %24 = arith.truncf %23 : vector<2x8x128xf32> to vector<2x8x128xbf16>
    %25 = vector.shape_cast %21 : vector<16x128xf32> to vector<2x8x128xf32>
    %26 = arith.truncf %25 : vector<2x8x128xf32> to vector<2x8x128xbf16>
    %27 = vector.shape_cast %22 : vector<16x128xf32> to vector<2x8x128xf32>
    %28 = arith.truncf %27 : vector<2x8x128xf32> to vector<2x8x128xbf16>
    "tpu.trace_start"() <{level = 10 : i32, message = "bqd,bkd->bqk"}> : () -> ()
    %cst_12 = arith.constant dense<0.000000e+00> : vector<2x8x8xf32>
    %29 = tpu.matmul %24, %26, %cst_12 {dimension_numbers = #tpu.dot_dimension_numbers<[2], [2], [1], [1], [0, 0, 0, 1, 1, 1], [0], [0]>} : vector<2x8x128xbf16>, vector<2x8x128xbf16>, vector<2x8x8xf32> -> vector<2x8x8xf32>
    "tpu.trace_stop"() : () -> ()
    %cst_13 = arith.constant dense<0xFF800000> : vector<2x8xf32>
    %30 = vector.multi_reduction <maximumf>, %29, %cst_13 [2] : vector<2x8x8xf32> to vector<2x8xf32>
    %31 = vector.shape_cast %30 : vector<2x8xf32> to vector<2x8x1xf32>
    %32 = vector.broadcast %31 : vector<2x8x1xf32> to vector<2x8x8xf32>
    %33 = arith.subf %29, %32 : vector<2x8x8xf32>
    %34 = math.exp %33 : vector<2x8x8xf32>
    %cst_14 = arith.constant dense<0.000000e+00> : vector<2x8xf32>
    %35 = vector.multi_reduction <add>, %34, %cst_14 [2] : vector<2x8x8xf32> to vector<2x8xf32>
    %36 = vector.shape_cast %35 : vector<2x8xf32> to vector<2x8x1xf32>
    %37 = tpu.reciprocal %36 {approx = true} : vector<2x8x1xf32> -> vector<2x8x1xf32>
    %38 = vector.broadcast %37 : vector<2x8x1xf32> to vector<2x8x8xf32>
    %39 = arith.mulf %34, %38 : vector<2x8x8xf32>
    %40 = arith.truncf %39 : vector<2x8x8xf32> to vector<2x8x8xbf16>
    "tpu.trace_start"() <{level = 10 : i32, message = "bqk,bkd->bqd"}> : () -> ()
    %cst_15 = arith.constant dense<0.000000e+00> : vector<2x8x128xf32>
    %41 = tpu.matmul %40, %28, %cst_15 {dimension_numbers = #tpu.dot_dimension_numbers<[2], [1], [1], [2], [0, 0, 0, 1, 1, 2], [0], [0]>} : vector<2x8x8xbf16>, vector<2x8x128xbf16>, vector<2x8x128xf32> -> vector<2x8x128xf32>
    "tpu.trace_stop"() : () -> ()
    %42 = vector.shape_cast %41 : vector<2x8x128xf32> to vector<16x128xf32>
    %43 = arith.truncf %42 : vector<16x128xf32> to vector<16x128xbf16>
    %44 = vector.extract_strided_slice %18 {offsets = [0, 0], sizes = [128, 128], strides = [1, 1]} : vector<128x512xbf16> to vector<128x128xbf16>
    %cst_16 = arith.constant dense<0.000000e+00> : vector<16x128xf32>
    %45 = tpu.matmul %43, %44, %cst_16 {dimension_numbers = #tpu.dot_dimension_numbers<[1], [0], [0], [1], [0, 0, 1, 1], [], []>} : vector<16x128xbf16>, vector<128x128xbf16>, vector<16x128xf32> -> vector<16x128xf32>
    %46 = vector.broadcast %19 : vector<1x128xf32> to vector<16x128xf32>
    %47 = arith.addf %46, %45 : vector<16x128xf32>
    %48 = vector.extract_strided_slice %17 {offsets = [0, 128], sizes = [16, 128], strides = [1, 1]} : vector<16x1536xf32> to vector<16x128xf32>
    %49 = vector.extract_strided_slice %17 {offsets = [0, 640], sizes = [16, 128], strides = [1, 1]} : vector<16x1536xf32> to vector<16x128xf32>
    %50 = vector.extract_strided_slice %17 {offsets = [0, 1152], sizes = [16, 128], strides = [1, 1]} : vector<16x1536xf32> to vector<16x128xf32>
    %51 = vector.shape_cast %48 : vector<16x128xf32> to vector<2x8x128xf32>
    %52 = arith.truncf %51 : vector<2x8x128xf32> to vector<2x8x128xbf16>
    %53 = vector.shape_cast %49 : vector<16x128xf32> to vector<2x8x128xf32>
    %54 = arith.truncf %53 : vector<2x8x128xf32> to vector<2x8x128xbf16>
    %55 = vector.shape_cast %50 : vector<16x128xf32> to vector<2x8x128xf32>
    %56 = arith.truncf %55 : vector<2x8x128xf32> to vector<2x8x128xbf16>
    "tpu.trace_start"() <{level = 10 : i32, message = "bqd,bkd->bqk"}> : () -> ()
    %cst_17 = arith.constant dense<0.000000e+00> : vector<2x8x8xf32>
    %57 = tpu.matmul %52, %54, %cst_17 {dimension_numbers = #tpu.dot_dimension_numbers<[2], [2], [1], [1], [0, 0, 0, 1, 1, 1], [0], [0]>} : vector<2x8x128xbf16>, vector<2x8x128xbf16>, vector<2x8x8xf32> -> vector<2x8x8xf32>
    "tpu.trace_stop"() : () -> ()
    %cst_18 = arith.constant dense<0xFF800000> : vector<2x8xf32>
    %58 = vector.multi_reduction <maximumf>, %57, %cst_18 [2] : vector<2x8x8xf32> to vector<2x8xf32>
    %59 = vector.shape_cast %58 : vector<2x8xf32> to vector<2x8x1xf32>
    %60 = vector.broadcast %59 : vector<2x8x1xf32> to vector<2x8x8xf32>
    %61 = arith.subf %57, %60 : vector<2x8x8xf32>
    %62 = math.exp %61 : vector<2x8x8xf32>
    %cst_19 = arith.constant dense<0.000000e+00> : vector<2x8xf32>
    %63 = vector.multi_reduction <add>, %62, %cst_19 [2] : vector<2x8x8xf32> to vector<2x8xf32>
    %64 = vector.shape_cast %63 : vector<2x8xf32> to vector<2x8x1xf32>
    %65 = tpu.reciprocal %64 {approx = true} : vector<2x8x1xf32> -> vector<2x8x1xf32>
    %66 = vector.broadcast %65 : vector<2x8x1xf32> to vector<2x8x8xf32>
    %67 = arith.mulf %62, %66 : vector<2x8x8xf32>
    %68 = arith.truncf %67 : vector<2x8x8xf32> to vector<2x8x8xbf16>
    "tpu.trace_start"() <{level = 10 : i32, message = "bqk,bkd->bqd"}> : () -> ()
    %cst_20 = arith.constant dense<0.000000e+00> : vector<2x8x128xf32>
    %69 = tpu.matmul %68, %56, %cst_20 {dimension_numbers = #tpu.dot_dimension_numbers<[2], [1], [1], [2], [0, 0, 0, 1, 1, 2], [0], [0]>} : vector<2x8x8xbf16>, vector<2x8x128xbf16>, vector<2x8x128xf32> -> vector<2x8x128xf32>
    "tpu.trace_stop"() : () -> ()
    %70 = vector.shape_cast %69 : vector<2x8x128xf32> to vector<16x128xf32>
    %71 = arith.truncf %70 : vector<16x128xf32> to vector<16x128xbf16>
    %72 = vector.extract_strided_slice %18 {offsets = [0, 128], sizes = [128, 128], strides = [1, 1]} : vector<128x512xbf16> to vector<128x128xbf16>
    %cst_21 = arith.constant dense<0.000000e+00> : vector<16x128xf32>
    %73 = tpu.matmul %71, %72, %cst_21 {dimension_numbers = #tpu.dot_dimension_numbers<[1], [0], [0], [1], [0, 0, 1, 1], [], []>} : vector<16x128xbf16>, vector<128x128xbf16>, vector<16x128xf32> -> vector<16x128xf32>
    %74 = arith.addf %47, %73 : vector<16x128xf32>
    %75 = vector.extract_strided_slice %17 {offsets = [0, 256], sizes = [16, 128], strides = [1, 1]} : vector<16x1536xf32> to vector<16x128xf32>
    %76 = vector.extract_strided_slice %17 {offsets = [0, 768], sizes = [16, 128], strides = [1, 1]} : vector<16x1536xf32> to vector<16x128xf32>
    %77 = vector.extract_strided_slice %17 {offsets = [0, 1280], sizes = [16, 128], strides = [1, 1]} : vector<16x1536xf32> to vector<16x128xf32>
    %78 = vector.shape_cast %75 : vector<16x128xf32> to vector<2x8x128xf32>
    %79 = arith.truncf %78 : vector<2x8x128xf32> to vector<2x8x128xbf16>
    %80 = vector.shape_cast %76 : vector<16x128xf32> to vector<2x8x128xf32>
    %81 = arith.truncf %80 : vector<2x8x128xf32> to vector<2x8x128xbf16>
    %82 = vector.shape_cast %77 : vector<16x128xf32> to vector<2x8x128xf32>
    %83 = arith.truncf %82 : vector<2x8x128xf32> to vector<2x8x128xbf16>
    "tpu.trace_start"() <{level = 10 : i32, message = "bqd,bkd->bqk"}> : () -> ()
    %cst_22 = arith.constant dense<0.000000e+00> : vector<2x8x8xf32>
    %84 = tpu.matmul %79, %81, %cst_22 {dimension_numbers = #tpu.dot_dimension_numbers<[2], [2], [1], [1], [0, 0, 0, 1, 1, 1], [0], [0]>} : vector<2x8x128xbf16>, vector<2x8x128xbf16>, vector<2x8x8xf32> -> vector<2x8x8xf32>
    "tpu.trace_stop"() : () -> ()
    %cst_23 = arith.constant dense<0xFF800000> : vector<2x8xf32>
    %85 = vector.multi_reduction <maximumf>, %84, %cst_23 [2] : vector<2x8x8xf32> to vector<2x8xf32>
    %86 = vector.shape_cast %85 : vector<2x8xf32> to vector<2x8x1xf32>
    %87 = vector.broadcast %86 : vector<2x8x1xf32> to vector<2x8x8xf32>
    %88 = arith.subf %84, %87 : vector<2x8x8xf32>
    %89 = math.exp %88 : vector<2x8x8xf32>
    %cst_24 = arith.constant dense<0.000000e+00> : vector<2x8xf32>
    %90 = vector.multi_reduction <add>, %89, %cst_24 [2] : vector<2x8x8xf32> to vector<2x8xf32>
    %91 = vector.shape_cast %90 : vector<2x8xf32> to vector<2x8x1xf32>
    %92 = tpu.reciprocal %91 {approx = true} : vector<2x8x1xf32> -> vector<2x8x1xf32>
    %93 = vector.broadcast %92 : vector<2x8x1xf32> to vector<2x8x8xf32>
    %94 = arith.mulf %89, %93 : vector<2x8x8xf32>
    %95 = arith.truncf %94 : vector<2x8x8xf32> to vector<2x8x8xbf16>
    "tpu.trace_start"() <{level = 10 : i32, message = "bqk,bkd->bqd"}> : () -> ()
    %cst_25 = arith.constant dense<0.000000e+00> : vector<2x8x128xf32>
    %96 = tpu.matmul %95, %83, %cst_25 {dimension_numbers = #tpu.dot_dimension_numbers<[2], [1], [1], [2], [0, 0, 0, 1, 1, 2], [0], [0]>} : vector<2x8x8xbf16>, vector<2x8x128xbf16>, vector<2x8x128xf32> -> vector<2x8x128xf32>
    "tpu.trace_stop"() : () -> ()
    %97 = vector.shape_cast %96 : vector<2x8x128xf32> to vector<16x128xf32>
    %98 = arith.truncf %97 : vector<16x128xf32> to vector<16x128xbf16>
    %99 = vector.extract_strided_slice %18 {offsets = [0, 256], sizes = [128, 128], strides = [1, 1]} : vector<128x512xbf16> to vector<128x128xbf16>
    %cst_26 = arith.constant dense<0.000000e+00> : vector<16x128xf32>
    %100 = tpu.matmul %98, %99, %cst_26 {dimension_numbers = #tpu.dot_dimension_numbers<[1], [0], [0], [1], [0, 0, 1, 1], [], []>} : vector<16x128xbf16>, vector<128x128xbf16>, vector<16x128xf32> -> vector<16x128xf32>
    %101 = arith.addf %74, %100 : vector<16x128xf32>
    %102 = vector.extract_strided_slice %17 {offsets = [0, 384], sizes = [16, 128], strides = [1, 1]} : vector<16x1536xf32> to vector<16x128xf32>
    %103 = vector.extract_strided_slice %17 {offsets = [0, 896], sizes = [16, 128], strides = [1, 1]} : vector<16x1536xf32> to vector<16x128xf32>
    %104 = vector.extract_strided_slice %17 {offsets = [0, 1408], sizes = [16, 128], strides = [1, 1]} : vector<16x1536xf32> to vector<16x128xf32>
    %105 = vector.shape_cast %102 : vector<16x128xf32> to vector<2x8x128xf32>
    %106 = arith.truncf %105 : vector<2x8x128xf32> to vector<2x8x128xbf16>
    %107 = vector.shape_cast %103 : vector<16x128xf32> to vector<2x8x128xf32>
    %108 = arith.truncf %107 : vector<2x8x128xf32> to vector<2x8x128xbf16>
    %109 = vector.shape_cast %104 : vector<16x128xf32> to vector<2x8x128xf32>
    %110 = arith.truncf %109 : vector<2x8x128xf32> to vector<2x8x128xbf16>
    "tpu.trace_start"() <{level = 10 : i32, message = "bqd,bkd->bqk"}> : () -> ()
    %cst_27 = arith.constant dense<0.000000e+00> : vector<2x8x8xf32>
    %111 = tpu.matmul %106, %108, %cst_27 {dimension_numbers = #tpu.dot_dimension_numbers<[2], [2], [1], [1], [0, 0, 0, 1, 1, 1], [0], [0]>} : vector<2x8x128xbf16>, vector<2x8x128xbf16>, vector<2x8x8xf32> -> vector<2x8x8xf32>
    "tpu.trace_stop"() : () -> ()
    %cst_28 = arith.constant dense<0xFF800000> : vector<2x8xf32>
    %112 = vector.multi_reduction <maximumf>, %111, %cst_28 [2] : vector<2x8x8xf32> to vector<2x8xf32>
    %113 = vector.shape_cast %112 : vector<2x8xf32> to vector<2x8x1xf32>
    %114 = vector.broadcast %113 : vector<2x8x1xf32> to vector<2x8x8xf32>
    %115 = arith.subf %111, %114 : vector<2x8x8xf32>
    %116 = math.exp %115 : vector<2x8x8xf32>
    %cst_29 = arith.constant dense<0.000000e+00> : vector<2x8xf32>
    %117 = vector.multi_reduction <add>, %116, %cst_29 [2] : vector<2x8x8xf32> to vector<2x8xf32>
    %118 = vector.shape_cast %117 : vector<2x8xf32> to vector<2x8x1xf32>
    %119 = tpu.reciprocal %118 {approx = true} : vector<2x8x1xf32> -> vector<2x8x1xf32>
    %120 = vector.broadcast %119 : vector<2x8x1xf32> to vector<2x8x8xf32>
    %121 = arith.mulf %116, %120 : vector<2x8x8xf32>
    %122 = arith.truncf %121 : vector<2x8x8xf32> to vector<2x8x8xbf16>
    "tpu.trace_start"() <{level = 10 : i32, message = "bqk,bkd->bqd"}> : () -> ()
    %cst_30 = arith.constant dense<0.000000e+00> : vector<2x8x128xf32>
    %123 = tpu.matmul %122, %110, %cst_30 {dimension_numbers = #tpu.dot_dimension_numbers<[2], [1], [1], [2], [0, 0, 0, 1, 1, 2], [0], [0]>} : vector<2x8x8xbf16>, vector<2x8x128xbf16>, vector<2x8x128xf32> -> vector<2x8x128xf32>
    "tpu.trace_stop"() : () -> ()
    %124 = vector.shape_cast %123 : vector<2x8x128xf32> to vector<16x128xf32>
    %125 = arith.truncf %124 : vector<16x128xf32> to vector<16x128xbf16>
    %126 = vector.extract_strided_slice %18 {offsets = [0, 384], sizes = [128, 128], strides = [1, 1]} : vector<128x512xbf16> to vector<128x128xbf16>
    %cst_31 = arith.constant dense<0.000000e+00> : vector<16x128xf32>
    %127 = tpu.matmul %125, %126, %cst_31 {dimension_numbers = #tpu.dot_dimension_numbers<[1], [0], [0], [1], [0, 0, 1, 1], [], []>} : vector<16x128xbf16>, vector<128x128xbf16>, vector<16x128xf32> -> vector<16x128xf32>
    %128 = arith.addf %101, %127 : vector<16x128xf32>
    %129 = arith.addf %11, %128 : vector<16x128xf32>
    %c0_32 = arith.constant 0 : index
    %c2048 = arith.constant 2048 : index
    %130 = vector.load %arg3[%c0_32, %c2048] : memref<1x4992xf32, #tpu.memory_space<vmem>>, vector<1x128xf32>
    %c0_33 = arith.constant 0 : index
    %c2176 = arith.constant 2176 : index
    %131 = vector.load %arg3[%c0_33, %c2176] : memref<1x4992xf32, #tpu.memory_space<vmem>>, vector<1x128xf32>
    %132 = vector.broadcast %4 : vector<1x128xf32> to vector<16x128xf32>
    %133 = arith.mulf %129, %132 : vector<16x128xf32>
    %cst_34 = arith.constant dense<0.000000e+00> : vector<16xf32>
    %134 = vector.multi_reduction <add>, %133, %cst_34 [1] : vector<16x128xf32> to vector<16xf32>
    %135 = vector.shape_cast %134 : vector<16xf32> to vector<16x1xf32>
    %cst_35 = arith.constant 3.125000e-02 : f32
    %136 = vector.broadcast %cst_35 : f32 to vector<16x1xf32>
    %137 = arith.mulf %135, %136 : vector<16x1xf32>
    %138 = vector.broadcast %137 : vector<16x1xf32> to vector<16x128xf32>
    %139 = arith.subf %129, %138 : vector<16x128xf32>
    %140 = vector.broadcast %4 : vector<1x128xf32> to vector<16x128xf32>
    %141 = arith.mulf %139, %140 : vector<16x128xf32>
    %142 = arith.mulf %141, %141 : vector<16x128xf32>
    %cst_36 = arith.constant dense<0.000000e+00> : vector<16xf32>
    %143 = vector.multi_reduction <add>, %142, %cst_36 [1] : vector<16x128xf32> to vector<16xf32>
    %144 = vector.shape_cast %143 : vector<16xf32> to vector<16x1xf32>
    %cst_37 = arith.constant 3.125000e-02 : f32
    %145 = vector.broadcast %cst_37 : f32 to vector<16x1xf32>
    %146 = arith.mulf %144, %145 : vector<16x1xf32>
    %cst_38 = arith.constant 9.99999974E-6 : f32
    %147 = vector.broadcast %cst_38 : f32 to vector<16x1xf32>
    %148 = arith.addf %146, %147 : vector<16x1xf32>
    %149 = math.rsqrt %148 : vector<16x1xf32>
    %150 = vector.broadcast %149 : vector<16x1xf32> to vector<16x128xf32>
    %151 = arith.mulf %141, %150 : vector<16x128xf32>
    %152 = vector.broadcast %130 : vector<1x128xf32> to vector<16x128xf32>
    %153 = arith.mulf %151, %152 : vector<16x128xf32>
    %154 = vector.broadcast %131 : vector<1x128xf32> to vector<16x128xf32>
    %155 = arith.addf %153, %154 : vector<16x128xf32>
    %156 = arith.truncf %155 : vector<16x128xf32> to vector<16x128xbf16>
    %c0_39 = arith.constant 0 : index
    %c2176_40 = arith.constant 2176 : index
    %157 = vector.load %arg2[%c0_39, %c2176_40] : memref<128x4864xbf16, #tpu.memory_space<vmem>>, vector<128x128xbf16>
    %cst_41 = arith.constant dense<0.000000e+00> : vector<16x128xf32>
    %158 = tpu.matmul %156, %157, %cst_41 {dimension_numbers = #tpu.dot_dimension_numbers<[1], [0], [0], [1], [0, 0, 1, 1], [], []>} : vector<16x128xbf16>, vector<128x128xbf16>, vector<16x128xf32> -> vector<16x128xf32>
    %c0_42 = arith.constant 0 : index
    %c1792 = arith.constant 1792 : index
    %159 = vector.load %arg3[%c0_42, %c1792] : memref<1x4992xf32, #tpu.memory_space<vmem>>, vector<1x128xf32>
    %160 = vector.broadcast %159 : vector<1x128xf32> to vector<16x128xf32>
    %161 = arith.addf %158, %160 : vector<16x128xf32>
    %cst_43 = arith.constant 0.000000e+00 : f32
    %162 = vector.broadcast %cst_43 : f32 to vector<16x128xf32>
    %163 = arith.maximumf %161, %162 : vector<16x128xf32>
    %164 = arith.truncf %163 : vector<16x128xf32> to vector<16x128xbf16>
    %c0_44 = arith.constant 0 : index
    %c2304 = arith.constant 2304 : index
    %165 = vector.load %arg2[%c0_44, %c2304] : memref<128x4864xbf16, #tpu.memory_space<vmem>>, vector<128x128xbf16>
    %cst_45 = arith.constant dense<0.000000e+00> : vector<16x128xf32>
    %166 = tpu.matmul %164, %165, %cst_45 {dimension_numbers = #tpu.dot_dimension_numbers<[1], [0], [0], [1], [0, 0, 1, 1], [], []>} : vector<16x128xbf16>, vector<128x128xbf16>, vector<16x128xf32> -> vector<16x128xf32>
    %c0_46 = arith.constant 0 : index
    %c1920 = arith.constant 1920 : index
    %167 = vector.load %arg3[%c0_46, %c1920] : memref<1x4992xf32, #tpu.memory_space<vmem>>, vector<1x128xf32>
    %168 = vector.broadcast %167 : vector<1x128xf32> to vector<16x128xf32>
    %169 = arith.addf %166, %168 : vector<16x128xf32>
    %170 = arith.addf %155, %169 : vector<16x128xf32>
    %c0_47 = arith.constant 0 : index
    %c2304_48 = arith.constant 2304 : index
    %171 = vector.load %arg3[%c0_47, %c2304_48] : memref<1x4992xf32, #tpu.memory_space<vmem>>, vector<1x128xf32>
    %c0_49 = arith.constant 0 : index
    %c2432 = arith.constant 2432 : index
    %172 = vector.load %arg3[%c0_49, %c2432] : memref<1x4992xf32, #tpu.memory_space<vmem>>, vector<1x128xf32>
    %173 = vector.broadcast %4 : vector<1x128xf32> to vector<16x128xf32>
    %174 = arith.mulf %170, %173 : vector<16x128xf32>
    %cst_50 = arith.constant dense<0.000000e+00> : vector<16xf32>
    %175 = vector.multi_reduction <add>, %174, %cst_50 [1] : vector<16x128xf32> to vector<16xf32>
    %176 = vector.shape_cast %175 : vector<16xf32> to vector<16x1xf32>
    %cst_51 = arith.constant 3.125000e-02 : f32
    %177 = vector.broadcast %cst_51 : f32 to vector<16x1xf32>
    %178 = arith.mulf %176, %177 : vector<16x1xf32>
    %179 = vector.broadcast %178 : vector<16x1xf32> to vector<16x128xf32>
    %180 = arith.subf %170, %179 : vector<16x128xf32>
    %181 = vector.broadcast %4 : vector<1x128xf32> to vector<16x128xf32>
    %182 = arith.mulf %180, %181 : vector<16x128xf32>
    %183 = arith.mulf %182, %182 : vector<16x128xf32>
    %cst_52 = arith.constant dense<0.000000e+00> : vector<16xf32>
    %184 = vector.multi_reduction <add>, %183, %cst_52 [1] : vector<16x128xf32> to vector<16xf32>
    %185 = vector.shape_cast %184 : vector<16xf32> to vector<16x1xf32>
    %cst_53 = arith.constant 3.125000e-02 : f32
    %186 = vector.broadcast %cst_53 : f32 to vector<16x1xf32>
    %187 = arith.mulf %185, %186 : vector<16x1xf32>
    %cst_54 = arith.constant 9.99999974E-6 : f32
    %188 = vector.broadcast %cst_54 : f32 to vector<16x1xf32>
    %189 = arith.addf %187, %188 : vector<16x1xf32>
    %190 = math.rsqrt %189 : vector<16x1xf32>
    %191 = vector.broadcast %190 : vector<16x1xf32> to vector<16x128xf32>
    %192 = arith.mulf %182, %191 : vector<16x128xf32>
    %193 = vector.broadcast %171 : vector<1x128xf32> to vector<16x128xf32>
    %194 = arith.mulf %192, %193 : vector<16x128xf32>
    %195 = vector.broadcast %172 : vector<1x128xf32> to vector<16x128xf32>
    %196 = arith.addf %194, %195 : vector<16x128xf32>
    %197 = arith.truncf %196 : vector<16x128xf32> to vector<16x128xbf16>
    %c0_55 = arith.constant 0 : index
    %c2432_56 = arith.constant 2432 : index
    %198 = vector.load %arg2[%c0_55, %c2432_56] : memref<128x4864xbf16, #tpu.memory_space<vmem>>, vector<128x1536xbf16>
    %cst_57 = arith.constant dense<0.000000e+00> : vector<16x1536xf32>
    %199 = tpu.matmul %197, %198, %cst_57 {dimension_numbers = #tpu.dot_dimension_numbers<[1], [0], [0], [1], [0, 0, 1, 1], [], []>} : vector<16x128xbf16>, vector<128x1536xbf16>, vector<16x1536xf32> -> vector<16x1536xf32>
    %c0_58 = arith.constant 0 : index
    %c2560 = arith.constant 2560 : index
    %200 = vector.load %arg3[%c0_58, %c2560] : memref<1x4992xf32, #tpu.memory_space<vmem>>, vector<1x1536xf32>
    %201 = vector.broadcast %200 : vector<1x1536xf32> to vector<16x1536xf32>
    %202 = arith.addf %199, %201 : vector<16x1536xf32>
    %c0_59 = arith.constant 0 : index
    %c3968 = arith.constant 3968 : index
    %203 = vector.load %arg2[%c0_59, %c3968] : memref<128x4864xbf16, #tpu.memory_space<vmem>>, vector<128x512xbf16>
    %c0_60 = arith.constant 0 : index
    %c4096 = arith.constant 4096 : index
    %204 = vector.load %arg3[%c0_60, %c4096] : memref<1x4992xf32, #tpu.memory_space<vmem>>, vector<1x128xf32>
    %205 = vector.extract_strided_slice %202 {offsets = [0, 0], sizes = [16, 128], strides = [1, 1]} : vector<16x1536xf32> to vector<16x128xf32>
    %206 = vector.extract_strided_slice %202 {offsets = [0, 512], sizes = [16, 128], strides = [1, 1]} : vector<16x1536xf32> to vector<16x128xf32>
    %207 = vector.extract_strided_slice %202 {offsets = [0, 1024], sizes = [16, 128], strides = [1, 1]} : vector<16x1536xf32> to vector<16x128xf32>
    %208 = vector.shape_cast %205 : vector<16x128xf32> to vector<2x8x128xf32>
    %209 = arith.truncf %208 : vector<2x8x128xf32> to vector<2x8x128xbf16>
    %210 = vector.shape_cast %206 : vector<16x128xf32> to vector<2x8x128xf32>
    %211 = arith.truncf %210 : vector<2x8x128xf32> to vector<2x8x128xbf16>
    %212 = vector.shape_cast %207 : vector<16x128xf32> to vector<2x8x128xf32>
    %213 = arith.truncf %212 : vector<2x8x128xf32> to vector<2x8x128xbf16>
    "tpu.trace_start"() <{level = 10 : i32, message = "bqd,bkd->bqk"}> : () -> ()
    %cst_61 = arith.constant dense<0.000000e+00> : vector<2x8x8xf32>
    %214 = tpu.matmul %209, %211, %cst_61 {dimension_numbers = #tpu.dot_dimension_numbers<[2], [2], [1], [1], [0, 0, 0, 1, 1, 1], [0], [0]>} : vector<2x8x128xbf16>, vector<2x8x128xbf16>, vector<2x8x8xf32> -> vector<2x8x8xf32>
    "tpu.trace_stop"() : () -> ()
    %cst_62 = arith.constant dense<0xFF800000> : vector<2x8xf32>
    %215 = vector.multi_reduction <maximumf>, %214, %cst_62 [2] : vector<2x8x8xf32> to vector<2x8xf32>
    %216 = vector.shape_cast %215 : vector<2x8xf32> to vector<2x8x1xf32>
    %217 = vector.broadcast %216 : vector<2x8x1xf32> to vector<2x8x8xf32>
    %218 = arith.subf %214, %217 : vector<2x8x8xf32>
    %219 = math.exp %218 : vector<2x8x8xf32>
    %cst_63 = arith.constant dense<0.000000e+00> : vector<2x8xf32>
    %220 = vector.multi_reduction <add>, %219, %cst_63 [2] : vector<2x8x8xf32> to vector<2x8xf32>
    %221 = vector.shape_cast %220 : vector<2x8xf32> to vector<2x8x1xf32>
    %222 = tpu.reciprocal %221 {approx = true} : vector<2x8x1xf32> -> vector<2x8x1xf32>
    %223 = vector.broadcast %222 : vector<2x8x1xf32> to vector<2x8x8xf32>
    %224 = arith.mulf %219, %223 : vector<2x8x8xf32>
    %225 = arith.truncf %224 : vector<2x8x8xf32> to vector<2x8x8xbf16>
    "tpu.trace_start"() <{level = 10 : i32, message = "bqk,bkd->bqd"}> : () -> ()
    %cst_64 = arith.constant dense<0.000000e+00> : vector<2x8x128xf32>
    %226 = tpu.matmul %225, %213, %cst_64 {dimension_numbers = #tpu.dot_dimension_numbers<[2], [1], [1], [2], [0, 0, 0, 1, 1, 2], [0], [0]>} : vector<2x8x8xbf16>, vector<2x8x128xbf16>, vector<2x8x128xf32> -> vector<2x8x128xf32>
    "tpu.trace_stop"() : () -> ()
    %227 = vector.shape_cast %226 : vector<2x8x128xf32> to vector<16x128xf32>
    %228 = arith.truncf %227 : vector<16x128xf32> to vector<16x128xbf16>
    %229 = vector.extract_strided_slice %203 {offsets = [0, 0], sizes = [128, 128], strides = [1, 1]} : vector<128x512xbf16> to vector<128x128xbf16>
    %cst_65 = arith.constant dense<0.000000e+00> : vector<16x128xf32>
    %230 = tpu.matmul %228, %229, %cst_65 {dimension_numbers = #tpu.dot_dimension_numbers<[1], [0], [0], [1], [0, 0, 1, 1], [], []>} : vector<16x128xbf16>, vector<128x128xbf16>, vector<16x128xf32> -> vector<16x128xf32>
    %231 = vector.broadcast %204 : vector<1x128xf32> to vector<16x128xf32>
    %232 = arith.addf %231, %230 : vector<16x128xf32>
    %233 = vector.extract_strided_slice %202 {offsets = [0, 128], sizes = [16, 128], strides = [1, 1]} : vector<16x1536xf32> to vector<16x128xf32>
    %234 = vector.extract_strided_slice %202 {offsets = [0, 640], sizes = [16, 128], strides = [1, 1]} : vector<16x1536xf32> to vector<16x128xf32>
    %235 = vector.extract_strided_slice %202 {offsets = [0, 1152], sizes = [16, 128], strides = [1, 1]} : vector<16x1536xf32> to vector<16x128xf32>
    %236 = vector.shape_cast %233 : vector<16x128xf32> to vector<2x8x128xf32>
    %237 = arith.truncf %236 : vector<2x8x128xf32> to vector<2x8x128xbf16>
    %238 = vector.shape_cast %234 : vector<16x128xf32> to vector<2x8x128xf32>
    %239 = arith.truncf %238 : vector<2x8x128xf32> to vector<2x8x128xbf16>
    %240 = vector.shape_cast %235 : vector<16x128xf32> to vector<2x8x128xf32>
    %241 = arith.truncf %240 : vector<2x8x128xf32> to vector<2x8x128xbf16>
    "tpu.trace_start"() <{level = 10 : i32, message = "bqd,bkd->bqk"}> : () -> ()
    %cst_66 = arith.constant dense<0.000000e+00> : vector<2x8x8xf32>
    %242 = tpu.matmul %237, %239, %cst_66 {dimension_numbers = #tpu.dot_dimension_numbers<[2], [2], [1], [1], [0, 0, 0, 1, 1, 1], [0], [0]>} : vector<2x8x128xbf16>, vector<2x8x128xbf16>, vector<2x8x8xf32> -> vector<2x8x8xf32>
    "tpu.trace_stop"() : () -> ()
    %cst_67 = arith.constant dense<0xFF800000> : vector<2x8xf32>
    %243 = vector.multi_reduction <maximumf>, %242, %cst_67 [2] : vector<2x8x8xf32> to vector<2x8xf32>
    %244 = vector.shape_cast %243 : vector<2x8xf32> to vector<2x8x1xf32>
    %245 = vector.broadcast %244 : vector<2x8x1xf32> to vector<2x8x8xf32>
    %246 = arith.subf %242, %245 : vector<2x8x8xf32>
    %247 = math.exp %246 : vector<2x8x8xf32>
    %cst_68 = arith.constant dense<0.000000e+00> : vector<2x8xf32>
    %248 = vector.multi_reduction <add>, %247, %cst_68 [2] : vector<2x8x8xf32> to vector<2x8xf32>
    %249 = vector.shape_cast %248 : vector<2x8xf32> to vector<2x8x1xf32>
    %250 = tpu.reciprocal %249 {approx = true} : vector<2x8x1xf32> -> vector<2x8x1xf32>
    %251 = vector.broadcast %250 : vector<2x8x1xf32> to vector<2x8x8xf32>
    %252 = arith.mulf %247, %251 : vector<2x8x8xf32>
    %253 = arith.truncf %252 : vector<2x8x8xf32> to vector<2x8x8xbf16>
    "tpu.trace_start"() <{level = 10 : i32, message = "bqk,bkd->bqd"}> : () -> ()
    %cst_69 = arith.constant dense<0.000000e+00> : vector<2x8x128xf32>
    %254 = tpu.matmul %253, %241, %cst_69 {dimension_numbers = #tpu.dot_dimension_numbers<[2], [1], [1], [2], [0, 0, 0, 1, 1, 2], [0], [0]>} : vector<2x8x8xbf16>, vector<2x8x128xbf16>, vector<2x8x128xf32> -> vector<2x8x128xf32>
    "tpu.trace_stop"() : () -> ()
    %255 = vector.shape_cast %254 : vector<2x8x128xf32> to vector<16x128xf32>
    %256 = arith.truncf %255 : vector<16x128xf32> to vector<16x128xbf16>
    %257 = vector.extract_strided_slice %203 {offsets = [0, 128], sizes = [128, 128], strides = [1, 1]} : vector<128x512xbf16> to vector<128x128xbf16>
    %cst_70 = arith.constant dense<0.000000e+00> : vector<16x128xf32>
    %258 = tpu.matmul %256, %257, %cst_70 {dimension_numbers = #tpu.dot_dimension_numbers<[1], [0], [0], [1], [0, 0, 1, 1], [], []>} : vector<16x128xbf16>, vector<128x128xbf16>, vector<16x128xf32> -> vector<16x128xf32>
    %259 = arith.addf %232, %258 : vector<16x128xf32>
    %260 = vector.extract_strided_slice %202 {offsets = [0, 256], sizes = [16, 128], strides = [1, 1]} : vector<16x1536xf32> to vector<16x128xf32>
    %261 = vector.extract_strided_slice %202 {offsets = [0, 768], sizes = [16, 128], strides = [1, 1]} : vector<16x1536xf32> to vector<16x128xf32>
    %262 = vector.extract_strided_slice %202 {offsets = [0, 1280], sizes = [16, 128], strides = [1, 1]} : vector<16x1536xf32> to vector<16x128xf32>
    %263 = vector.shape_cast %260 : vector<16x128xf32> to vector<2x8x128xf32>
    %264 = arith.truncf %263 : vector<2x8x128xf32> to vector<2x8x128xbf16>
    %265 = vector.shape_cast %261 : vector<16x128xf32> to vector<2x8x128xf32>
    %266 = arith.truncf %265 : vector<2x8x128xf32> to vector<2x8x128xbf16>
    %267 = vector.shape_cast %262 : vector<16x128xf32> to vector<2x8x128xf32>
    %268 = arith.truncf %267 : vector<2x8x128xf32> to vector<2x8x128xbf16>
    "tpu.trace_start"() <{level = 10 : i32, message = "bqd,bkd->bqk"}> : () -> ()
    %cst_71 = arith.constant dense<0.000000e+00> : vector<2x8x8xf32>
    %269 = tpu.matmul %264, %266, %cst_71 {dimension_numbers = #tpu.dot_dimension_numbers<[2], [2], [1], [1], [0, 0, 0, 1, 1, 1], [0], [0]>} : vector<2x8x128xbf16>, vector<2x8x128xbf16>, vector<2x8x8xf32> -> vector<2x8x8xf32>
    "tpu.trace_stop"() : () -> ()
    %cst_72 = arith.constant dense<0xFF800000> : vector<2x8xf32>
    %270 = vector.multi_reduction <maximumf>, %269, %cst_72 [2] : vector<2x8x8xf32> to vector<2x8xf32>
    %271 = vector.shape_cast %270 : vector<2x8xf32> to vector<2x8x1xf32>
    %272 = vector.broadcast %271 : vector<2x8x1xf32> to vector<2x8x8xf32>
    %273 = arith.subf %269, %272 : vector<2x8x8xf32>
    %274 = math.exp %273 : vector<2x8x8xf32>
    %cst_73 = arith.constant dense<0.000000e+00> : vector<2x8xf32>
    %275 = vector.multi_reduction <add>, %274, %cst_73 [2] : vector<2x8x8xf32> to vector<2x8xf32>
    %276 = vector.shape_cast %275 : vector<2x8xf32> to vector<2x8x1xf32>
    %277 = tpu.reciprocal %276 {approx = true} : vector<2x8x1xf32> -> vector<2x8x1xf32>
    %278 = vector.broadcast %277 : vector<2x8x1xf32> to vector<2x8x8xf32>
    %279 = arith.mulf %274, %278 : vector<2x8x8xf32>
    %280 = arith.truncf %279 : vector<2x8x8xf32> to vector<2x8x8xbf16>
    "tpu.trace_start"() <{level = 10 : i32, message = "bqk,bkd->bqd"}> : () -> ()
    %cst_74 = arith.constant dense<0.000000e+00> : vector<2x8x128xf32>
    %281 = tpu.matmul %280, %268, %cst_74 {dimension_numbers = #tpu.dot_dimension_numbers<[2], [1], [1], [2], [0, 0, 0, 1, 1, 2], [0], [0]>} : vector<2x8x8xbf16>, vector<2x8x128xbf16>, vector<2x8x128xf32> -> vector<2x8x128xf32>
    "tpu.trace_stop"() : () -> ()
    %282 = vector.shape_cast %281 : vector<2x8x128xf32> to vector<16x128xf32>
    %283 = arith.truncf %282 : vector<16x128xf32> to vector<16x128xbf16>
    %284 = vector.extract_strided_slice %203 {offsets = [0, 256], sizes = [128, 128], strides = [1, 1]} : vector<128x512xbf16> to vector<128x128xbf16>
    %cst_75 = arith.constant dense<0.000000e+00> : vector<16x128xf32>
    %285 = tpu.matmul %283, %284, %cst_75 {dimension_numbers = #tpu.dot_dimension_numbers<[1], [0], [0], [1], [0, 0, 1, 1], [], []>} : vector<16x128xbf16>, vector<128x128xbf16>, vector<16x128xf32> -> vector<16x128xf32>
    %286 = arith.addf %259, %285 : vector<16x128xf32>
    %287 = vector.extract_strided_slice %202 {offsets = [0, 384], sizes = [16, 128], strides = [1, 1]} : vector<16x1536xf32> to vector<16x128xf32>
    %288 = vector.extract_strided_slice %202 {offsets = [0, 896], sizes = [16, 128], strides = [1, 1]} : vector<16x1536xf32> to vector<16x128xf32>
    %289 = vector.extract_strided_slice %202 {offsets = [0, 1408], sizes = [16, 128], strides = [1, 1]} : vector<16x1536xf32> to vector<16x128xf32>
    %290 = vector.shape_cast %287 : vector<16x128xf32> to vector<2x8x128xf32>
    %291 = arith.truncf %290 : vector<2x8x128xf32> to vector<2x8x128xbf16>
    %292 = vector.shape_cast %288 : vector<16x128xf32> to vector<2x8x128xf32>
    %293 = arith.truncf %292 : vector<2x8x128xf32> to vector<2x8x128xbf16>
    %294 = vector.shape_cast %289 : vector<16x128xf32> to vector<2x8x128xf32>
    %295 = arith.truncf %294 : vector<2x8x128xf32> to vector<2x8x128xbf16>
    "tpu.trace_start"() <{level = 10 : i32, message = "bqd,bkd->bqk"}> : () -> ()
    %cst_76 = arith.constant dense<0.000000e+00> : vector<2x8x8xf32>
    %296 = tpu.matmul %291, %293, %cst_76 {dimension_numbers = #tpu.dot_dimension_numbers<[2], [2], [1], [1], [0, 0, 0, 1, 1, 1], [0], [0]>} : vector<2x8x128xbf16>, vector<2x8x128xbf16>, vector<2x8x8xf32> -> vector<2x8x8xf32>
    "tpu.trace_stop"() : () -> ()
    %cst_77 = arith.constant dense<0xFF800000> : vector<2x8xf32>
    %297 = vector.multi_reduction <maximumf>, %296, %cst_77 [2] : vector<2x8x8xf32> to vector<2x8xf32>
    %298 = vector.shape_cast %297 : vector<2x8xf32> to vector<2x8x1xf32>
    %299 = vector.broadcast %298 : vector<2x8x1xf32> to vector<2x8x8xf32>
    %300 = arith.subf %296, %299 : vector<2x8x8xf32>
    %301 = math.exp %300 : vector<2x8x8xf32>
    %cst_78 = arith.constant dense<0.000000e+00> : vector<2x8xf32>
    %302 = vector.multi_reduction <add>, %301, %cst_78 [2] : vector<2x8x8xf32> to vector<2x8xf32>
    %303 = vector.shape_cast %302 : vector<2x8xf32> to vector<2x8x1xf32>
    %304 = tpu.reciprocal %303 {approx = true} : vector<2x8x1xf32> -> vector<2x8x1xf32>
    %305 = vector.broadcast %304 : vector<2x8x1xf32> to vector<2x8x8xf32>
    %306 = arith.mulf %301, %305 : vector<2x8x8xf32>
    %307 = arith.truncf %306 : vector<2x8x8xf32> to vector<2x8x8xbf16>
    "tpu.trace_start"() <{level = 10 : i32, message = "bqk,bkd->bqd"}> : () -> ()
    %cst_79 = arith.constant dense<0.000000e+00> : vector<2x8x128xf32>
    %308 = tpu.matmul %307, %295, %cst_79 {dimension_numbers = #tpu.dot_dimension_numbers<[2], [1], [1], [2], [0, 0, 0, 1, 1, 2], [0], [0]>} : vector<2x8x8xbf16>, vector<2x8x128xbf16>, vector<2x8x128xf32> -> vector<2x8x128xf32>
    "tpu.trace_stop"() : () -> ()
    %309 = vector.shape_cast %308 : vector<2x8x128xf32> to vector<16x128xf32>
    %310 = arith.truncf %309 : vector<16x128xf32> to vector<16x128xbf16>
    %311 = vector.extract_strided_slice %203 {offsets = [0, 384], sizes = [128, 128], strides = [1, 1]} : vector<128x512xbf16> to vector<128x128xbf16>
    %cst_80 = arith.constant dense<0.000000e+00> : vector<16x128xf32>
    %312 = tpu.matmul %310, %311, %cst_80 {dimension_numbers = #tpu.dot_dimension_numbers<[1], [0], [0], [1], [0, 0, 1, 1], [], []>} : vector<16x128xbf16>, vector<128x128xbf16>, vector<16x128xf32> -> vector<16x128xf32>
    %313 = arith.addf %286, %312 : vector<16x128xf32>
    %314 = arith.addf %196, %313 : vector<16x128xf32>
    %c0_81 = arith.constant 0 : index
    %c4480 = arith.constant 4480 : index
    %315 = vector.load %arg3[%c0_81, %c4480] : memref<1x4992xf32, #tpu.memory_space<vmem>>, vector<1x128xf32>
    %c0_82 = arith.constant 0 : index
    %c4608 = arith.constant 4608 : index
    %316 = vector.load %arg3[%c0_82, %c4608] : memref<1x4992xf32, #tpu.memory_space<vmem>>, vector<1x128xf32>
    %317 = vector.broadcast %4 : vector<1x128xf32> to vector<16x128xf32>
    %318 = arith.mulf %314, %317 : vector<16x128xf32>
    %cst_83 = arith.constant dense<0.000000e+00> : vector<16xf32>
    %319 = vector.multi_reduction <add>, %318, %cst_83 [1] : vector<16x128xf32> to vector<16xf32>
    %320 = vector.shape_cast %319 : vector<16xf32> to vector<16x1xf32>
    %cst_84 = arith.constant 3.125000e-02 : f32
    %321 = vector.broadcast %cst_84 : f32 to vector<16x1xf32>
    %322 = arith.mulf %320, %321 : vector<16x1xf32>
    %323 = vector.broadcast %322 : vector<16x1xf32> to vector<16x128xf32>
    %324 = arith.subf %314, %323 : vector<16x128xf32>
    %325 = vector.broadcast %4 : vector<1x128xf32> to vector<16x128xf32>
    %326 = arith.mulf %324, %325 : vector<16x128xf32>
    %327 = arith.mulf %326, %326 : vector<16x128xf32>
    %cst_85 = arith.constant dense<0.000000e+00> : vector<16xf32>
    %328 = vector.multi_reduction <add>, %327, %cst_85 [1] : vector<16x128xf32> to vector<16xf32>
    %329 = vector.shape_cast %328 : vector<16xf32> to vector<16x1xf32>
    %cst_86 = arith.constant 3.125000e-02 : f32
    %330 = vector.broadcast %cst_86 : f32 to vector<16x1xf32>
    %331 = arith.mulf %329, %330 : vector<16x1xf32>
    %cst_87 = arith.constant 9.99999974E-6 : f32
    %332 = vector.broadcast %cst_87 : f32 to vector<16x1xf32>
    %333 = arith.addf %331, %332 : vector<16x1xf32>
    %334 = math.rsqrt %333 : vector<16x1xf32>
    %335 = vector.broadcast %334 : vector<16x1xf32> to vector<16x128xf32>
    %336 = arith.mulf %326, %335 : vector<16x128xf32>
    %337 = vector.broadcast %315 : vector<1x128xf32> to vector<16x128xf32>
    %338 = arith.mulf %336, %337 : vector<16x128xf32>
    %339 = vector.broadcast %316 : vector<1x128xf32> to vector<16x128xf32>
    %340 = arith.addf %338, %339 : vector<16x128xf32>
    %341 = arith.truncf %340 : vector<16x128xf32> to vector<16x128xbf16>
    %c0_88 = arith.constant 0 : index
    %c4480_89 = arith.constant 4480 : index
    %342 = vector.load %arg2[%c0_88, %c4480_89] : memref<128x4864xbf16, #tpu.memory_space<vmem>>, vector<128x128xbf16>
    %cst_90 = arith.constant dense<0.000000e+00> : vector<16x128xf32>
    %343 = tpu.matmul %341, %342, %cst_90 {dimension_numbers = #tpu.dot_dimension_numbers<[1], [0], [0], [1], [0, 0, 1, 1], [], []>} : vector<16x128xbf16>, vector<128x128xbf16>, vector<16x128xf32> -> vector<16x128xf32>
    %c0_91 = arith.constant 0 : index
    %c4224 = arith.constant 4224 : index
    %344 = vector.load %arg3[%c0_91, %c4224] : memref<1x4992xf32, #tpu.memory_space<vmem>>, vector<1x128xf32>
    %345 = vector.broadcast %344 : vector<1x128xf32> to vector<16x128xf32>
    %346 = arith.addf %343, %345 : vector<16x128xf32>
    %cst_92 = arith.constant 0.000000e+00 : f32
    %347 = vector.broadcast %cst_92 : f32 to vector<16x128xf32>
    %348 = arith.maximumf %346, %347 : vector<16x128xf32>
    %349 = arith.truncf %348 : vector<16x128xf32> to vector<16x128xbf16>
    %c0_93 = arith.constant 0 : index
    %c4608_94 = arith.constant 4608 : index
    %350 = vector.load %arg2[%c0_93, %c4608_94] : memref<128x4864xbf16, #tpu.memory_space<vmem>>, vector<128x128xbf16>
    %cst_95 = arith.constant dense<0.000000e+00> : vector<16x128xf32>
    %351 = tpu.matmul %349, %350, %cst_95 {dimension_numbers = #tpu.dot_dimension_numbers<[1], [0], [0], [1], [0, 0, 1, 1], [], []>} : vector<16x128xbf16>, vector<128x128xbf16>, vector<16x128xf32> -> vector<16x128xf32>
    %c0_96 = arith.constant 0 : index
    %c4352 = arith.constant 4352 : index
    %352 = vector.load %arg3[%c0_96, %c4352] : memref<1x4992xf32, #tpu.memory_space<vmem>>, vector<1x128xf32>
    %353 = vector.broadcast %352 : vector<1x128xf32> to vector<16x128xf32>
    %354 = arith.addf %351, %353 : vector<16x128xf32>
    %355 = arith.addf %340, %354 : vector<16x128xf32>
    %c0_97 = arith.constant 0 : index
    %c4736 = arith.constant 4736 : index
    %356 = vector.load %arg3[%c0_97, %c4736] : memref<1x4992xf32, #tpu.memory_space<vmem>>, vector<1x128xf32>
    %c0_98 = arith.constant 0 : index
    %c4864 = arith.constant 4864 : index
    %357 = vector.load %arg3[%c0_98, %c4864] : memref<1x4992xf32, #tpu.memory_space<vmem>>, vector<1x128xf32>
    %358 = vector.broadcast %4 : vector<1x128xf32> to vector<16x128xf32>
    %359 = arith.mulf %355, %358 : vector<16x128xf32>
    %cst_99 = arith.constant dense<0.000000e+00> : vector<16xf32>
    %360 = vector.multi_reduction <add>, %359, %cst_99 [1] : vector<16x128xf32> to vector<16xf32>
    %361 = vector.shape_cast %360 : vector<16xf32> to vector<16x1xf32>
    %cst_100 = arith.constant 3.125000e-02 : f32
    %362 = vector.broadcast %cst_100 : f32 to vector<16x1xf32>
    %363 = arith.mulf %361, %362 : vector<16x1xf32>
    %364 = vector.broadcast %363 : vector<16x1xf32> to vector<16x128xf32>
    %365 = arith.subf %355, %364 : vector<16x128xf32>
    %366 = vector.broadcast %4 : vector<1x128xf32> to vector<16x128xf32>
    %367 = arith.mulf %365, %366 : vector<16x128xf32>
    %368 = arith.mulf %367, %367 : vector<16x128xf32>
    %cst_101 = arith.constant dense<0.000000e+00> : vector<16xf32>
    %369 = vector.multi_reduction <add>, %368, %cst_101 [1] : vector<16x128xf32> to vector<16xf32>
    %370 = vector.shape_cast %369 : vector<16xf32> to vector<16x1xf32>
    %cst_102 = arith.constant 3.125000e-02 : f32
    %371 = vector.broadcast %cst_102 : f32 to vector<16x1xf32>
    %372 = arith.mulf %370, %371 : vector<16x1xf32>
    %cst_103 = arith.constant 9.99999974E-6 : f32
    %373 = vector.broadcast %cst_103 : f32 to vector<16x1xf32>
    %374 = arith.addf %372, %373 : vector<16x1xf32>
    %375 = math.rsqrt %374 : vector<16x1xf32>
    %376 = vector.broadcast %375 : vector<16x1xf32> to vector<16x128xf32>
    %377 = arith.mulf %367, %376 : vector<16x128xf32>
    %378 = vector.broadcast %356 : vector<1x128xf32> to vector<16x128xf32>
    %379 = arith.mulf %377, %378 : vector<16x128xf32>
    %380 = vector.broadcast %357 : vector<1x128xf32> to vector<16x128xf32>
    %381 = arith.addf %379, %380 : vector<16x128xf32>
    %382 = arith.truncf %381 : vector<16x128xf32> to vector<16x128xbf16>
    %c0_104 = arith.constant 0 : index
    %c4736_105 = arith.constant 4736 : index
    %383 = vector.load %arg2[%c0_104, %c4736_105] : memref<128x4864xbf16, #tpu.memory_space<vmem>>, vector<128x128xbf16>
    %cst_106 = arith.constant dense<0.000000e+00> : vector<16x128xf32>
    %384 = tpu.matmul %382, %383, %cst_106 {dimension_numbers = #tpu.dot_dimension_numbers<[1], [0], [0], [1], [0, 0, 1, 1], [], []>} : vector<16x128xbf16>, vector<128x128xbf16>, vector<16x128xf32> -> vector<16x128xf32>
    %c0_107 = arith.constant 0 : index
    %c0_108 = arith.constant 0 : index
    %385 = vector.load %arg3[%c0_107, %c0_108] : memref<1x4992xf32, #tpu.memory_space<vmem>>, vector<1x128xf32>
    %386 = vector.broadcast %385 : vector<1x128xf32> to vector<16x128xf32>
    %387 = arith.addf %384, %386 : vector<16x128xf32>
    %c0_109 = arith.constant 0 : index
    %c0_110 = arith.constant 0 : index
    %388 = vector.load %arg4[%c0_109, %c0_110] : memref<16x128xf32, #tpu.memory_space<vmem>>, vector<16x128xf32>
    tpu.vector_store %arg4[%c0_109, %c0_110], %387 {strides = array<i32>} : memref<16x128xf32, #tpu.memory_space<vmem>>, vector<16x128xf32>,
    return
  }
}

</mosaic_0001>

<bundles_post_ra>
// kernel: simple_transformer_forward.1
= control target key start
LH: loop header
LB: loop body
LE: loop exit
PB: predicated region body
PF: predicated region fallthrough
CT: control target
= control target key end

     0   :  { %9 = vsyncpa [#allocation3], 0  ;;  %s5706_s0 = inlined_call_operand.vmem [shape: f32[16,128], index: 0, kind: input, shape index: {}]   ;;  %s5707_s1 = inlined_call_operand.vmem [shape: f32[8,128], index: 1, kind: input, shape index: {}]   ;;  %s5708_s2 = inlined_call_operand.hbm [shape: bf16[128,4864], index: 2, kind: input, shape index: {}]   ;;  %s5709_s3 = inlined_call_operand.hbm [shape: f32[1,4992], index: 3, kind: input, shape index: {}]   ;;  %s5710_s4 = inlined_call_operand.vmem [shape: f32[16,128], index: 4, kind: output, shape index: {}]  }
   0x1   :  { %s19_s17 = sshll.u32 %s5708_s2, 4  ;;  %s20_s17 = int_to_ptr.hbm [resolvable:$true] %s19_s17 }
   0x2   :  { %10 = vsyncpa [#allocation5], 0  ;;  %s5311_s18 = smov [#allocation2]   ;;  %s33_s22 = sshll.u32 %s5709_s3, 4  ;;  %s34_s22 = int_to_ptr.hbm [resolvable:$true] %s33_s22 }
   0x3   :  { %s21_s19 = sshll.u32 %s5311_s18, 4  ;;  %s5312_s23 = smov 2432   ;;  %s22_s19 = int_to_ptr.vmem [resolvable:$true] %s21_s19 }
   0x4   :  { %s5313_s24 = smov 152   ;;  %s5314_s25 = smov [#allocation4]  }
   0x5   :  { %27 = dma.hbm_to_vmem [thread:$0]  %s20_s17, 38912, %s22_s19, [#allocation3], %s5312_s23, %s5312_s23, %s5313_s24  }
   0x6   :  { %s35_s26 = sshll.u32 %s5314_s25, 4  ;;  %s36_s26 = int_to_ptr.vmem [resolvable:$true] %s35_s26 }
   0x7   :  { %38 = dma.hbm_to_vmem [thread:$0]  %s34_s22, 624, %s36_s26, [#allocation5]  }
   0x8   :  { %5307 = dma.done.wait [#allocation3], 38912  }
   0x9   :  { %5308 = vsyncadd [#allocation3], 4294928384 }
   0xa   :  { %5309 = dma.done.wait [#allocation5], 624  }
   0xb   :  { %5310 = vsyncadd [#allocation5], 4294966672  ;;  %v3653_v0 = vld [vmem:[#allocation2 + $0x850] sm:$0xf]  ;;  %v4862_v1 = vld [vmem:[#allocation2 + $0x8e4] sm:$0xf0] }
   0xc   :  { %v3649_v2 = vld [vmem:[#allocation2 + $0x720] sm:$0xf]  ;;  %v3654_v3 = vor.u32 %v4862_v1, %v3653_v0  ;;  %v4861_v4 = vld [vmem:[#allocation2 + $0x7b4] sm:$0xf0]  ;;  %v3645_v6 = vld [vmem:[#allocation2 + $0x5f0] sm:$0xf] }
   0xd   :  { %v3650_v5 = vor.u32 %v4861_v4, %v3649_v2  ;;  %v4860_v7 = vld [vmem:[#allocation2 + $0x684] sm:$0xf0]  ;;  %v3993_v8 = vld [vmem:[#allocation2 + $0x854] sm:$0xf]  ;;  %v4953_v9 = vld [vmem:[#allocation2 + $0x8e8] sm:$0xf0] }
   0xe   :  { %121 = vmatpush.bf16.msra.mxu0 %v3654_v3  ;;  %v4947_v10 = vld [vmem:[#allocation2 + $0x858] sm:$0xf]  ;;  %v3646_v11 = vor.u32 %v4860_v7, %v3645_v6  ;;  %v3994_v12 = vor.u32 %v4953_v9, %v3993_v8  ;;  %v3995_v13 = vld [vmem:[#allocation2 + $0x8ec] sm:$0xf0]  ;;  %v4001_v14 = vld [vmem:[#allocation2 + $0x85c] sm:$0xf] }
   0xf   :  { %v4954_v15 = vld [vmem:[#allocation2 + $0x8f0] sm:$0xf0]  ;;  %v3641_v16 = vld [vmem:[#allocation2 + $0x4c0] sm:$0xf]  ;;  %v4859_v17 = vld [vmem:[#allocation2 + $0x554] sm:$0xf0]  ;;  %v3998_v18 = vor.u32 %v4947_v10, %v3995_v13 }
  0x10   :  { %v4002_v19 = vor.u32 %v4954_v15, %v4001_v14  ;;  %v3945_v20 = vld [vmem:[#allocation2 + $0x724] sm:$0xf]  ;;  %740 = vmatpush.bf16.msra.mxu1 %v3994_v12  ;;  %v4941_v21 = vld [vmem:[#allocation2 + $0x7b8] sm:$0xf0]  ;;  %v4935_v22 = vld [vmem:[#allocation2 + $0x728] sm:$0xf]  ;;  %v3642_v29 = vor.u32 %v4859_v17, %v3641_v16 }
  0x11   :  { %v3947_v23 = vld [vmem:[#allocation2 + $0x7bc] sm:$0xf0]  ;;  %v3637_v24 = vld [vmem:[#allocation2 + $0x390] sm:$0xf]  ;;  %754 = vmatpush.bf16.msra.mxu2 %v3998_v18  ;;  %v3946_v25 = vor.u32 %v4941_v21, %v3945_v20  ;;  %v3953_v27 = vld [vmem:[#allocation2 + $0x72c] sm:$0xf] }
  0x12   :  { %122 = vmatpush.bf16.msra.mxu0 %v3650_v5  ;;  %768 = vmatpush.bf16.msra.mxu3 %v4002_v19  ;;  %v3950_v26 = vor.u32 %v4935_v22, %v3947_v23  ;;  %v4942_v28 = vld [vmem:[#allocation2 + $0x7c0] sm:$0xf0]  ;;  %v4858_v30 = vld [vmem:[#allocation2 + $0x424] sm:$0xf0]  ;;  %v3897_v32 = vld [vmem:[#allocation2 + $0x5f4] sm:$0xf] }
  0x13   :  { %v3954_v31 = vor.u32 %v4942_v28, %v3953_v27  ;;  %v4929_v33 = vld [vmem:[#allocation2 + $0x688] sm:$0xf0]  ;;  %v4923_v34 = vld [vmem:[#allocation2 + $0x5f8] sm:$0xf]  ;;  %v3899_v35 = vld [vmem:[#allocation2 + $0x68c] sm:$0xf0]  ;;  %v3638_v44 = vor.u32 %v4858_v30, %v3637_v24 }
  0x14   :  { %v3905_v36 = vld [vmem:[#allocation2 + $0x5fc] sm:$0xf]  ;;  %741 = vmatpush.bf16.msra.mxu1 %v3946_v25  ;;  %v3898_v37 = vor.u32 %v4929_v33, %v3897_v32  ;;  %v4930_v38 = vld [vmem:[#allocation2 + $0x690] sm:$0xf0]  ;;  %v3902_v39 = vor.u32 %v4923_v34, %v3899_v35  ;;  %v3849_v41 = vld [vmem:[#allocation2 + $0x4c4] sm:$0xf] }
  0x15   :  { %755 = vmatpush.bf16.msra.mxu2 %v3950_v26  ;;  %v3906_v40 = vor.u32 %v4930_v38, %v3905_v36  ;;  %v4917_v42 = vld [vmem:[#allocation2 + $0x558] sm:$0xf0]  ;;  %v4911_v43 = vld [vmem:[#allocation2 + $0x4c8] sm:$0xf]  ;;  %v3851_v45 = vld [vmem:[#allocation2 + $0x55c] sm:$0xf0] }
  0x16   :  { %123 = vmatpush.bf16.msra.mxu0 %v3646_v11  ;;  %769 = vmatpush.bf16.msra.mxu3 %v3954_v31  ;;  %v3857_v46 = vld [vmem:[#allocation2 + $0x4cc] sm:$0xf]  ;;  %v4918_v47 = vld [vmem:[#allocation2 + $0x560] sm:$0xf0]  ;;  %v3633_v48 = vld [vmem:[#allocation2 + $0x260] sm:$0xf]  ;;  %v3850_v50 = vor.u32 %v4917_v42, %v3849_v41  ;;  %v3854_v51 = vor.u32 %v4911_v43, %v3851_v45 }
  0x17   :  { %v4857_v49 = vld [vmem:[#allocation2 + $0x2f4] sm:$0xf0]  ;;  %v3858_v52 = vor.u32 %v4918_v47, %v3857_v46  ;;  %v3801_v53 = vld [vmem:[#allocation2 + $0x394] sm:$0xf]  ;;  %v4905_v54 = vld [vmem:[#allocation2 + $0x428] sm:$0xf0] }
  0x18   :  { %742 = vmatpush.bf16.msra.mxu1 %v3898_v37  ;;  %v4899_v55 = vld [vmem:[#allocation2 + $0x398] sm:$0xf]  ;;  %v3634_v56 = vor.u32 %v4857_v49, %v3633_v48  ;;  %v3803_v57 = vld [vmem:[#allocation2 + $0x42c] sm:$0xf0]  ;;  %v3809_v58 = vld [vmem:[#allocation2 + $0x39c] sm:$0xf]  ;;  %v3802_v62 = vor.u32 %v4905_v54, %v3801_v53 }
  0x19   :  { %756 = vmatpush.bf16.msra.mxu2 %v3902_v39  ;;  %v4906_v59 = vld [vmem:[#allocation2 + $0x430] sm:$0xf0]  ;;  %v3629_v60 = vld [vmem:[#allocation2 + $0x130] sm:$0xf]  ;;  %v4856_v61 = vld [vmem:[#allocation2 + $0x1c4] sm:$0xf0]  ;;  %v3806_v63 = vor.u32 %v4899_v55, %v3803_v57 }
  0x1a   :  { %124 = vmatpush.bf16.msra.mxu0 %v3642_v29  ;;  %770 = vmatpush.bf16.msra.mxu3 %v3906_v40  ;;  %v3810_v0 = vor.u32 %v4906_v59, %v3809_v58  ;;  %v3753_v1 = vld [vmem:[#allocation2 + $0x264] sm:$0xf]  ;;  %v4893_v2 = vld [vmem:[#allocation2 + $0x2f8] sm:$0xf0]  ;;  %v4887_v3 = vld [vmem:[#allocation2 + $0x268] sm:$0xf]  ;;  %v3630_v4 = vor.u32 %v4856_v61, %v3629_v60 }
  0x1b   :  { %v3755_v5 = vld [vmem:[#allocation2 + $0x2fc] sm:$0xf0]  ;;  %v3761_v6 = vld [vmem:[#allocation2 + $0x26c] sm:$0xf]  ;;  %v4894_v7 = vld [vmem:[#allocation2 + $0x300] sm:$0xf0]  ;;  %v3754_v14 = vor.u32 %v4893_v2, %v3753_v1 }
  0x1c   :  { %743 = vmatpush.bf16.msra.mxu1 %v3850_v50  ;;  %v3625_v8 = vld [vmem:[#allocation2] sm:$0xf]  ;;  %v4855_v9 = vld [vmem:[#allocation2 + $0x94] sm:$0xf0]  ;;  %v54_v11 = vld [vmem:[%s5706_s0 + $0x8] sm:$0xff]  ;;  %v3758_v15 = vor.u32 %v4887_v3, %v3755_v5  ;;  %v3762_v16 = vor.u32 %v4894_v7, %v3761_v6  ;;  %vm1001_vm0 = vcmask 1043456  }
  0x1d   :  { %757 = vmatpush.bf16.msra.mxu2 %v3854_v51  ;;  %v53_v10 = vld [vmem:[%s5706_s0] sm:$0xff]  ;;  %v4003_v13 = vld [vmem:[#allocation2 + $0x8f4] sm:$0xf0]  ;;  %v3705_v17 = vld [vmem:[#allocation2 + $0x134] sm:$0xf]  ;;  %v3626_v20 = vor.u32 %v4855_v9, %v3625_v8  ;;  %vm973_vm1 = vcmask 64512  }
  0x1e   :  { %125 = vmatpush.bf16.msra.mxu0 %v3638_v44  ;;  %771 = vmatpush.bf16.msra.mxu3 %v3858_v52  ;;  %v4948_v12 = vld [vmem:[#allocation2 + $0x860] sm:$0xf]  ;;  %v4881_v18 = vld [vmem:[#allocation2 + $0x1c8] sm:$0xf0]  ;;  %v4875_v19 = vld [vmem:[#allocation2 + $0x138] sm:$0xf]  ;;  %v56_v29 = vpack.c.bf16 %v54_v11, %v53_v10 }
  0x1f   :  { %v3707_v21 = vld [vmem:[#allocation2 + $0x1cc] sm:$0xf0]  ;;  %v4006_v22 = vor.u32 %v4948_v12, %v4003_v13  ;;  %v3713_v23 = vld [vmem:[#allocation2 + $0x13c] sm:$0xf]  ;;  %v4882_v24 = vld [vmem:[#allocation2 + $0x1d0] sm:$0xf0]  ;;  %v3706_v27 = vor.u32 %v4881_v18, %v3705_v17 }
  0x20   :  { %744 = vmatpush.bf16.msra.mxu1 %v3802_v62  ;;  %v4936_v25 = vld [vmem:[#allocation2 + $0x730] sm:$0xf]  ;;  %v3955_v26 = vld [vmem:[#allocation2 + $0x7c4] sm:$0xf0]  ;;  %v3657_v28 = vld [vmem:[#allocation2 + $0x4] sm:$0xf]  ;;  %v3710_v30 = vor.u32 %v4875_v19, %v3707_v21  ;;  %v3714_v35 = vor.u32 %v4882_v24, %v3713_v23 }
  0x21   :  { %758 = vmatpush.bf16.msra.mxu2 %v3806_v63  ;;  %v4869_v31 = vld [vmem:[#allocation2 + $0x98] sm:$0xf0]  ;;  %v4863_v32 = vld [vmem:[#allocation2 + $0x8] sm:$0xf]  ;;  %v3659_v33 = vld [vmem:[#allocation2 + $0x9c] sm:$0xf0]  ;;  %v3958_v39 = vor.u32 %v4936_v25, %v3955_v26 }
  0x22   :  { %126 = vmatpush.bf16.msra.mxu0 %v3634_v56  ;;  %772 = vmatpush.bf16.msra.mxu3 %v3810_v0  ;;  %v4924_v34 = vld [vmem:[#allocation2 + $0x600] sm:$0xf]  ;;  %v3665_v36 = vld [vmem:[#allocation2 + $0xc] sm:$0xf]  ;;  %v4009_v37 = vld [vmem:[#allocation2 + $0x864] sm:$0xf]  ;;  %v3658_v44 = vor.u32 %v4869_v31, %v3657_v28  ;;  %v3662_v47 = vor.u32 %v4863_v32, %v3659_v33 }
  0x23   :  { %v4955_v38 = vld [vmem:[#allocation2 + $0x8f8] sm:$0xf0]  ;;  %v4870_v40 = vld [vmem:[#allocation2 + $0xa0] sm:$0xf0]  ;;  %v4949_v41 = vld [vmem:[#allocation2 + $0x868] sm:$0xf] }
  0x24   :  { %745 = vmatpush.bf16.msra.mxu1 %v3754_v14  ;;  %v4011_v42 = vld [vmem:[#allocation2 + $0x8fc] sm:$0xf0]  ;;  %v3907_v43 = vld [vmem:[#allocation2 + $0x694] sm:$0xf0]  ;;  %v4017_v45 = vld [vmem:[#allocation2 + $0x86c] sm:$0xf]  ;;  %v4010_v48 = vor.u32 %v4955_v38, %v4009_v37  ;;  %v3666_v51 = vor.u32 %v4870_v40, %v3665_v36 }
  0x25   :  { %759 = vmatpush.bf16.msra.mxu2 %v3758_v15  ;;  %v4956_v46 = vld [vmem:[#allocation2 + $0x900] sm:$0xf0]  ;;  %v3961_v49 = vld [vmem:[#allocation2 + $0x734] sm:$0xf]  ;;  %v4912_v50 = vld [vmem:[#allocation2 + $0x4d0] sm:$0xf]  ;;  %v4014_v52 = vor.u32 %v4949_v41, %v4011_v42  ;;  %v3910_v56 = vor.u32 %v4924_v34, %v3907_v43 }
  0x26   :  { %127 = vmatpush.bf16.msra.mxu0 %v3630_v4  ;;  %773 = vmatpush.bf16.msra.mxu3 %v3762_v16  ;;  %v4943_v53 = vld [vmem:[#allocation2 + $0x7c8] sm:$0xf0]  ;;  %v4937_v54 = vld [vmem:[#allocation2 + $0x738] sm:$0xf]  ;;  %v3963_v55 = vld [vmem:[#allocation2 + $0x7cc] sm:$0xf0]  ;;  %v4018_v57 = vor.u32 %v4956_v46, %v4017_v45 }
  0x27   :  { %v3859_v58 = vld [vmem:[#allocation2 + $0x564] sm:$0xf0]  ;;  %v3969_v59 = vld [vmem:[#allocation2 + $0x73c] sm:$0xf]  ;;  %v4944_v60 = vld [vmem:[#allocation2 + $0x7d0] sm:$0xf0]  ;;  %v3962_v61 = vor.u32 %v4943_v53, %v3961_v49  ;;  %v3966_v3 = vor.u32 %v4937_v54, %v3963_v55 }
  0x28   :  { %746 = vmatpush.bf16.msra.mxu1 %v3706_v27  ;;  %v3913_v62 = vld [vmem:[#allocation2 + $0x604] sm:$0xf]  ;;  %v4931_v63 = vld [vmem:[#allocation2 + $0x698] sm:$0xf0]  ;;  %v4925_v0 = vld [vmem:[#allocation2 + $0x608] sm:$0xf]  ;;  %v3862_v6 = vor.u32 %v4912_v50, %v3859_v58  ;;  %v3970_v7 = vor.u32 %v4944_v60, %v3969_v59 }
  0x29   :  { %760 = vmatpush.bf16.msra.mxu2 %v3710_v30  ;;  %v4900_v1 = vld [vmem:[#allocation2 + $0x3a0] sm:$0xf]  ;;  %v3811_v2 = vld [vmem:[#allocation2 + $0x434] sm:$0xf0]  ;;  %v3921_v5 = vld [vmem:[#allocation2 + $0x60c] sm:$0xf]  ;;  %v3914_v9 = vor.u32 %v4931_v63, %v3913_v62 }
  0x2a   :  { %128 = vmatpush.bf16.msra.mxu0 %v3626_v20  ;;  %774 = vmatpush.bf16.msra.mxu3 %v3714_v35  ;;  %v3915_v4 = vld [vmem:[#allocation2 + $0x69c] sm:$0xf0]  ;;  %v4932_v8 = vld [vmem:[#allocation2 + $0x6a0] sm:$0xf0]  ;;  %v3865_v11 = vld [vmem:[#allocation2 + $0x4d4] sm:$0xf]  ;;  %v3814_v13 = vor.u32 %v4900_v1, %v3811_v2 }
  0x2b   :  { %v3918_v10 = vor.u32 %v4925_v0, %v3915_v4  ;;  %v4919_v12 = vld [vmem:[#allocation2 + $0x568] sm:$0xf0]  ;;  %v4888_v14 = vld [vmem:[#allocation2 + $0x270] sm:$0xf]  ;;  %v3922_v15 = vor.u32 %v4932_v8, %v3921_v5  ;;  %v4913_v16 = vld [vmem:[#allocation2 + $0x4d8] sm:$0xf] }
  0x2c   :  { %747 = vmatpush.bf16.msra.mxu1 %v3658_v44  ;;  %v3867_v17 = vld [vmem:[#allocation2 + $0x56c] sm:$0xf0]  ;;  %v3763_v18 = vld [vmem:[#allocation2 + $0x304] sm:$0xf0]  ;;  %v3873_v19 = vld [vmem:[#allocation2 + $0x4dc] sm:$0xf]  ;;  %v3866_v21 = vor.u32 %v4919_v12, %v3865_v11 }
  0x2d   :  { %129 = vmatmul.bf16.vlgmr.msra.gmra.mxu0 %v56_v29  ;;  %761 = vmatpush.bf16.msra.mxu2 %v3662_v47  ;;  %v4920_v20 = vld [vmem:[#allocation2 + $0x570] sm:$0xf0]  ;;  %v3766_v23 = vor.u32 %v4888_v14, %v3763_v18  ;;  %v4876_v25 = vld [vmem:[#allocation2 + $0x140] sm:$0xf]  ;;  %v3715_v26 = vld [vmem:[#allocation2 + $0x1d4] sm:$0xf0] }
  0x2e   :  { %782 = vmatpush.bf16.msrb.mxu0 %v4006_v22  ;;  %775 = vmatpush.bf16.msra.mxu3 %v3666_v51  ;;  %v3870_v22 = vor.u32 %v4913_v16, %v3867_v17  ;;  %v3874_v24 = vor.u32 %v4920_v20, %v3873_v19  ;;  %v3718_v27 = vor.u32 %v4876_v25, %v3715_v26  ;;  %v4864_v28 = vld [vmem:[#allocation2 + $0x10] sm:$0xf]  ;;  %v3667_v29 = vld [vmem:[#allocation2 + $0xa4] sm:$0xf0]  ;;  %v4938_v34 = vld [vmem:[#allocation2 + $0x740] sm:$0xf] }
  0x2f   :  { %v4950_v30 = vld [vmem:[#allocation2 + $0x870] sm:$0xf]  ;;  %v4019_v31 = vld [vmem:[#allocation2 + $0x904] sm:$0xf0]  ;;  %v3670_v32 = vor.u32 %v4864_v28, %v3667_v29  ;;  %v3971_v35 = vld [vmem:[#allocation2 + $0x7d4] sm:$0xf0] }
  0x30   :  { %796 = vmatpush.bf16.msrb.mxu1 %v4010_v48  ;;  %v4022_v33 = vor.u32 %v4950_v30, %v4019_v31  ;;  %v3974_v36 = vor.u32 %v4938_v34, %v3971_v35  ;;  %v4926_v37 = vld [vmem:[#allocation2 + $0x610] sm:$0xf]  ;;  %v3923_v38 = vld [vmem:[#allocation2 + $0x6a4] sm:$0xf0]  ;;  %v4914_v40 = vld [vmem:[#allocation2 + $0x4e0] sm:$0xf] }
  0x31   :  { %810 = vmatpush.bf16.msrb.mxu2 %v4014_v52  ;;  %v3875_v41 = vld [vmem:[#allocation2 + $0x574] sm:$0xf0]  ;;  %v3817_v43 = vld [vmem:[#allocation2 + $0x3a4] sm:$0xf]  ;;  %v4907_v44 = vld [vmem:[#allocation2 + $0x438] sm:$0xf0] }
  0x32   :  { %783 = vmatpush.bf16.msrb.mxu0 %v3958_v39  ;;  %824 = vmatpush.bf16.msrb.mxu3 %v4018_v57  ;;  %v3926_v39 = vor.u32 %v4926_v37, %v3923_v38  ;;  %v3878_v42 = vor.u32 %v4914_v40, %v3875_v41  ;;  %v4901_v45 = vld [vmem:[#allocation2 + $0x3a8] sm:$0xf]  ;;  %v3818_v46 = vor.u32 %v4907_v44, %v3817_v43  ;;  %v3819_v47 = vld [vmem:[#allocation2 + $0x43c] sm:$0xf0]  ;;  %v3825_v48 = vld [vmem:[#allocation2 + $0x3ac] sm:$0xf] }
  0x33   :  { %v4908_v49 = vld [vmem:[#allocation2 + $0x440] sm:$0xf0]  ;;  %v3822_v50 = vor.u32 %v4901_v45, %v3819_v47  ;;  %v4902_v52 = vld [vmem:[#allocation2 + $0x3b0] sm:$0xf]  ;;  %v3827_v53 = vld [vmem:[#allocation2 + $0x444] sm:$0xf0] }
  0x34   :  { %797 = vmatpush.bf16.msrb.mxu1 %v3962_v61  ;;  %v3826_v51 = vor.u32 %v4908_v49, %v3825_v48  ;;  %v3830_v54 = vor.u32 %v4902_v52, %v3827_v53  ;;  %v3769_v55 = vld [vmem:[#allocation2 + $0x274] sm:$0xf]  ;;  %v4889_v57 = vld [vmem:[#allocation2 + $0x278] sm:$0xf]  ;;  %v3771_v59 = vld [vmem:[#allocation2 + $0x30c] sm:$0xf0] }
  0x35   :  { %811 = vmatpush.bf16.msrb.mxu2 %v3966_v3  ;;  %v3777_v60 = vld [vmem:[#allocation2 + $0x27c] sm:$0xf]  ;;  %v4896_v61 = vld [vmem:[#allocation2 + $0x310] sm:$0xf0]  ;;  %v3774_v62 = vor.u32 %v4889_v57, %v3771_v59  ;;  %v4890_v0 = vld [vmem:[#allocation2 + $0x280] sm:$0xf] }
  0x36   :  { %784 = vmatpush.bf16.msrb.mxu0 %v3910_v56  ;;  %825 = vmatpush.bf16.msrb.mxu3 %v3970_v7  ;;  %v4895_v56 = vld [vmem:[#allocation2 + $0x308] sm:$0xf0]  ;;  %v3778_v63 = vor.u32 %v4896_v61, %v3777_v60  ;;  %v3779_v1 = vld [vmem:[#allocation2 + $0x314] sm:$0xf0]  ;;  %v3721_v3 = vld [vmem:[#allocation2 + $0x144] sm:$0xf] }
  0x37   :  { %v3770_v58 = vor.u32 %v4895_v56, %v3769_v55  ;;  %v3782_v2 = vor.u32 %v4890_v0, %v3779_v1  ;;  %v4883_v4 = vld [vmem:[#allocation2 + $0x1d8] sm:$0xf0]  ;;  %v4877_v5 = vld [vmem:[#allocation2 + $0x148] sm:$0xf]  ;;  %v3723_v7 = vld [vmem:[#allocation2 + $0x1dc] sm:$0xf0] }
  0x38   :  { %798 = vmatpush.bf16.msrb.mxu1 %v3914_v9  ;;  %v3729_v8 = vld [vmem:[#allocation2 + $0x14c] sm:$0xf]  ;;  %v4884_v9 = vld [vmem:[#allocation2 + $0x1e0] sm:$0xf0]  ;;  %v4878_v12 = vld [vmem:[#allocation2 + $0x150] sm:$0xf] }
  0x39   :  { %812 = vmatpush.bf16.msrb.mxu2 %v3918_v10  ;;  %v3726_v10 = vor.u32 %v4877_v5, %v3723_v7  ;;  %v3730_v11 = vor.u32 %v4884_v9, %v3729_v8  ;;  %v4871_v16 = vld [vmem:[#allocation2 + $0xa8] sm:$0xf0]  ;;  %v4865_v17 = vld [vmem:[#allocation2 + $0x18] sm:$0xf]  ;;  %v3675_v19 = vld [vmem:[#allocation2 + $0xac] sm:$0xf0] }
  0x3a   :  { %785 = vmatpush.bf16.msrb.mxu0 %v3862_v6  ;;  %826 = vmatpush.bf16.msrb.mxu3 %v3922_v15  ;;  %v3722_v6 = vor.u32 %v4883_v4, %v3721_v3  ;;  %v3673_v15 = vld [vmem:[#allocation2 + $0x14] sm:$0xf]  ;;  %v3681_v20 = vld [vmem:[#allocation2 + $0x1c] sm:$0xf]  ;;  %v3683_v25 = vld [vmem:[#allocation2 + $0xb4] sm:$0xf0] }
  0x3b   :  { %v3674_v18 = vor.u32 %v4871_v16, %v3673_v15  ;;  %v55_v28 = vld [vmem:[%s5707_s1] sm:$0xff]  ;;  %v4025_v29 = vld [vmem:[#allocation2 + $0x874] sm:$0xf]  ;;  %v4957_v30 = vld [vmem:[#allocation2 + $0x908] sm:$0xf0] }
  0x3c   :  { %799 = vmatpush.bf16.msrb.mxu1 %v3866_v21  ;;  %v4872_v21 = vld [vmem:[#allocation2 + $0xb0] sm:$0xf0]  ;;  %v4033_v34 = vld [vmem:[#allocation2 + $0x87c] sm:$0xf]  ;;  %v4952_v38 = vld [vmem:[#allocation2 + $0x880] sm:$0xf]  ;;  %v4026_v41 = vor.u32 %v4957_v30, %v4025_v29 }
  0x3d   :  { %813 = vmatpush.bf16.msrb.mxu2 %v3870_v22  ;;  %v3678_v22 = vor.u32 %v4865_v17, %v3675_v19  ;;  %v4958_v37 = vld [vmem:[#allocation2 + $0x910] sm:$0xf0]  ;;  %v3977_v43 = vld [vmem:[#allocation2 + $0x744] sm:$0xf]  ;;  %v4945_v44 = vld [vmem:[#allocation2 + $0x7d8] sm:$0xf0] }
  0x3e   :  { %786 = vmatpush.bf16.msrb.mxu0 %v3814_v13  ;;  %827 = vmatpush.bf16.msrb.mxu3 %v3874_v24  ;;  %v3731_v13 = vld [vmem:[#allocation2 + $0x1e4] sm:$0xf0]  ;;  %v4866_v24 = vld [vmem:[#allocation2 + $0x20] sm:$0xf]  ;;  %v4034_v45 = vor.u32 %v4958_v37, %v4033_v34  ;;  %v3985_v49 = vld [vmem:[#allocation2 + $0x74c] sm:$0xf]  ;;  %v3978_v53 = vor.u32 %v4945_v44, %v3977_v43 }
  0x3f   :  { %v3734_v14 = vor.u32 %v4878_v12, %v3731_v13  ;;  %v3686_v26 = vor.u32 %v4866_v24, %v3683_v25  ;;  %v4939_v47 = vld [vmem:[#allocation2 + $0x748] sm:$0xf]  ;;  %v3979_v48 = vld [vmem:[#allocation2 + $0x7dc] sm:$0xf0]  ;;  %v3929_v55 = vld [vmem:[#allocation2 + $0x614] sm:$0xf] }
  0x40   :  { %800 = vmatpush.bf16.msrb.mxu1 %v3818_v46  ;;  %v3987_v52 = vld [vmem:[#allocation2 + $0x7e4] sm:$0xf0]  ;;  %v4933_v56 = vld [vmem:[#allocation2 + $0x6a8] sm:$0xf0]  ;;  %v4927_v59 = vld [vmem:[#allocation2 + $0x618] sm:$0xf] }
  0x41   :  { %814 = vmatpush.bf16.msrb.mxu2 %v3822_v50  ;;  %v4946_v50 = vld [vmem:[#allocation2 + $0x7e0] sm:$0xf0]  ;;  %v3931_v60 = vld [vmem:[#allocation2 + $0x6ac] sm:$0xf0]  ;;  %v3937_v61 = vld [vmem:[#allocation2 + $0x61c] sm:$0xf]  ;;  %v3930_v1 = vor.u32 %v4933_v56, %v3929_v55 }
  0x42   :  { %787 = vmatpush.bf16.msrb.mxu0 %v3766_v23  ;;  %828 = vmatpush.bf16.msrb.mxu3 %v3826_v51  ;;  %v3682_v23 = vor.u32 %v4872_v21, %v3681_v20  ;;  %v4940_v51 = vld [vmem:[#allocation2 + $0x750] sm:$0xf]  ;;  %v3986_v57 = vor.u32 %v4946_v50, %v3985_v49  ;;  %v3939_v0 = vld [vmem:[#allocation2 + $0x6b4] sm:$0xf0]  ;;  %v3881_v3 = vld [vmem:[#allocation2 + $0x4e4] sm:$0xf] }
  0x43   :  { %v4921_v4 = vld [vmem:[#allocation2 + $0x578] sm:$0xf0]  ;;  %v4915_v7 = vld [vmem:[#allocation2 + $0x4e8] sm:$0xf]  ;;  %v3883_v8 = vld [vmem:[#allocation2 + $0x57c] sm:$0xf0] }
  0x44   :  { %801 = vmatpush.bf16.msrb.mxu1 %v3770_v58  ;;  %v3990_v58 = vor.u32 %v4940_v51, %v3987_v52  ;;  %v3889_v9 = vld [vmem:[#allocation2 + $0x4ec] sm:$0xf]  ;;  %v3891_v12 = vld [vmem:[#allocation2 + $0x584] sm:$0xf0]  ;;  %v3882_v13 = vor.u32 %v4921_v4, %v3881_v3  ;;  %v3833_v15 = vld [vmem:[#allocation2 + $0x3b4] sm:$0xf] }
  0x45   :  { %815 = vmatpush.bf16.msrb.mxu2 %v3774_v62  ;;  %v4934_v62 = vld [vmem:[#allocation2 + $0x6b0] sm:$0xf0]  ;;  %v4909_v16 = vld [vmem:[#allocation2 + $0x448] sm:$0xf0]  ;;  %v4903_v19 = vld [vmem:[#allocation2 + $0x3b8] sm:$0xf] }
  0x46   :  { %788 = vmatpush.bf16.msrb.mxu0 %v3718_v27  ;;  %829 = vmatpush.bf16.msrb.mxu3 %v3778_v63  ;;  %v4928_v63 = vld [vmem:[#allocation2 + $0x620] sm:$0xf]  ;;  %v3938_v5 = vor.u32 %v4934_v62, %v3937_v61  ;;  %v3835_v20 = vld [vmem:[#allocation2 + $0x44c] sm:$0xf0]  ;;  %v3841_v21 = vld [vmem:[#allocation2 + $0x3bc] sm:$0xf]  ;;  %v3834_v25 = vor.u32 %v4909_v16, %v3833_v15 }
  0x47   :  { %v3843_v24 = vld [vmem:[#allocation2 + $0x454] sm:$0xf0]  ;;  %v4898_v34 = vld [vmem:[#allocation2 + $0x320] sm:$0xf0]  ;;  %v4892_v37 = vld [vmem:[#allocation2 + $0x290] sm:$0xf] }
  0x48   :  { %802 = vmatpush.bf16.msrb.mxu1 %v3722_v6  ;;  %v3942_v6 = vor.u32 %v4928_v63, %v3939_v0  ;;  %v4885_v43 = vld [vmem:[#allocation2 + $0x1e8] sm:$0xf0]  ;;  %v4886_v49 = vld [vmem:[#allocation2 + $0x1f0] sm:$0xf0]  ;;  %v4880_v50 = vld [vmem:[#allocation2 + $0x160] sm:$0xf] }
  0x49   :  { %816 = vmatpush.bf16.msrb.mxu2 %v3726_v10  ;;  %v4922_v10 = vld [vmem:[#allocation2 + $0x580] sm:$0xf0]  ;;  %v3747_v51 = vld [vmem:[#allocation2 + $0x1f4] sm:$0xf0]  ;;  %v4873_v55 = vld [vmem:[#allocation2 + $0xb8] sm:$0xf0] }
  0x4a   :  { %789 = vmatpush.bf16.msrb.mxu0 %v3670_v32  ;;  %830 = vmatpush.bf16.msrb.mxu3 %v3730_v11  ;;  %v4951_v32 = vld [vmem:[#allocation2 + $0x878] sm:$0xf]  ;;  %v4916_v11 = vld [vmem:[#allocation2 + $0x4f0] sm:$0xf]  ;;  %v3890_v17 = vor.u32 %v4922_v10, %v3889_v9  ;;  %v4874_v61 = vld [vmem:[#allocation2 + $0xc0] sm:$0xf0] }
  0x4b   :  { %v4868_v62 = vld [vmem:[#allocation2 + $0x30] sm:$0xf]  ;;  %v3699_v63 = vld [vmem:[#allocation2 + $0xc4] sm:$0xf0] }
  0x4c   :  { %803 = vmatpush.bf16.msrb.mxu1 %v3674_v18  ;;  %v3894_v18 = vor.u32 %v4916_v11, %v3891_v12  ;;  %v3702_v3 = vor.u32 %v4868_v62, %v3699_v63  ;;  %v5376_v4 = vld [vmem:[#allocation4 + $0x1] sm:$0xff] }
  0x4d   :  { %817 = vmatpush.bf16.msrb.mxu2 %v3678_v22  ;;  %v4910_v22 = vld [vmem:[#allocation2 + $0x450] sm:$0xf0]  ;;  %v237_v9 = vperm.slane %v5376_v4, 1  ;;  %v238_v10 = vperm.slane %v5376_v4, 2  ;;  %v240_v16 = vperm.slane %v5376_v4, 4 }
  0x4e   :  { %838 = vmatpush.bf16.msra.mxu0 %v4022_v33  ;;  %831 = vmatpush.bf16.msrb.mxu3 %v3682_v23  ;;  %v4027_v33 = vld [vmem:[#allocation2 + $0x90c] sm:$0xf0]  ;;  %v4904_v23 = vld [vmem:[#allocation2 + $0x3c0] sm:$0xf]  ;;  %v3842_v29 = vor.u32 %v4910_v22, %v3841_v21 }
  0x4f   :  { %v3846_v30 = vor.u32 %v4904_v23, %v3843_v24  ;;  %v236_v23 = vperm.slane %v5376_v4, 0 }
  0x52   :  { %839 = vmatpush.bf16.msra.mxu0 %v3974_v36 }
  0x56   :  { %840 = vmatpush.bf16.msra.mxu0 %v3926_v39  ;;  %v4035_v39 = vld [vmem:[#allocation2 + $0x914] sm:$0xf0] }
  0x57   :  { %v4038_v46 = vor.u32 %v4952_v38, %v4035_v39  ;;  %v3795_v38 = vld [vmem:[#allocation2 + $0x324] sm:$0xf0] }
  0x5a   :  { %841 = vmatpush.bf16.msra.mxu0 %v3878_v42  ;;  %v4030_v42 = vor.u32 %v4951_v32, %v4027_v33  ;;  %v3787_v32 = vld [vmem:[#allocation2 + $0x31c] sm:$0xf0]  ;;  %v3793_v33 = vld [vmem:[#allocation2 + $0x28c] sm:$0xf] }
  0x5b   :  { %v3794_v44 = vor.u32 %v4898_v34, %v3793_v33 }
  0x5e   :  { %842 = vmatpush.bf16.msra.mxu0 %v3830_v54  ;;  %v3982_v54 = vor.u32 %v4939_v47, %v3979_v48  ;;  %v3739_v47 = vld [vmem:[#allocation2 + $0x1ec] sm:$0xf0]  ;;  %v3745_v48 = vld [vmem:[#allocation2 + $0x15c] sm:$0xf] }
  0x5f   :  { %v3746_v56 = vor.u32 %v4886_v49, %v3745_v48 }
  0x62   :  { %843 = vmatpush.bf16.msra.mxu0 %v3782_v2  ;;  %v3934_v2 = vor.u32 %v4927_v59, %v3931_v60  ;;  %v3691_v59 = vld [vmem:[#allocation2 + $0xbc] sm:$0xf0]  ;;  %v3697_v60 = vld [vmem:[#allocation2 + $0x2c] sm:$0xf] }
  0x66   :  { %844 = vmatpush.bf16.msra.mxu0 %v3734_v14  ;;  %v3886_v14 = vor.u32 %v4915_v7, %v3883_v8 }
  0x6a   :  { %845 = vmatpush.bf16.msra.mxu0 %v3686_v26  ;;  %v3838_v26 = vor.u32 %v4903_v19, %v3835_v20 }
  0xaa   :  { %v130_v27 = vpop.f32.mrf.mxu0 }
  0xab   :  { %v5356_v35 = vadd.f32 %v130_v27, %v55_v28  ;;  %v3785_v27 = vld [vmem:[#allocation2 + $0x284] sm:$0xf] }
  0xb2   :  { %v132_v31 = vpop.f32.mrf.mxu0 }
  0xb3   :  { %v5358_v36 = vadd.f32 %v132_v31, %v55_v28  ;;  %v4897_v28 = vld [vmem:[#allocation2 + $0x318] sm:$0xf0]  ;;  %v4891_v31 = vld [vmem:[#allocation2 + $0x288] sm:$0xf] }
  0xb4   :  { %v3786_v39 = vor.u32 %v4897_v28, %v3785_v27 }
  0xb5   :  { %v5362_v40 = vpack.c.bf16 %v5358_v36, %v5356_v35 }
  0xb7   :  { %748 = vmatmul.bf16.vlgmr.msra.gmra.mxu1 %v5362_v40  ;;  %762 = vmatmul.bf16.vlgmr.msra.gmra.mxu2 %v5362_v40 }
  0xb8   :  { %776 = vmatmul.bf16.vlgmr.msra.gmra.mxu3 %v5362_v40  ;;  %790 = vmatmul.bf16.vlgmr.msrb.gmra.mxu0 %v5362_v40 }
  0xb9   :  { %852 = vmatpush.bf16.msra.mxu1 %v4026_v41  ;;  %866 = vmatpush.bf16.msra.mxu2 %v4030_v42  ;;  %v3790_v41 = vor.u32 %v4891_v31, %v3787_v32  ;;  %v3737_v42 = vld [vmem:[#allocation2 + $0x154] sm:$0xf]  ;;  %v4989_v31 = vld [vmem:[#allocation2 + $0x918] sm:$0xf0] }
  0xba   :  { %880 = vmatpush.bf16.msra.mxu3 %v4034_v45  ;;  %894 = vmatpush.bf16.msrb.mxu0 %v4038_v46  ;;  %v3798_v45 = vor.u32 %v4892_v37, %v3795_v38  ;;  %v4879_v46 = vld [vmem:[#allocation2 + $0x158] sm:$0xf]  ;;  %v3738_v52 = vor.u32 %v4885_v43, %v3737_v42  ;;  %v5411_v42 = vld [vmem:[#allocation4 + $0x9] sm:$0xf]  ;;  %v4067_v43 = vld [vmem:[#allocation2 + $0x754] sm:$0xf] }
  0xbd   :  { %853 = vmatpush.bf16.msra.mxu1 %v3978_v53  ;;  %867 = vmatpush.bf16.msra.mxu2 %v3982_v54  ;;  %v3742_v53 = vor.u32 %v4879_v46, %v3739_v47  ;;  %v3689_v54 = vld [vmem:[#allocation2 + $0x24] sm:$0xf]  ;;  %v4987_v46 = vld [vmem:[#allocation2 + $0x888] sm:$0xf]  ;;  %v4103_v47 = vld [vmem:[#allocation2 + $0x91c] sm:$0xf0] }
  0xbe   :  { %881 = vmatpush.bf16.msra.mxu3 %v3986_v57  ;;  %895 = vmatpush.bf16.msrb.mxu0 %v3990_v58  ;;  %v3750_v57 = vor.u32 %v4880_v50, %v3747_v51  ;;  %v4867_v58 = vld [vmem:[#allocation2 + $0x28] sm:$0xf]  ;;  %v3690_v0 = vor.u32 %v4873_v55, %v3689_v54  ;;  %v244_v50 = vperm.slane %v5411_v42, 0  ;;  %v4063_v54 = vld [vmem:[#allocation2 + $0x624] sm:$0xf] }
  0xbf   :  { %v4981_v55 = vld [vmem:[#allocation2 + $0x6b8] sm:$0xf0] }
  0xc1   :  { %854 = vmatpush.bf16.msra.mxu1 %v3930_v1  ;;  %868 = vmatpush.bf16.msra.mxu2 %v3934_v2  ;;  %v3694_v1 = vor.u32 %v4867_v58, %v3691_v59  ;;  %v3698_v2 = vor.u32 %v4874_v61, %v3697_v60  ;;  %v4983_v59 = vld [vmem:[#allocation2 + $0x758] sm:$0xf]  ;;  %v4099_v60 = vld [vmem:[#allocation2 + $0x7ec] sm:$0xf0] }
  0xc2   :  { %882 = vmatpush.bf16.msra.mxu3 %v3938_v5  ;;  %896 = vmatpush.bf16.msrb.mxu0 %v3942_v6  ;;  %v239_v5 = vperm.slane %v5376_v4, 3 }
  0xc5   :  { %855 = vmatpush.bf16.msra.mxu1 %v3882_v13  ;;  %869 = vmatpush.bf16.msra.mxu2 %v3886_v14 }
  0xc6   :  { %883 = vmatpush.bf16.msra.mxu3 %v3890_v17  ;;  %897 = vmatpush.bf16.msrb.mxu0 %v3894_v18  ;;  %v243_v18 = vperm.slane %v5376_v4, 7 }
  0xc7   :  { %804 = vmatmul.bf16.vlgmr.msrb.gmra.mxu1 %v5362_v40  ;;  %818 = vmatmul.bf16.vlgmr.msrb.gmra.mxu2 %v5362_v40 }
  0xc8   :  { %832 = vmatmul.bf16.vlgmr.msrb.gmra.mxu3 %v5362_v40  ;;  %846 = vmatmul.bf16.vlgmr.msra.gmra.mxu0 %v5362_v40 }
  0xc9   :  { %856 = vmatpush.bf16.msra.mxu1 %v3834_v25  ;;  %870 = vmatpush.bf16.msra.mxu2 %v3838_v26  ;;  %v242_v26 = vperm.slane %v5376_v4, 6 }
  0xca   :  { %884 = vmatpush.bf16.msra.mxu3 %v3842_v29  ;;  %898 = vmatpush.bf16.msrb.mxu0 %v3846_v30  ;;  %v4071_v30 = vld [vmem:[#allocation2 + $0x884] sm:$0xf] }
  0xcd   :  { %857 = vmatpush.bf16.msra.mxu1 %v3786_v39  ;;  %871 = vmatpush.bf16.msra.mxu2 %v3790_v41  ;;  %v4072_v39 = vor.u32 %v4989_v31, %v4071_v30  ;;  %v4975_v31 = vld [vmem:[#allocation2 + $0x4f8] sm:$0xf] }
  0xce   :  { %885 = vmatpush.bf16.msra.mxu3 %v3794_v44  ;;  %899 = vmatpush.bf16.msrb.mxu0 %v3798_v45  ;;  %v4985_v44 = vld [vmem:[#allocation2 + $0x7e8] sm:$0xf0]  ;;  %v241_v45 = vperm.slane %v5376_v4, 5 }
  0xcf   :  { %v4068_v51 = vor.u32 %v4985_v44, %v4067_v43  ;;  %v4969_v43 = vld [vmem:[#allocation2 + $0x328] sm:$0xf0] }
  0xd1   :  { %858 = vmatpush.bf16.msra.mxu1 %v3738_v52  ;;  %872 = vmatpush.bf16.msra.mxu2 %v3742_v53  ;;  %v247_v53 = vperm.slane %v5411_v42, 3 }
  0xd2   :  { %886 = vmatpush.bf16.msra.mxu3 %v3746_v56  ;;  %900 = vmatpush.bf16.msrb.mxu0 %v3750_v57  ;;  %v4106_v56 = vor.u32 %v4987_v46, %v4103_v47  ;;  %v4971_v46 = vld [vmem:[#allocation2 + $0x3c8] sm:$0xf]  ;;  %v4087_v47 = vld [vmem:[#allocation2 + $0x45c] sm:$0xf0] }
  0xd5   :  { %859 = vmatpush.bf16.msra.mxu1 %v3690_v0  ;;  %873 = vmatpush.bf16.msra.mxu2 %v3694_v1  ;;  %v4064_v1 = vor.u32 %v4981_v55, %v4063_v54  ;;  %v4090_v54 = vor.u32 %v4971_v46, %v4087_v47  ;;  %v4967_v55 = vld [vmem:[#allocation2 + $0x298] sm:$0xf] }
  0xd6   :  { %887 = vmatpush.bf16.msra.mxu3 %v3698_v2  ;;  %901 = vmatpush.bf16.msrb.mxu0 %v3702_v3  ;;  %v4059_v3 = vld [vmem:[#allocation2 + $0x4f4] sm:$0xf] }
  0xd8   :  { %860 = vmatmul.bf16.vlgmr.msra.gmra.mxu1 %v5362_v40  ;;  %874 = vmatmul.bf16.vlgmr.msra.gmra.mxu2 %v5362_v40 }
  0xd9   :  { %888 = vmatmul.bf16.vlgmr.msra.gmra.mxu3 %v5362_v40  ;;  %902 = vmatmul.bf16.vlgmr.msrb.gmra.mxu0 %v5362_v40 }
 0x134   :  { %v749_v6 = vpop.f32.mrf.mxu1 }
 0x135   :  { %v791_v7 = vpop.f32.mrf.mxu0  ;;  %v750_v27 = vadd.f32 %v749_v6, %v236_v23  ;;  %v4977_v6 = vld [vmem:[#allocation2 + $0x588] sm:$0xf0] }
 0x136   :  { %v5381_v8 = vadd.f32 %v791_v7, %v239_v5 }
 0x137   :  { %v941_v38 = vpack.c.bf16 %v750_v27, %v750_v27  ;;  %v4055_v27 = vld [vmem:[#allocation2 + $0x3c4] sm:$0xf] }
 0x13a   :  { %v763_v11 = vpop.f32.mrf.mxu2 }
 0x13b   :  { %v5387_v12 = vadd.f32 %v763_v11, %v237_v9  ;;  %v777_v40 = vpop.f32.mrf.mxu3 }
 0x13c   :  { %v5391_v13 = vadd.f32 %v777_v40, %v238_v10  ;;  %v751_v14 = vpop.f32.mrf.mxu1  ;;  %v245_v40 = vperm.slane %v5411_v42, 1 }
 0x13d   :  { %v5393_v15 = vpop.f32.mrf.mxu0  ;;  %v752_v48 = vadd.f32 %v751_v14, %v236_v23  ;;  %v4102_v14 = vor.u32 %v4983_v59, %v4099_v60  ;;  %v4060_v23 = vor.u32 %v4977_v6, %v4059_v3  ;;  %v4043_v59 = vld [vmem:[#allocation2 + $0x34] sm:$0xf]  ;;  %v4961_v60 = vld [vmem:[#allocation2 + $0xc8] sm:$0xf0] }
 0x13f   :  { %v942_v61 = vpack.c.bf16 %v752_v48, %v752_v48 }
 0x142   :  { %v765_v17 = vpop.f32.mrf.mxu2 }
 0x143   :  { %v5397_v19 = vpop.f32.mrf.mxu3  ;;  %v766_v7 = vadd.f32 %v765_v17, %v237_v9 }
 0x144   :  { %v805_v20 = vpop.f32.mrf.mxu1 }
 0x145   :  { %v806_v21 = vadd.f32 %v805_v20, %v240_v16  ;;  %v847_v22 = vpop.f32.mrf.mxu0  ;;  %v4095_v20 = vld [vmem:[#allocation2 + $0x6bc] sm:$0xf0] }
 0x146   :  { %v5402_v24 = vadd.f32 %v847_v22, %v243_v18 }
 0x147   :  { %v943_v25 = vpack.c.bf16 %v806_v21, %v806_v21 }
 0x149   :  { %954 = vmatpush.bf16.xpose.msrb.mxu1 %v943_v25 }
 0x14a   :  { %v819_v28 = vpop.f32.mrf.mxu2 }
 0x14b   :  { %v833_v29 = vpop.f32.mrf.mxu3  ;;  %v820_v62 = vadd.f32 %v819_v28, %v241_v45  ;;  %v4973_v28 = vld [vmem:[#allocation2 + $0x458] sm:$0xf0] }
 0x14c   :  { %v5407_v32 = vadd.f32 %v833_v29, %v242_v26  ;;  %v807_v33 = vpop.f32.mrf.mxu1  ;;  %v1106_v29 = vpack.c.bf16 %v766_v7, %v766_v7  ;;  %v4959_v7 = vld [vmem:[#allocation2 + $0x38] sm:$0xf] }
 0x14d   :  { %v808_v34 = vadd.f32 %v807_v33, %v240_v16  ;;  %v5409_v37 = vpop.f32.mrf.mxu0  ;;  %v4979_v16 = vld [vmem:[#allocation2 + $0x628] sm:$0xf]  ;;  %v1107_v21 = vpack.c.bf16 %v820_v62, %v820_v62  ;;  %v4091_v33 = vld [vmem:[#allocation2 + $0x58c] sm:$0xf0] }
 0x14e   :  { %v4098_v17 = vor.u32 %v4979_v16, %v4095_v20 }
 0x14f   :  { %v944_v41 = vpack.c.bf16 %v808_v34, %v808_v34 }
 0x150   :  { %955 = vmatmul.bf16.vlgmr.msrb.gmra.mxu1 %v941_v38  ;;  %v4056_v38 = vor.u32 %v4973_v28, %v4055_v27 }
 0x151   :  { %967 = vmatpush.bf16.xpose.msrb.mxu2 %v944_v41  ;;  %v4051_v41 = vld [vmem:[#allocation2 + $0x294] sm:$0xf] }
 0x152   :  { %v821_v49 = vpop.f32.mrf.mxu2 }
 0x153   :  { %v822_v52 = vadd.f32 %v821_v49, %v241_v45  ;;  %v4094_v45 = vor.u32 %v4975_v31, %v4091_v33  ;;  %v4052_v49 = vor.u32 %v4969_v43, %v4051_v41 }
 0x155   :  { %v1108_v57 = vpack.c.bf16 %v822_v52, %v822_v52  ;;  %v861_v58 = vpop.f32.mrf.mxu1  ;;  %v4047_v52 = vld [vmem:[#allocation2 + $0x164] sm:$0xf] }
 0x156   :  { %v862_v63 = vadd.f32 %v861_v58, %v244_v50  ;;  %v903_v0 = vpop.f32.mrf.mxu0 }
 0x157   :  { %v5418_v2 = vadd.f32 %v903_v0, %v247_v53  ;;  %1131 = vmatpush.bf16.xpose.msra.mxu0 %v1108_v57  ;;  %v835_v57 = vpop.f32.mrf.mxu3  ;;  %v4079_v0 = vld [vmem:[#allocation2 + $0x1fc] sm:$0xf0] }
 0x158   :  { %v945_v11 = vpack.c.bf16 %v862_v63, %v862_v63  ;;  %968 = vmatmul.bf16.vlgmr.msrb.gmra.mxu2 %v942_v61  ;;  %v836_v62 = vadd.f32 %v835_v57, %v242_v26  ;;  %v4963_v63 = vld [vmem:[#allocation2 + $0x168] sm:$0xf] }
 0x159   :  { %1086 = vmatpush.bf16.msra.mxu2 %v4072_v39  ;;  %v4082_v3 = vor.u32 %v4963_v63, %v4079_v0 }
 0x15a   :  { %v1003_v22 = vsel %vm1001_vm0, %v945_v11, 0  ;;  %v1251_v6 = vpack.c.bf16 %v836_v62, %v836_v62  ;;  %v4075_v11 = vld [vmem:[#allocation2 + $0xcc] sm:$0xf0] }
 0x15b   :  { %v875_v25 = vpop.f32.mrf.mxu2  ;;  %1012 = vmatpush.bf16.msrb.mxu3 %v1003_v22  ;;  %v4078_v16 = vor.u32 %v4959_v7, %v4075_v11 }
 0x15c   :  { %v876_v9 = vadd.f32 %v875_v25, %v245_v40 }
 0x15d   :  { %1087 = vmatpush.bf16.msra.mxu2 %v4068_v51  ;;  %v863_v30 = vpop.f32.mrf.mxu1 }
 0x15e   :  { %v864_v34 = vadd.f32 %v863_v30, %v244_v50  ;;  %1132 = vmatmul.bf16.vlgmr.msra.gmra.mxu0 %v1106_v29  ;;  %v1109_v39 = vpack.c.bf16 %v876_v9, %v876_v9  ;;  %v4965_v50 = vld [vmem:[#allocation2 + $0x1f8] sm:$0xf0]  ;;  %v5434_v22 = vpop.f32.mrf.mxu0 }
 0x15f   :  { %1232 = vmatpush.bf16.msrb.mxu0 %v4106_v56  ;;  %1118 = vmatpush.bf16.xpose.msra.mxu3 %v1107_v21  ;;  %v4083_v56 = vld [vmem:[#allocation2 + $0x32c] sm:$0xf0]  ;;  %v4048_v58 = vor.u32 %v4965_v50, %v4047_v52 }
 0x160   :  { %v946_v44 = vpack.c.bf16 %v864_v34, %v864_v34  ;;  %v1165_v51 = vsel %vm1001_vm0, %v1109_v39, 0  ;;  %v4086_v61 = vor.u32 %v4967_v55, %v4083_v56  ;;  %v889_v55 = vpop.f32.mrf.mxu3 }
 0x161   :  { %1088 = vmatpush.bf16.msra.mxu2 %v4064_v1  ;;  %v4044_v1 = vor.u32 %v4961_v60, %v4043_v59 }
 0x162   :  { %v1022_v48 = vsel %vm1001_vm0, %v946_v44, 0 }
 0x163   :  { %1233 = vmatpush.bf16.msrb.mxu0 %v4102_v14  ;;  %1031 = vmatpush.bf16.msra.mxu1 %v1022_v48  ;;  %v850_v14 = vadd.f32 %v5409_v37, %v243_v18 }
 0x165   :  { %1089 = vmatpush.bf16.msra.mxu2 %v4060_v23  ;;  %v1410_v20 = vpack.c.bf16 %v850_v14, %v850_v14  ;;  %v877_v23 = vpop.f32.mrf.mxu2 }
 0x166   :  { %v878_v46 = vadd.f32 %v877_v23, %v245_v40  ;;  %v1250_v40 = vpack.c.bf16 %v5407_v32, %v5407_v32 }
 0x167   :  { %1234 = vmatpush.bf16.msrb.mxu0 %v4098_v17  ;;  %1174 = vmatpush.bf16.msrb.mxu1 %v1165_v51 }
 0x168   :  { %v1110_v48 = vpack.c.bf16 %v878_v46, %v878_v46  ;;  %v891_v63 = vpop.f32.mrf.mxu3 }
 0x169   :  { %1090 = vmatpush.bf16.msra.mxu2 %v4056_v38 }
 0x16a   :  { %v1184_v52 = vsel %vm1001_vm0, %v1110_v48, 0 }
 0x16b   :  { %1235 = vmatpush.bf16.msrb.mxu0 %v4094_v45 }
 0x16d   :  { %1091 = vmatpush.bf16.msra.mxu2 %v4052_v49 }
 0x16f   :  { %1236 = vmatpush.bf16.msrb.mxu0 %v4090_v54  ;;  %v246_v54 = vperm.slane %v5411_v42, 2  ;;  %v1407_v42 = vpack.c.bf16 %v5381_v8, %v5381_v8 }
 0x171   :  { %1092 = vmatpush.bf16.msra.mxu2 %v4048_v58  ;;  %v890_v56 = vadd.f32 %v889_v55, %v246_v54 }
 0x173   :  { %1237 = vmatpush.bf16.msrb.mxu0 %v4086_v61  ;;  %v1252_v59 = vpack.c.bf16 %v890_v56, %v890_v56  ;;  %v1105_v61 = vpack.c.bf16 %v5387_v12, %v5387_v12 }
 0x175   :  { %1093 = vmatpush.bf16.msra.mxu2 %v4044_v1  ;;  %v1308_v62 = vsel %vm1001_vm0, %v1252_v59, 0 }
 0x177   :  { %1238 = vmatpush.bf16.msrb.mxu0 %v4082_v3 }
 0x179   :  { %1274 = vmatpush.bf16.xpose.msrb.mxu2 %v1251_v6 }
 0x17b   :  { %1239 = vmatpush.bf16.msrb.mxu0 %v4078_v16 }
 0x17f   :  { %1433 = vmatpush.bf16.xpose.msra.mxu0 %v1410_v20  ;;  %v780_v20 = vadd.f32 %v5397_v19, %v238_v10 }
 0x181   :  { %v1249_v23 = vpack.c.bf16 %v780_v20, %v780_v20 }
 0x1cd   :  { %v956_v26 = vpop.f32.mrf.mxu1 }
 0x1ce   :  { %v974_v21 = vsel %vm973_vm1, %v956_v26, -inf }
 0x1cf   :  { %975 = vmax.xlane.f32.xlu0 %v974_v21 }
 0x1d5   :  { %v958_v25 = vpop.f32.mrf.mxu1 }
 0x1db   :  { %v969_v27 = vpop.f32.mrf.mxu2  ;;  %v1133_v28 = vpop.f32.mrf.mxu0 }
 0x1dc   :  { %v977_v29 = vsel %vm973_vm1, %v969_v27, -inf  ;;  %v1140_v41 = vsel %vm973_vm1, %v1133_v28, -inf }
 0x1dd   :  { %978 = vmax.xlane.f32.xlu1 %v977_v29 }
 0x1e3   :  { %v971_v18 = vpop.f32.mrf.mxu2  ;;  %v1135_v37 = vpop.f32.mrf.mxu0 }
 0x242   :  { %v976_v9 = vpop.xlane.xlu0 %975 }
 0x243   :  { %v980_v17 = vsub.f32 %v956_v26, %v976_v9 }
 0x245   :  { %v982_v30 = vmul.f32 1.442695, %v980_v17 }
 0x247   :  { %5179 = vpow2.f32 %v982_v30 }
 0x24d   :  { %v5180_v31 = vpop.eup %5179 }
 0x24e   :  { %v986_v33 = vsel %vm973_vm1, %v5180_v31, 0.0 }
 0x24f   :  { %987 = vadd.xlane.f32.xlu0 %v986_v33  ;;  %v1409_v33 = vpack.c.bf16 %v5402_v24, %v5402_v24 }
 0x250   :  { %v979_v34 = vpop.xlane.xlu1 %978 }
 0x251   :  { %v981_v38 = vsub.f32 %v969_v27, %v979_v34 }
 0x253   :  { %v984_v39 = vmul.f32 1.442695, %v981_v38 }
 0x255   :  { %5181 = vpow2.f32 %v984_v39 }
 0x257   :  { %1141 = vmax.xlane.f32.xlu0 %v1140_v41 }
 0x25b   :  { %v5182_v43 = vpop.eup %5181 }
 0x25c   :  { %v989_v44 = vsel %vm973_vm1, %v5182_v43, 0.0 }
 0x25d   :  { %990 = vadd.xlane.f32.xlu2 %v989_v44 }
 0x2c2   :  { %v988_v45 = vpop.xlane.xlu0 %987 }
 0x2c3   :  { %5183 = vrcp.f32 %v988_v45 }
 0x2c9   :  { %v5184_v47 = vpop.eup %5183 }
 0x2ca   :  { %v994_v49 = vmul.f32 %v5184_v47, %v5180_v31  ;;  %v1142_v1 = vpop.xlane.xlu0 %1141 }
 0x2cb   :  { %v1144_v3 = vsub.f32 %v1133_v28, %v1142_v1 }
 0x2cc   :  { %v996_v51 = vpack.c.bf16 %v994_v49, %v994_v49 }
 0x2cd   :  { %v1147_v14 = vmul.f32 1.442695, %v1144_v3 }
 0x2ce   :  { %4039 = vmatmul.msk.bf16.vlgmr.msrb.gmra.mxu3 %vm973_vm1, %v996_v51 }
 0x2cf   :  { %1193 = vmatpush.bf16.msrb.mxu3 %v1184_v52 }
 0x2d0   :  { %v991_v50 = vpop.xlane.xlu2 %990 }
 0x2d1   :  { %5185 = vrcp.f32 %v991_v50  ;;  %v1411_v50 = vpack.c.bf16 %v5418_v2, %v5418_v2  ;;  %v794_v2 = vadd.f32 %v5393_v15, %v239_v5 }
 0x2d2   :  { %5187 = vpow2.f32 %v1147_v14 }
 0x2d3   :  { %v1408_v1 = vpack.c.bf16 %v794_v2, %v794_v2 }
 0x2d7   :  { %v5186_v57 = vpop.eup %5185 }
 0x2d8   :  { %v995_v58 = vmul.f32 %v5186_v57, %v5182_v43  ;;  %v5188_v26 = vpop.eup %5187  ;;  %v892_v43 = vadd.f32 %v891_v63, %v246_v54  ;;  %v1248_v54 = vpack.c.bf16 %v5391_v13, %v5391_v13  ;;  %v1467_v57 = vsel %vm1001_vm0, %v1411_v50, 0 }
 0x2d9   :  { %v1152_v25 = vsel %vm973_vm1, %v5188_v26, 0.0 }
 0x2da   :  { %v997_v60 = vpack.c.bf16 %v995_v58, %v995_v58  ;;  %v1253_v45 = vpack.c.bf16 %v892_v43, %v892_v43  ;;  %v906_v43 = vadd.f32 %v5434_v22, %v247_v53  ;;  %v4123_v53 = vld [vmem:[#allocation2 + $0x3cc] sm:$0xf]  ;;  %v4974_v22 = vld [vmem:[#allocation2 + $0x460] sm:$0xf0] }
 0x2dc   :  { %4040 = vmatmul.msk.bf16.vlgmr.msra.gmra.mxu1 %vm973_vm1, %v997_v60  ;;  %v1327_v48 = vsel %vm1001_vm0, %v1253_v45, 0  ;;  %v4978_v45 = vld [vmem:[#allocation2 + $0x590] sm:$0xf0] }
 0x2dd   :  { %1261 = vmatpush.bf16.xpose.msra.mxu1 %v1250_v40 }
 0x2de   :  { %1119 = vmatmul.bf16.vlgmr.msra.gmra.mxu3 %v1105_v61 }
 0x2df   :  { %1317 = vmatpush.bf16.msra.mxu3 %v1308_v62 }
 0x351   :  { %v1014_v0 = vpop.f32.mrf.mxu3 }
 0x359   :  { %v1016_v6 = vpop.f32.mrf.mxu3  ;;  %v1033_v7 = vpop.f32.mrf.mxu1 }
 0x35a   :  { %v1037_v11 = vpack.c.bf16 %v1033_v7, %v1014_v0  ;;  %v5164_v7 = vld [vmem:[#allocation4 + $0xd] ss:$0 sm:$0xff] }
 0x35c   :  { %1094 = vmatmul.bf16.vlgmr.msra.gmra.mxu2 %v1037_v11 }
 0x361   :  { %v1035_v32 = vpop.f32.mrf.mxu1  ;;  %v1120_v16 = vpop.f32.mrf.mxu3 }
 0x362   :  { %v1137_v12 = vsel %vm973_vm1, %v1120_v16, -inf }
 0x363   :  { %1138 = vmax.xlane.f32.xlu1 %v1137_v12 }
 0x369   :  { %v1122_v21 = vpop.f32.mrf.mxu3 }
 0x36b   :  { %1153 = vadd.xlane.f32.xlu1 %v1152_v25 }
 0x36c   :  { %1275 = vmatmul.bf16.vlgmr.msrb.gmra.mxu2 %v1249_v23 }
 0x3d6   :  { %v1139_v27 = vpop.xlane.xlu1 %1138 }
 0x3d7   :  { %v1143_v28 = vsub.f32 %v1120_v16, %v1139_v27 }
 0x3d9   :  { %v1145_v29 = vmul.f32 1.442695, %v1143_v28 }
 0x3db   :  { %5189 = vpow2.f32 %v1145_v29 }
 0x3de   :  { %v1154_v18 = vpop.xlane.xlu1 %1153 }
 0x3df   :  { %5191 = vrcp.f32 %v1154_v18  ;;  %v1095_v37 = vpop.f32.mrf.mxu2  ;;  %v4139_v18 = vld [vmem:[#allocation2 + $0x88c] sm:$0xf] }
 0x3e0   :  { %v1103_v11 = vadd.f32 %v5164_v7, %v1095_v37  ;;  %v4990_v37 = vld [vmem:[#allocation2 + $0x920] sm:$0xf0] }
 0x3e1   :  { %v5190_v9 = vpop.eup %5189 }
 0x3e2   :  { %v1149_v17 = vsel %vm973_vm1, %v5190_v9, 0.0 }
 0x3e3   :  { %1150 = vadd.xlane.f32.xlu2 %v1149_v17  ;;  %v4140_v17 = vor.u32 %v4990_v37, %v4139_v18  ;;  %v4980_v18 = vld [vmem:[#allocation2 + $0x630] sm:$0xf]  ;;  %v4163_v37 = vld [vmem:[#allocation2 + $0x6c4] sm:$0xf0] }
 0x3e5   :  { %v5192_v30 = vpop.eup %5191  ;;  %1391 = vmatpush.bf16.msra.mxu2 %v4140_v17  ;;  %v4976_v17 = vld [vmem:[#allocation2 + $0x500] sm:$0xf] }
 0x3e6   :  { %v1158_v10 = vmul.f32 %v5192_v30, %v5188_v26  ;;  %v4986_v30 = vld [vmem:[#allocation2 + $0x7f0] sm:$0xf0] }
 0x3e7   :  { %v1097_v19 = vpop.f32.mrf.mxu2 }
 0x3e8   :  { %v1160_v31 = vpack.c.bf16 %v1158_v10, %v1158_v10  ;;  %v1104_v12 = vadd.f32 %v5164_v7, %v1097_v19 }
 0x3ea   :  { %4074 = vmatmul.msk.bf16.vlgmr.msrb.gmra.mxu3 %vm973_vm1, %v1160_v31 }
 0x3eb   :  { %1420 = vmatpush.bf16.xpose.msrb.mxu3 %v1409_v33  ;;  %v4131_v33 = vld [vmem:[#allocation2 + $0x62c] sm:$0xf] }
 0x3ef   :  { %v1276_v34 = vpop.f32.mrf.mxu2 }
 0x3f0   :  { %v1283_v38 = vsel %vm973_vm1, %v1276_v34, -inf }
 0x3f1   :  { %1284 = vmax.xlane.f32.xlu1 %v1283_v38 }
 0x3f7   :  { %v1278_v39 = vpop.f32.mrf.mxu2 }
 0x456   :  { %v1151_v41 = vpop.xlane.xlu2 %1150 }
 0x457   :  { %5193 = vrcp.f32 %v1151_v41 }
 0x45d   :  { %v5194_v44 = vpop.eup %5193 }
 0x45e   :  { %v1157_v46 = vmul.f32 %v5194_v44, %v5190_v9  ;;  %v4135_v9 = vld [vmem:[#allocation2 + $0x75c] sm:$0xf] }
 0x45f   :  { %v4136_v10 = vor.u32 %v4986_v30, %v4135_v9  ;;  %v4127_v44 = vld [vmem:[#allocation2 + $0x4fc] sm:$0xf]  ;;  %v4166_v9 = vor.u32 %v4980_v18, %v4163_v37  ;;  %v4159_v30 = vld [vmem:[#allocation2 + $0x594] sm:$0xf0]  ;;  %v4994_v18 = vld [vmem:[#allocation2 + $0x468] sm:$0xf0] }
 0x460   :  { %v1159_v47 = vpack.c.bf16 %v1157_v46, %v1157_v46 }
 0x461   :  { %1392 = vmatpush.bf16.msra.mxu2 %v4136_v10  ;;  %v4162_v10 = vor.u32 %v4976_v17, %v4159_v30  ;;  %v4993_v17 = vld [vmem:[#allocation2 + $0x338] sm:$0xf0] }
 0x462   :  { %4073 = vmatmul.msk.bf16.vlgmr.msrb.gmra.mxu1 %vm973_vm1, %v1159_v47  ;;  %v4128_v47 = vor.u32 %v4978_v45, %v4127_v44  ;;  %v4147_v44 = vld [vmem:[#allocation2 + $0x204] sm:$0xf0] }
 0x463   :  { %1336 = vmatpush.bf16.msrb.mxu1 %v1327_v48  ;;  %v1412_v48 = vpack.c.bf16 %v906_v43, %v906_v43  ;;  %v4964_v43 = vld [vmem:[#allocation2 + $0x170] sm:$0xf] }
 0x464   :  { %v1285_v24 = vpop.xlane.xlu1 %1284  ;;  %v4150_v45 = vor.u32 %v4964_v43, %v4147_v44  ;;  %v4237_v44 = vld [vmem:[#allocation2 + $0x898] sm:$0xf] }
 0x465   :  { %v1287_v49 = vsub.f32 %v1276_v34, %v1285_v24  ;;  %v4982_v34 = vld [vmem:[#allocation2 + $0x6c0] sm:$0xf0] }
 0x466   :  { %v4132_v41 = vor.u32 %v4982_v34, %v4131_v33  ;;  %v4968_v34 = vld [vmem:[#allocation2 + $0x2a0] sm:$0xf] }
 0x467   :  { %v1290_v51 = vmul.f32 1.442695, %v1287_v49 }
 0x468   :  { %1393 = vmatpush.bf16.msra.mxu2 %v4132_v41 }
 0x469   :  { %5195 = vpow2.f32 %v1290_v51 }
 0x46c   :  { %1394 = vmatpush.bf16.msra.mxu2 %v4128_v47 }
 0x46d   :  { %v1195_v52 = vpop.f32.mrf.mxu3 }
 0x46f   :  { %v5196_v55 = vpop.eup %5195 }
 0x470   :  { %v1295_v56 = vsel %vm973_vm1, %v5196_v55, 0.0 }
 0x471   :  { %1296 = vadd.xlane.f32.xlu1 %v1295_v56  ;;  %v4970_v56 = vld [vmem:[#allocation2 + $0x330] sm:$0xf0] }
 0x472   :  { %1262 = vmatmul.bf16.vlgmr.msra.gmra.mxu1 %v1248_v54  ;;  %v4119_v54 = vld [vmem:[#allocation2 + $0x29c] sm:$0xf] }
 0x473   :  { %1476 = vmatpush.bf16.msra.mxu1 %v1467_v57  ;;  %v4120_v57 = vor.u32 %v4970_v56, %v4119_v54 }
 0x475   :  { %v1197_v58 = vpop.f32.mrf.mxu3 }
 0x476   :  { %v4115_v58 = vld [vmem:[#allocation2 + $0x16c] sm:$0xf] }
 0x4df   :  { %v1176_v59 = vpop.f32.mrf.mxu1 }
 0x4e0   :  { %v1199_v60 = vpack.c.bf16 %v1195_v52, %v1176_v59  ;;  %v1486_v52 = vsel %vm1001_vm0, %v1412_v48, 0  ;;  %v4966_v59 = vld [vmem:[#allocation2 + $0x200] sm:$0xf0] }
 0x4e2   :  { %1240 = vmatmul.bf16.vlgmr.msrb.gmra.mxu0 %v1199_v60  ;;  %v4116_v60 = vor.u32 %v4966_v59, %v4115_v58  ;;  %v5315_v58 = vmov 0.0  }
 0x4e4   :  { %v1297_v40 = vpop.xlane.xlu1 %1296 }
 0x4e5   :  { %5197 = vrcp.f32 %v1297_v40  ;;  %v4111_v40 = vld [vmem:[#allocation2 + $0x3c] sm:$0xf] }
 0x4e7   :  { %v1178_v61 = vpop.f32.mrf.mxu1 }
 0x4e8   :  { %v4962_v61 = vld [vmem:[#allocation2 + $0xd0] sm:$0xf0] }
 0x4eb   :  { %v5198_v62 = vpop.eup %5197 }
 0x4ec   :  { %v1301_v13 = vmul.f32 %v5198_v62, %v5196_v55  ;;  %v4124_v55 = vor.u32 %v4974_v22, %v4123_v53  ;;  %v4112_v62 = vor.u32 %v4962_v61, %v4111_v40  ;;  %v48_v53 = vlaneseq }
 0x4ee   :  { %v1303_v63 = vpack.c.bf16 %v1301_v13, %v1301_v13  ;;  %1395 = vmatpush.bf16.msra.mxu2 %v4124_v55  ;;  %v49_v55 = vand.u32 127, %v48_v53  ;;  %v5004_v53 = vld [vmem:[#allocation2 + $0x6cc] sm:$0xf0] }
 0x4ef   :  { %v1263_v0 = vpop.f32.mrf.mxu1 }
 0x4f0   :  { %4108 = vmatmul.msk.bf16.vlgmr.msrb.gmra.mxu1 %vm973_vm1, %v1303_v63  ;;  %v1280_v3 = vsel %vm973_vm1, %v1263_v0, -inf  ;;  %vm50_vm2 = vcmp.lt.s32.totalorder %v49_v55, 32 }
 0x4f1   :  { %1281 = vmax.xlane.f32.xlu2 %v1280_v3  ;;  %v5496_v59 = vsel %vm50_vm2, 1.0, %v5315_v58 }
 0x4f2   :  { %1434 = vmatmul.bf16.vlgmr.msra.gmra.mxu0 %v1408_v1  ;;  %1396 = vmatpush.bf16.msra.mxu2 %v4120_v57 }
 0x4f6   :  { %1397 = vmatpush.bf16.msra.mxu2 %v4116_v60 }
 0x4f7   :  { %v1265_v6 = vpop.f32.mrf.mxu1 }
 0x4fa   :  { %1398 = vmatpush.bf16.msra.mxu2 %v4112_v62 }
 0x55f   :  { %v1241_v14 = vpop.f32.mrf.mxu0 }
 0x560   :  { %v5474_v32 = vadd.f32 %v1241_v14, %v1103_v11 }
 0x564   :  { %v1282_v16 = vpop.xlane.xlu2 %1281 }
 0x565   :  { %v1286_v4 = vsub.f32 %v1263_v0, %v1282_v16 }
 0x567   :  { %v1288_v5 = vmul.f32 1.442695, %v1286_v4  ;;  %v1243_v15 = vpop.f32.mrf.mxu0 }
 0x568   :  { %v5476_v20 = vadd.f32 %v1243_v15, %v1104_v12 }
 0x569   :  { %5199 = vpow2.f32 %v1288_v5 }
 0x56d   :  { %v5478_v26 = vpop.f32.mrf.mxu1 }
 0x56f   :  { %v5200_v21 = vpop.eup %5199  ;;  %v1435_v23 = vpop.f32.mrf.mxu0 }
 0x570   :  { %v1442_v25 = vsel %vm973_vm1, %v1435_v23, -inf  ;;  %v1292_v27 = vsel %vm973_vm1, %v5200_v21, 0.0 }
 0x571   :  { %1443 = vmax.xlane.f32.xlu2 %v1442_v25  ;;  %1293 = vadd.xlane.f32.xlu0 %v1292_v27  ;;  %v4171_v25 = vld [vmem:[#allocation2 + $0x924] sm:$0xf0] }
 0x575   :  { %v1340_v28 = vpop.f32.mrf.mxu1 }
 0x576   :  { %v4167_v28 = vld [vmem:[#allocation2 + $0x7f4] sm:$0xf0] }
 0x577   :  { %v1437_v29 = vpop.f32.mrf.mxu0 }
 0x5e4   :  { %v1294_v19 = vpop.xlane.xlu0 %1293  ;;  %v1444_v31 = vpop.xlane.xlu2 %1443 }
 0x5e5   :  { %5201 = vrcp.f32 %v1294_v19  ;;  %v1446_v38 = vsub.f32 %v1435_v23, %v1444_v31  ;;  %v4988_v23 = vld [vmem:[#allocation2 + $0x890] sm:$0xf]  ;;  %v4155_v31 = vld [vmem:[#allocation2 + $0x464] sm:$0xf0] }
 0x5e6   :  { %v4174_v27 = vor.u32 %v4988_v23, %v4171_v25  ;;  %v4972_v19 = vld [vmem:[#allocation2 + $0x3d0] sm:$0xf]  ;;  %v4996_v23 = vld [vmem:[#allocation2 + $0x6c8] sm:$0xf0] }
 0x5e7   :  { %v1449_v39 = vmul.f32 1.442695, %v1446_v38  ;;  %v4158_v33 = vor.u32 %v4972_v19, %v4155_v31  ;;  %v4151_v38 = vld [vmem:[#allocation2 + $0x334] sm:$0xf0]  ;;  %v4992_v19 = vld [vmem:[#allocation2 + $0x208] sm:$0xf0] }
 0x5e8   :  { %1534 = vmatpush.bf16.msrb.mxu0 %v4174_v27  ;;  %v4995_v27 = vld [vmem:[#allocation2 + $0x598] sm:$0xf0]  ;;  %v4177_v31 = vld [vmem:[#allocation2 + $0x44] sm:$0xf] }
 0x5e9   :  { %5203 = vpow2.f32 %v1449_v39  ;;  %v4154_v39 = vor.u32 %v4968_v34, %v4151_v38  ;;  %v4991_v38 = vld [vmem:[#allocation2 + $0xd8] sm:$0xf0] }
 0x5eb   :  { %v5202_v46 = vpop.eup %5201 }
 0x5ec   :  { %v1300_v24 = vmul.f32 %v5202_v46, %v5200_v21 }
 0x5ee   :  { %v1302_v49 = vpack.c.bf16 %v1300_v24, %v1300_v24  ;;  %v4960_v24 = vld [vmem:[#allocation2 + $0x40] sm:$0xf] }
 0x5ef   :  { %v5204_v51 = vpop.eup %5203 }
 0x5f0   :  { %4107 = vmatmul.msk.bf16.vlgmr.msra.gmra.mxu3 %vm973_vm1, %v1302_v49  ;;  %v1454_v50 = vsel %vm973_vm1, %v5204_v51, 0.0  ;;  %v4143_v49 = vld [vmem:[#allocation2 + $0xd4] sm:$0xf0] }
 0x5f1   :  { %1495 = vmatpush.bf16.msra.mxu3 %v1486_v52  ;;  %1455 = vadd.xlane.f32.xlu2 %v1454_v50 }
 0x600   :  { %1421 = vmatmul.bf16.vlgmr.msrb.gmra.mxu3 %v1407_v42 }
 0x664   :  { %v1456_v2 = vpop.xlane.xlu2 %1455 }
 0x665   :  { %5205 = vrcp.f32 %v1456_v2 }
 0x66b   :  { %v5206_v8 = vpop.eup %5205 }
 0x66c   :  { %v1460_v13 = vmul.f32 %v5206_v8, %v5204_v51  ;;  %v4146_v51 = vor.u32 %v4960_v24, %v4143_v49  ;;  %v5005_v24 = vld [vmem:[#allocation2 + $0x7fc] sm:$0xf0] }
 0x66e   :  { %v1462_v63 = vpack.c.bf16 %v1460_v13, %v1460_v13 }
 0x670   :  { %4142 = vmatmul.msk.bf16.vlgmr.msra.gmra.mxu3 %vm973_vm1, %v1462_v63 }
 0x673   :  { %v1319_v0 = vpop.f32.mrf.mxu3 }
 0x674   :  { %v1342_v1 = vpack.c.bf16 %v5478_v26, %v1319_v0  ;;  %v4984_v26 = vld [vmem:[#allocation2 + $0x760] sm:$0xf] }
 0x675   :  { %v4170_v29 = vor.u32 %v4984_v26, %v4167_v28  ;;  %v4193_v26 = vld [vmem:[#allocation2 + $0x504] sm:$0xf] }
 0x676   :  { %1399 = vmatmul.bf16.vlgmr.msra.gmra.mxu2 %v1342_v1  ;;  %v4194_v28 = vor.u32 %v4995_v27, %v4193_v26  ;;  %v4213_v26 = vld [vmem:[#allocation2 + $0x178] sm:$0xf]  ;;  %v5000_v27 = vld [vmem:[#allocation2 + $0x20c] sm:$0xf0] }
 0x677   :  { %1535 = vmatpush.bf16.msrb.mxu0 %v4170_v29  ;;  %v4189_v29 = vld [vmem:[#allocation2 + $0x3d4] sm:$0xf] }
 0x678   :  { %v4190_v37 = vor.u32 %v4994_v18, %v4189_v29  ;;  %v4999_v29 = vld [vmem:[#allocation2 + $0xdc] sm:$0xf0] }
 0x67b   :  { %v1321_v3 = vpop.f32.mrf.mxu3  ;;  %1536 = vmatpush.bf16.msrb.mxu0 %v4166_v9  ;;  %v4185_v9 = vld [vmem:[#allocation2 + $0x2a4] sm:$0xf] }
 0x67c   :  { %v4186_v30 = vor.u32 %v4993_v17, %v4185_v9  ;;  %v5167_v9 = vld [vmem:[#allocation4 + $0xe] ss:$0 sm:$0xff] }
 0x67f   :  { %1537 = vmatpush.bf16.msrb.mxu0 %v4162_v10  ;;  %v4181_v10 = vld [vmem:[#allocation2 + $0x174] sm:$0xf] }
 0x680   :  { %v4182_v34 = vor.u32 %v4992_v19, %v4181_v10 }
 0x683   :  { %v1422_v6 = vpop.f32.mrf.mxu3  ;;  %1538 = vmatpush.bf16.msrb.mxu0 %v4158_v33 }
 0x684   :  { %v1439_v7 = vsel %vm973_vm1, %v1422_v6, -inf }
 0x685   :  { %1440 = vmax.xlane.f32.xlu0 %v1439_v7 }
 0x687   :  { %1539 = vmatpush.bf16.msrb.mxu0 %v4154_v39 }
 0x68b   :  { %v1424_v11 = vpop.f32.mrf.mxu3  ;;  %1540 = vmatpush.bf16.msrb.mxu0 %v4150_v45  ;;  %v5006_v45 = vld [vmem:[#allocation2 + $0x92c] sm:$0xf0] }
 0x68f   :  { %1541 = vmatpush.bf16.msrb.mxu0 %v4146_v51 }
 0x6f3   :  { %v1497_v14 = vpop.f32.mrf.mxu3 }
 0x6f8   :  { %v1441_v16 = vpop.xlane.xlu0 %1440 }
 0x6f9   :  { %v1445_v4 = vsub.f32 %v1422_v6, %v1441_v16  ;;  %v1400_v22 = vpop.f32.mrf.mxu2  ;;  %v4998_v16 = vld [vmem:[#allocation2 + $0x928] sm:$0xf0] }
 0x6fa   :  { %v1405_v54 = vadd.f32 %v1400_v22, %v5474_v32 }
 0x6fb   :  { %v1447_v12 = vmul.f32 1.442695, %v1445_v4  ;;  %v1499_v5 = vpop.f32.mrf.mxu3 }
 0x6fc   :  { %v4997_v5 = vld [vmem:[#allocation2 + $0x7f8] sm:$0xf0] }
 0x6fd   :  { %5207 = vpow2.f32 %v1447_v12  ;;  %v4201_v12 = vld [vmem:[#allocation2 + $0x764] sm:$0xf] }
 0x701   :  { %v1402_v40 = vpop.f32.mrf.mxu2 }
 0x702   :  { %v1406_v62 = vadd.f32 %v1402_v40, %v5476_v20 }
 0x703   :  { %v5208_v15 = vpop.eup %5207 }
 0x704   :  { %v1451_v21 = vsel %vm973_vm1, %v5208_v15, 0.0 }
 0x705   :  { %1452 = vadd.xlane.f32.xlu0 %v1451_v21  ;;  %v4197_v21 = vld [vmem:[#allocation2 + $0x634] sm:$0xf] }
 0x706   :  { %v4198_v25 = vor.u32 %v4996_v23, %v4197_v21  ;;  %v4217_v23 = vld [vmem:[#allocation2 + $0x2a8] sm:$0xf] }
 0x778   :  { %v1453_v41 = vpop.xlane.xlu0 %1452 }
 0x779   :  { %5209 = vrcp.f32 %v1453_v41  ;;  %v4178_v41 = vor.u32 %v4991_v38, %v4177_v31 }
 0x77f   :  { %v5210_v46 = vpop.eup %5209 }
 0x780   :  { %v1459_v47 = vmul.f32 %v5210_v46, %v5208_v15  ;;  %v4202_v15 = vor.u32 %v4997_v5, %v4201_v12  ;;  %v4233_v46 = vld [vmem:[#allocation2 + $0x768] sm:$0xf]  ;;  %v4221_v5 = vld [vmem:[#allocation2 + $0x3d8] sm:$0xf] }
 0x781   :  { %v4234_v51 = vor.u32 %v5005_v24, %v4233_v46  ;;  %v5097_v24 = vld [vmem:[#allocation2 + $0x930] sm:$0xf0] }
 0x782   :  { %v1461_v48 = vpack.c.bf16 %v1459_v47, %v1459_v47 }
 0x784   :  { %4141 = vmatmul.msk.bf16.vlgmr.msra.gmra.mxu1 %vm973_vm1, %v1461_v48  ;;  %v4238_v48 = vor.u32 %v5006_v45, %v4237_v44 }
 0x786   :  { %1762 = vmatpush.bf16.msrb.mxu2 %v4238_v48  ;;  %v4577_v48 = vld [vmem:[#allocation2 + $0x89c] sm:$0xf] }
 0x78a   :  { %1763 = vmatpush.bf16.msrb.mxu2 %v4234_v51  ;;  %v4578_v51 = vor.u32 %v5097_v24, %v4577_v48 }
 0x78c   :  { %2439 = vmatpush.bf16.msrb.mxu3 %v4578_v51 }
 0x801   :  { %v1478_v52 = vpop.f32.mrf.mxu1 }
 0x802   :  { %v1501_v50 = vpack.c.bf16 %v1497_v14, %v1478_v52  ;;  %v4205_v14 = vld [vmem:[#allocation2 + $0x894] sm:$0xf] }
 0x803   :  { %v4206_v4 = vor.u32 %v4998_v16, %v4205_v14 }
 0x804   :  { %1542 = vmatmul.bf16.vlgmr.msrb.gmra.mxu0 %v1501_v50 }
 0x805   :  { %1677 = vmatpush.bf16.msrb.mxu1 %v4206_v4 }
 0x809   :  { %v1480_v42 = vpop.f32.mrf.mxu1  ;;  %1678 = vmatpush.bf16.msrb.mxu1 %v4202_v15  ;;  %v5002_v15 = vld [vmem:[#allocation2 + $0x46c] sm:$0xf0] }
 0x80a   :  { %v4229_v42 = vld [vmem:[#allocation2 + $0x638] sm:$0xf]  ;;  %v4222_v21 = vor.u32 %v5002_v15, %v4221_v5  ;;  %v4433_v15 = vld [vmem:[#allocation2 + $0x50c] sm:$0xf] }
 0x80d   :  { %1679 = vmatpush.bf16.msrb.mxu1 %v4198_v25 }
 0x811   :  { %1680 = vmatpush.bf16.msrb.mxu1 %v4194_v28  ;;  %v4214_v28 = vor.u32 %v5000_v27, %v4213_v26  ;;  %v4441_v26 = vld [vmem:[#allocation2 + $0x514] sm:$0xf]  ;;  %v5062_v27 = vld [vmem:[#allocation2 + $0x5a8] sm:$0xf0] }
 0x815   :  { %1681 = vmatpush.bf16.msrb.mxu1 %v4190_v37 }
 0x819   :  { %1682 = vmatpush.bf16.msrb.mxu1 %v4186_v30 }
 0x81d   :  { %1683 = vmatpush.bf16.msrb.mxu1 %v4182_v34  ;;  %v5168_v34 = vld [vmem:[#allocation4 + $0xf] ss:$0 sm:$0xff] }
 0x821   :  { %1684 = vmatpush.bf16.msrb.mxu1 %v4178_v41 }
 0x881   :  { %v1543_v56 = vpop.f32.mrf.mxu0 }
 0x882   :  { %v1548_v57 = vadd.f32 %v1543_v56, %v1405_v54  ;;  %v4230_v54 = vor.u32 %v5004_v53, %v4229_v42  ;;  %v4225_v56 = vld [vmem:[#allocation2 + $0x508] sm:$0xf]  ;;  %v5098_v42 = vld [vmem:[#allocation2 + $0x938] sm:$0xf0] }
 0x884   :  { %v1550_v60 = vadd.f32 %v1548_v57, %v5356_v35  ;;  %v5003_v57 = vld [vmem:[#allocation2 + $0x59c] sm:$0xf0]  ;;  %1764 = vmatpush.bf16.msrb.mxu2 %v4230_v54 }
 0x885   :  { %v4226_v40 = vor.u32 %v5003_v57, %v4225_v56  ;;  %v4587_v54 = vld [vmem:[#allocation2 + $0x93c] sm:$0xf0]  ;;  %v4529_v56 = vld [vmem:[#allocation2 + $0x76c] sm:$0xf] }
 0x886   :  { %v1554_v61 = vmul.f32 %v5496_v59, %v1550_v60 }
 0x888   :  { %1556 = vadd.xlane.f32.xlu1 %v1554_v61  ;;  %1765 = vmatpush.bf16.msrb.mxu2 %v4226_v40  ;;  %v4531_v40 = vld [vmem:[#allocation2 + $0x804] sm:$0xf0] }
 0x889   :  { %v1545_v2 = vpop.f32.mrf.mxu0 }
 0x88a   :  { %v1549_v8 = vadd.f32 %v1545_v2, %v1406_v62 }
 0x88c   :  { %v1551_v13 = vadd.f32 %v1549_v8, %v5358_v36  ;;  %1766 = vmatpush.bf16.msrb.mxu2 %v4222_v21  ;;  %v5061_v21 = vld [vmem:[#allocation2 + $0x5a0] sm:$0xf0] }
 0x88e   :  { %v1555_v32 = vmul.f32 %v5496_v59, %v1551_v13 }
 0x890   :  { %1558 = vadd.xlane.f32.xlu2 %v1555_v32 }
 0x8fb   :  { %v1557_v63 = vpop.xlane.xlu1 %1556 }
 0x8fc   :  { %v1560_v0 = vmul.f32 0.03125, %v1557_v63 }
 0x8fe   :  { %v1562_v1 = vsub.f32 %v1550_v60, %v1560_v0 }
 0x900   :  { %v5504_v3 = vmul.f32 %v5496_v59, %v1562_v1  ;;  %v5165_v1 = vld [vmem:[#allocation4 + $0x10] ss:$0 sm:$0xff] }
 0x902   :  { %v1566_v35 = vmul.f32 %v5504_v3, %v5504_v3 }
 0x903   :  { %v1559_v6 = vpop.xlane.xlu2 %1558 }
 0x904   :  { %v1561_v7 = vmul.f32 0.03125, %v1559_v6  ;;  %1568 = vadd.xlane.f32.xlu0 %v1566_v35 }
 0x906   :  { %v1563_v20 = vsub.f32 %v1551_v13, %v1561_v7 }
 0x908   :  { %v5509_v11 = vmul.f32 %v5496_v59, %v1563_v20 }
 0x90a   :  { %v1567_v36 = vmul.f32 %v5509_v11, %v5509_v11 }
 0x90c   :  { %1570 = vadd.xlane.f32.xlu1 %v1567_v36  ;;  %v5166_v36 = vld [vmem:[#allocation4 + $0x11] ss:$0 sm:$0xff] }
 0x977   :  { %v1569_v33 = vpop.xlane.xlu0 %1568 }
 0x978   :  { %v1572_v39 = vmul.f32 0.03125, %v1569_v33 }
 0x97a   :  { %v1574_v43 = vadd.f32 1e-05, %v1572_v39 }
 0x97c   :  { %5211 = vrsqrt.f32 %v1574_v43  ;;  %vm1582_vm4 = vweird.f32 %v1574_v43 }
 0x97f   :  { %v1571_v47 = vpop.xlane.xlu1 %1570 }
 0x980   :  { %v1573_v49 = vmul.f32 0.03125, %v1571_v47 }
 0x982   :  { %v5212_v52 = vpop.eup %5211  ;;  %v1575_v50 = vadd.f32 1e-05, %v1573_v49  ;;  %v5091_v49 = vld [vmem:[#allocation2 + $0x8a0] sm:$0xf] }
 0x983   :  { %v1577_v22 = vmul.f32 %v5212_v52, %v1574_v43  ;;  %vm1583_vm3 = vweird.f32 %v5212_v52 }
 0x984   :  { %5213 = vrsqrt.f32 %v1575_v50  ;;  %vm1584_vm5 = vmor %vm1582_vm4, %vm1583_vm3  ;;  %vm1592_vm7 = vweird.f32 %v1575_v50 }
 0x985   :  { %v1578_v55 = vmul.f32 %v5212_v52, %v1577_v22 }
 0x987   :  { %v1579_v58 = vmul.f32 0.5, %v1578_v55  ;;  %v5092_v55 = vld [vmem:[#allocation2 + $0x8a8] sm:$0xf] }
 0x988   :  { %v4590_v57 = vor.u32 %v5092_v55, %v4587_v54  ;;  %v5037_v55 = vld [vmem:[#allocation2 + $0x340] sm:$0xf0]  ;;  %v5031_v54 = vld [vmem:[#allocation2 + $0x2b0] sm:$0xf] }
 0x989   :  { %v1580_v60 = vsub.f32 1.5, %v1579_v58  ;;  %v5085_v58 = vld [vmem:[#allocation2 + $0x800] sm:$0xf0] }
 0x98a   :  { %v5214_v61 = vpop.eup %5213 }
 0x98b   :  { %v1581_v62 = vmul.f32 %v5212_v52, %v1580_v60  ;;  %v1587_v2 = vmul.f32 %v5214_v61, %v1575_v50  ;;  %vm1593_vm6 = vweird.f32 %v5214_v61  ;;  %v4585_v50 = vld [vmem:[#allocation2 + $0x8a4] sm:$0xf]  ;;  %v5079_v60 = vld [vmem:[#allocation2 + $0x770] sm:$0xf] }
 0x98c   :  { %vm1594_vm8 = vmor %vm1592_vm7, %vm1593_vm6  ;;  %v4586_v22 = vor.u32 %v5098_v42, %v4585_v50 }
 0x98d   :  { %v1588_v8 = vmul.f32 %v5214_v61, %v1587_v2  ;;  %v1585_v13 = vsel %vm1584_vm5, %v5212_v52, %v1581_v62  ;;  %v4579_v52 = vld [vmem:[#allocation2 + $0x934] sm:$0xf0]  ;;  %v4534_v62 = vor.u32 %v5079_v60, %v4531_v40  ;;  %v4537_v2 = vld [vmem:[#allocation2 + $0x774] sm:$0xf]  ;;  %v5038_v60 = vld [vmem:[#allocation2 + $0x348] sm:$0xf0] }
 0x98e   :  { %v1596_v0 = vmul.f32 %v1585_v13, %v5504_v3  ;;  %v5001_v3 = vld [vmem:[#allocation2 + $0x33c] sm:$0xf0]  ;;  %v4582_v53 = vor.u32 %v5091_v49, %v4579_v52  ;;  %2467 = vmatpush.bf16.msra.mxu1 %v4586_v22  ;;  %v5080_v13 = vld [vmem:[#allocation2 + $0x778] sm:$0xf]  ;;  %v4337_v22 = vld [vmem:[#allocation2 + $0x2ac] sm:$0xf] }
 0x98f   :  { %v1589_v32 = vmul.f32 0.5, %v1588_v8  ;;  %v4218_v25 = vor.u32 %v5001_v3, %v4217_v23  ;;  %v5086_v8 = vld [vmem:[#allocation2 + $0x808] sm:$0xf0]  ;;  %v5055_v23 = vld [vmem:[#allocation2 + $0x510] sm:$0xf] }
 0x990   :  { %v1601_v20 = vmul.f32 %v5165_v1, %v1596_v0  ;;  %2453 = vmatpush.bf16.msra.mxu0 %v4582_v53  ;;  %v4481_v0 = vld [vmem:[#allocation2 + $0x63c] sm:$0xf] }
 0x991   :  { %v1590_v63 = vsub.f32 1.5, %v1589_v32  ;;  %1767 = vmatpush.bf16.msrb.mxu2 %v4218_v25  ;;  %v4538_v32 = vor.u32 %v5086_v8, %v4537_v2  ;;  %v4435_v25 = vld [vmem:[#allocation2 + $0x5a4] sm:$0xf0]  ;;  %v4347_v2 = vld [vmem:[#allocation2 + $0x34c] sm:$0xf0] }
 0x992   :  { %v1606_v16 = vadd.f32 %v5166_v36, %v1601_v20  ;;  %v4489_v20 = vld [vmem:[#allocation2 + $0x644] sm:$0xf]  ;;  %v4289_v8 = vld [vmem:[#allocation2 + $0x17c] sm:$0xf] }
 0x993   :  { %v1591_v35 = vmul.f32 %v5214_v61, %v1590_v63  ;;  %v4539_v63 = vld [vmem:[#allocation2 + $0x80c] sm:$0xf0]  ;;  %2468 = vmatpush.bf16.msra.mxu1 %v4538_v32  ;;  %v5019_v32 = vld [vmem:[#allocation2 + $0x180] sm:$0xf] }
 0x994   :  { %2454 = vmatpush.bf16.msra.mxu0 %v4534_v62  ;;  %v5032_v62 = vld [vmem:[#allocation2 + $0x2b8] sm:$0xf] }
 0x995   :  { %v1595_v6 = vsel %vm1594_vm8, %v5214_v61, %v1591_v35  ;;  %1768 = vmatpush.bf16.msrb.mxu2 %v4214_v28  ;;  %v4530_v61 = vor.u32 %v5085_v58, %v4529_v56  ;;  %v4542_v35 = vor.u32 %v5080_v13, %v4539_v63  ;;  %v5056_v28 = vld [vmem:[#allocation2 + $0x518] sm:$0xf]  ;;  %v4338_v56 = vor.u32 %v5037_v55, %v4337_v22  ;;  %v4345_v58 = vld [vmem:[#allocation2 + $0x2b4] sm:$0xf]  ;;  %v5075_v22 = vld [vmem:[#allocation2 + $0x6e0] sm:$0xf0] }
 0x996   :  { %v1597_v7 = vmul.f32 %v1595_v6, %v5509_v11  ;;  %v4209_v11 = vld [vmem:[#allocation2 + $0x48] sm:$0xf]  ;;  %v5067_v6 = vld [vmem:[#allocation2 + $0x640] sm:$0xf]  ;;  %v5025_v13 = vld [vmem:[#allocation2 + $0x210] sm:$0xf0] }
 0x997   :  { %v4210_v18 = vor.u32 %v4999_v29, %v4209_v11  ;;  %2440 = vmatpush.bf16.msrb.mxu3 %v4530_v61  ;;  %v4443_v11 = vld [vmem:[#allocation2 + $0x5ac] sm:$0xf0]  ;;  %v4434_v29 = vor.u32 %v5061_v21, %v4433_v15  ;;  %v4346_v61 = vor.u32 %v5038_v60, %v4345_v58  ;;  %v4290_v63 = vor.u32 %v5025_v13, %v4289_v8  ;;  %v4243_v15 = vld [vmem:[#allocation2 + $0xe4] sm:$0xf0]  ;;  %v4249_v21 = vld [vmem:[#allocation2 + $0x54] sm:$0xf] }
 0x998   :  { %v1602_v14 = vmul.f32 %v5165_v1, %v1597_v7  ;;  %v5073_v1 = vld [vmem:[#allocation2 + $0x6d0] sm:$0xf0]  ;;  %v4483_v7 = vld [vmem:[#allocation2 + $0x6d4] sm:$0xf0]  ;;  %v5069_v55 = vld [vmem:[#allocation2 + $0x650] sm:$0xf] }
 0x999   :  { %1769 = vmatpush.bf16.msrb.mxu2 %v4210_v18  ;;  %v4438_v18 = vor.u32 %v5055_v23, %v4435_v25  ;;  %v5014_v23 = vld [vmem:[#allocation2 + $0xe8] sm:$0xf0]  ;;  %v5063_v8 = vld [vmem:[#allocation2 + $0x5b0] sm:$0xf0]  ;;  %v5057_v13 = vld [vmem:[#allocation2 + $0x520] sm:$0xf] }
 0x99a   :  { %v1607_v4 = vadd.f32 %v5166_v36, %v1602_v14  ;;  %v4482_v36 = vor.u32 %v5073_v1, %v4481_v0  ;;  %v5074_v14 = vld [vmem:[#allocation2 + $0x6d8] sm:$0xf0]  ;;  %v4291_v0 = vld [vmem:[#allocation2 + $0x214] sm:$0xf0]  ;;  %v4297_v1 = vld [vmem:[#allocation2 + $0x184] sm:$0xf]  ;;  %v4250_v25 = vor.u32 %v5014_v23, %v4249_v21 }
 0x99b   :  { %v4490_v5 = vor.u32 %v5074_v14, %v4489_v20  ;;  %v5020_v20 = vld [vmem:[#allocation2 + $0x188] sm:$0xf]  ;;  %v5076_v58 = vld [vmem:[#allocation2 + $0x6e8] sm:$0xf0] }
 0x99c   :  { %v1608_v12 = vpack.c.bf16 %v1607_v4, %v1606_v16  ;;  %2441 = vmatpush.bf16.msrb.mxu3 %v4482_v36  ;;  %v4299_v36 = vld [vmem:[#allocation2 + $0x21c] sm:$0xf0]  ;;  %v5052_v21 = vld [vmem:[#allocation2 + $0x488] sm:$0xf0] }
 0x99d   :  { %2481 = vmatpush.bf16.msra.mxu2 %v4590_v57  ;;  %2469 = vmatpush.bf16.msra.mxu1 %v4490_v5  ;;  %v4339_v57 = vld [vmem:[#allocation2 + $0x344] sm:$0xf0]  ;;  %v4302_v14 = vor.u32 %v5020_v20, %v4299_v36  ;;  %v4459_v20 = vld [vmem:[#allocation2 + $0x5bc] sm:$0xf0] }
 0x99e   :  { %1685 = vmatmul.bf16.vlgmr.msrb.gmra.mxu1 %v1608_v12  ;;  %v4486_v12 = vor.u32 %v5067_v6, %v4483_v7  ;;  %v4342_v40 = vor.u32 %v5031_v54, %v4339_v57  ;;  %v4294_v6 = vor.u32 %v5019_v32, %v4291_v0  ;;  %v4505_v57 = vld [vmem:[#allocation2 + $0x654] sm:$0xf]  ;;  %v4457_v0 = vld [vmem:[#allocation2 + $0x524] sm:$0xf] }
 0x9a0   :  { %2455 = vmatpush.bf16.msra.mxu0 %v4486_v12  ;;  %2442 = vmatpush.bf16.msrb.mxu3 %v4434_v29  ;;  %v5007_v12 = vld [vmem:[#allocation2 + $0x50] sm:$0xf]  ;;  %v5099_v29 = vld [vmem:[#allocation2 + $0x940] sm:$0xf0] }
 0x9a1   :  { %2482 = vmatpush.bf16.msra.mxu2 %v4542_v35  ;;  %v5026_v35 = vld [vmem:[#allocation2 + $0x218] sm:$0xf0] }
 0x9a2   :  { %v4298_v7 = vor.u32 %v5026_v35, %v4297_v1  ;;  %v5064_v1 = vld [vmem:[#allocation2 + $0x5b8] sm:$0xf0] }
 0x9a4   :  { %2456 = vmatpush.bf16.msra.mxu0 %v4438_v18  ;;  %v5093_v18 = vld [vmem:[#allocation2 + $0x8b0] sm:$0xf] }
 0xa1b   :  { %v1686_v37 = vpop.f32.mrf.mxu1 }
 0xa1c   :  { %v1687_v17 = vadd.f32 %v5167_v9, %v1686_v37  ;;  %v4442_v37 = vor.u32 %v5062_v27, %v4441_v26  ;;  %v5008_v26 = vld [vmem:[#allocation2 + $0x58] sm:$0xf]  ;;  %v4251_v27 = vld [vmem:[#allocation2 + $0xec] sm:$0xf0] }
 0xa1e   :  { %v1691_v19 = vmax.f32 %v1687_v17, 0.0  ;;  %v5049_v17 = vld [vmem:[#allocation2 + $0x470] sm:$0xf0]  ;;  %2470 = vmatpush.bf16.msra.mxu1 %v4442_v37  ;;  %v4595_v37 = vld [vmem:[#allocation2 + $0x944] sm:$0xf0] }
 0xa23   :  { %v1688_v30 = vpop.f32.mrf.mxu1 }
 0xa24   :  { %v1689_v10 = vadd.f32 %v5167_v9, %v1688_v30  ;;  %v4385_v9 = vld [vmem:[#allocation2 + $0x3dc] sm:$0xf]  ;;  %v5043_v30 = vld [vmem:[#allocation2 + $0x3e0] sm:$0xf] }
 0xa26   :  { %v1692_v31 = vmax.f32 %v1689_v10, 0.0  ;;  %v4446_v10 = vor.u32 %v5056_v28, %v4443_v11  ;;  %v4593_v28 = vld [vmem:[#allocation2 + $0x8ac] sm:$0xf]  ;;  %v4254_v11 = vor.u32 %v5008_v26, %v4251_v27  ;;  %v4411_v26 = vld [vmem:[#allocation2 + $0x48c] sm:$0xf0] }
 0xa28   :  { %v1693_v33 = vpack.c.bf16 %v1692_v31, %v1691_v19  ;;  %v4387_v19 = vld [vmem:[#allocation2 + $0x474] sm:$0xf0]  ;;  %v4393_v31 = vld [vmem:[#allocation2 + $0x3e4] sm:$0xf] }
 0xa2a   :  { %1770 = vmatmul.bf16.vlgmr.msrb.gmra.mxu2 %v1693_v33  ;;  %v5050_v33 = vld [vmem:[#allocation2 + $0x478] sm:$0xf0] }
 0xaad   :  { %v1771_v38 = vpop.f32.mrf.mxu2 }
 0xaae   :  { %v1772_v39 = vadd.f32 %v5168_v34, %v1771_v38  ;;  %v4395_v38 = vld [vmem:[#allocation2 + $0x47c] sm:$0xf0] }
 0xab0   :  { %v5515_v41 = vadd.f32 %v1772_v39, %v1606_v16  ;;  %v5068_v16 = vld [vmem:[#allocation2 + $0x648] sm:$0xf] }
 0xab2   :  { %v1780_v43 = vmul.f32 %v5496_v59, %v5515_v41 }
 0xab4   :  { %1782 = vadd.xlane.f32.xlu2 %v1780_v43  ;;  %v4386_v43 = vor.u32 %v5049_v17, %v4385_v9  ;;  %v4594_v9 = vor.u32 %v5099_v29, %v4593_v28  ;;  %v4598_v17 = vor.u32 %v5093_v18, %v4595_v37  ;;  %v4353_v28 = vld [vmem:[#allocation2 + $0x2bc] sm:$0xf]  ;;  %v5033_v29 = vld [vmem:[#allocation2 + $0x2c0] sm:$0xf]  ;;  %v4355_v37 = vld [vmem:[#allocation2 + $0x354] sm:$0xf0] }
 0xab5   :  { %v1773_v44 = vpop.f32.mrf.mxu2 }
 0xab6   :  { %v1774_v45 = vadd.f32 %v5168_v34, %v1773_v44  ;;  %v5044_v34 = vld [vmem:[#allocation2 + $0x3e8] sm:$0xf]  ;;  %2443 = vmatpush.bf16.msrb.mxu3 %v4386_v43 }
 0xab7   :  { %v4398_v48 = vor.u32 %v5044_v34, %v4395_v38  ;;  %v4545_v34 = vld [vmem:[#allocation2 + $0x77c] sm:$0xf]  ;;  %v5087_v38 = vld [vmem:[#allocation2 + $0x810] sm:$0xf0] }
 0xab8   :  { %v5519_v46 = vadd.f32 %v1774_v45, %v1607_v4  ;;  %v4491_v4 = vld [vmem:[#allocation2 + $0x6dc] sm:$0xf0]  ;;  %v4390_v45 = vor.u32 %v5043_v30, %v4387_v19  ;;  %v4601_v30 = vld [vmem:[#allocation2 + $0x8b4] sm:$0xf]  ;;  %v5094_v19 = vld [vmem:[#allocation2 + $0x8b8] sm:$0xf]  ;;  %v4546_v43 = vor.u32 %v5087_v38, %v4545_v34 }
 0xab9   :  { %v4494_v3 = vor.u32 %v5068_v16, %v4491_v4  ;;  %v4241_v16 = vld [vmem:[#allocation2 + $0x4c] sm:$0xf]  ;;  %v5013_v4 = vld [vmem:[#allocation2 + $0xe0] sm:$0xf0] }
 0xaba   :  { %v1781_v47 = vmul.f32 %v5496_v59, %v5519_v46  ;;  %2457 = vmatpush.bf16.msra.mxu0 %v4390_v45  ;;  %2444 = vmatpush.bf16.msrb.mxu3 %v4338_v56  ;;  %v4242_v5 = vor.u32 %v5013_v4, %v4241_v16  ;;  %v4547_v45 = vld [vmem:[#allocation2 + $0x814] sm:$0xf0]  ;;  %v4499_v56 = vld [vmem:[#allocation2 + $0x6e4] sm:$0xf0]  ;;  %v5051_v16 = vld [vmem:[#allocation2 + $0x480] sm:$0xf0] }
 0xabb   :  { %2483 = vmatpush.bf16.msra.mxu2 %v4494_v3  ;;  %v4246_v3 = vor.u32 %v5007_v12, %v4243_v15  ;;  %v4502_v60 = vor.u32 %v5069_v55, %v4499_v56  ;;  %v5045_v4 = vld [vmem:[#allocation2 + $0x3f0] sm:$0xf]  ;;  %v4409_v15 = vld [vmem:[#allocation2 + $0x3f4] sm:$0xf]  ;;  %v4257_v55 = vld [vmem:[#allocation2 + $0x5c] sm:$0xf] }
 0xabc   :  { %1784 = vadd.xlane.f32.xlu0 %v1781_v47  ;;  %v4394_v47 = vor.u32 %v5050_v33, %v4393_v31  ;;  %v4603_v33 = vld [vmem:[#allocation2 + $0x94c] sm:$0xf0]  ;;  %v5009_v56 = vld [vmem:[#allocation2 + $0x60] sm:$0xf] }
 0xabe   :  { %2471 = vmatpush.bf16.msra.mxu1 %v4394_v47  ;;  %2458 = vmatpush.bf16.msra.mxu0 %v4342_v40  ;;  %v4553_v47 = vld [vmem:[#allocation2 + $0x784] sm:$0xf]  ;;  %v4506_v40 = vor.u32 %v5076_v58, %v4505_v57  ;;  %v4259_v58 = vld [vmem:[#allocation2 + $0xf4] sm:$0xf0] }
 0xabf   :  { %2484 = vmatpush.bf16.msra.mxu2 %v4446_v10  ;;  %2445 = vmatpush.bf16.msrb.mxu3 %v4290_v63  ;;  %v5100_v10 = vld [vmem:[#allocation2 + $0x948] sm:$0xf0]  ;;  %v4451_v63 = vld [vmem:[#allocation2 + $0x5b4] sm:$0xf0] }
 0xac0   :  { %v4602_v31 = vor.u32 %v5100_v10, %v4601_v30  ;;  %v4454_v35 = vor.u32 %v5057_v13, %v4451_v63  ;;  %v4358_v10 = vor.u32 %v5033_v29, %v4355_v37  ;;  %v5101_v29 = vld [vmem:[#allocation2 + $0x950] sm:$0xf0]  ;;  %v4611_v37 = vld [vmem:[#allocation2 + $0x954] sm:$0xf0] }
 0xac2   :  { %2472 = vmatpush.bf16.msra.mxu1 %v4346_v61  ;;  %2459 = vmatpush.bf16.msra.mxu0 %v4294_v6  ;;  %v5070_v61 = vld [vmem:[#allocation2 + $0x658] sm:$0xf]  ;;  %v4458_v6 = vor.u32 %v5064_v1, %v4457_v0 }
 0xac3   :  { %2485 = vmatpush.bf16.msra.mxu2 %v4398_v48  ;;  %2446 = vmatpush.bf16.msrb.mxu3 %v4242_v5  ;;  %v4403_v5 = vld [vmem:[#allocation2 + $0x484] sm:$0xf0] }
 0xac4   :  { %v4406_v23 = vor.u32 %v5045_v4, %v4403_v5 }
 0xac6   :  { %2473 = vmatpush.bf16.msra.mxu1 %v4298_v7  ;;  %2460 = vmatpush.bf16.msra.mxu0 %v4246_v3  ;;  %v5058_v7 = vld [vmem:[#allocation2 + $0x528] sm:$0xf]  ;;  %v4410_v3 = vor.u32 %v5052_v21, %v4409_v15  ;;  %v5169_v15 = vld [vmem:[#allocation4 + $0x12] ss:$0 sm:$0xff] }
 0xac7   :  { %2495 = vmatpush.bf16.msra.mxu3 %v4594_v9  ;;  %v4462_v36 = vor.u32 %v5058_v7, %v4459_v20  ;;  %v4361_v9 = vld [vmem:[#allocation2 + $0x2c4] sm:$0xf] }
 0xaca   :  { %2474 = vmatpush.bf16.msra.mxu1 %v4250_v25  ;;  %2509 = vmatpush.bf16.msrb.mxu0 %v4598_v17  ;;  %v5046_v25 = vld [vmem:[#allocation2 + $0x3f8] sm:$0xf]  ;;  %v5040_v17 = vld [vmem:[#allocation2 + $0x358] sm:$0xf0] }
 0xacb   :  { %2496 = vmatpush.bf16.msra.mxu3 %v4546_v43  ;;  %v4414_v27 = vor.u32 %v5046_v25, %v4411_v26  ;;  %v5027_v43 = vld [vmem:[#allocation2 + $0x220] sm:$0xf0]  ;;  %v5170_v25 = vld [vmem:[#allocation4 + $0x13] ss:$0 sm:$0xff] }
 0xace   :  { %2523 = vmatpush.bf16.msrb.mxu1 %v4602_v31  ;;  %v5034_v31 = vld [vmem:[#allocation2 + $0x2c8] sm:$0xf] }
 0xb27   :  { %v1783_v39 = vpop.xlane.xlu2 %1782 }
 0xb28   :  { %v1786_v44 = vmul.f32 0.03125, %v1783_v39  ;;  %v4606_v39 = vor.u32 %v5094_v19, %v4603_v33  ;;  %v4362_v19 = vor.u32 %v5040_v17, %v4361_v9  ;;  %v4363_v33 = vld [vmem:[#allocation2 + $0x35c] sm:$0xf0]  ;;  %v4617_v9 = vld [vmem:[#allocation2 + $0x8c4] sm:$0xf] }
 0xb29   :  { %v4366_v38 = vor.u32 %v5034_v31, %v4363_v33 }
 0xb2a   :  { %v1788_v24 = vsub.f32 %v5515_v41, %v1786_v44  ;;  %v5081_v44 = vld [vmem:[#allocation2 + $0x780] sm:$0xf] }
 0xb2b   :  { %v4550_v48 = vor.u32 %v5081_v44, %v4547_v45  ;;  %v5021_v44 = vld [vmem:[#allocation2 + $0x190] sm:$0xf] }
 0xb2c   :  { %v5525_v49 = vmul.f32 %v5496_v59, %v1788_v24  ;;  %v5088_v24 = vld [vmem:[#allocation2 + $0x818] sm:$0xf0] }
 0xb2d   :  { %2510 = vmatpush.bf16.msrb.mxu0 %v4550_v48  ;;  %v4307_v48 = vld [vmem:[#allocation2 + $0x224] sm:$0xf0] }
 0xb2e   :  { %v1792_v51 = vmul.f32 %v5525_v49, %v5525_v49 }
 0xb2f   :  { %v1785_v52 = vpop.xlane.xlu0 %1784 }
 0xb30   :  { %v1787_v50 = vmul.f32 0.03125, %v1785_v52  ;;  %1794 = vadd.xlane.f32.xlu1 %v1792_v51  ;;  %v5082_v51 = vld [vmem:[#allocation2 + $0x788] sm:$0xf]  ;;  %v4555_v52 = vld [vmem:[#allocation2 + $0x81c] sm:$0xf0] }
 0xb31   :  { %2511 = vmatpush.bf16.msrb.mxu0 %v4502_v60  ;;  %v4265_v60 = vld [vmem:[#allocation2 + $0x64] sm:$0xf] }
 0xb32   :  { %v1789_v42 = vsub.f32 %v5519_v46, %v1787_v50  ;;  %v4350_v46 = vor.u32 %v5032_v62, %v4347_v2  ;;  %v4554_v50 = vor.u32 %v5088_v24, %v4553_v47  ;;  %v4507_v62 = vld [vmem:[#allocation2 + $0x6ec] sm:$0xf0]  ;;  %v4313_v24 = vld [vmem:[#allocation2 + $0x194] sm:$0xf] }
 0xb33   :  { %v4510_v2 = vor.u32 %v5070_v61, %v4507_v62  ;;  %v4262_v62 = vor.u32 %v5009_v56, %v4259_v58  ;;  %v4515_v56 = vld [vmem:[#allocation2 + $0x6f4] sm:$0xf0]  ;;  %v5078_v58 = vld [vmem:[#allocation2 + $0x6f8] sm:$0xf0] }
 0xb34   :  { %v5531_v53 = vmul.f32 %v5496_v59, %v1789_v42  ;;  %2486 = vmatpush.bf16.msra.mxu2 %v4350_v46  ;;  %v4558_v42 = vor.u32 %v5082_v51, %v4555_v52  ;;  %2524 = vmatpush.bf16.msrb.mxu1 %v4554_v50  ;;  %v4449_v46 = vld [vmem:[#allocation2 + $0x51c] sm:$0xf]  ;;  %v4310_v51 = vor.u32 %v5021_v44, %v4307_v48  ;;  %v5028_v52 = vld [vmem:[#allocation2 + $0x228] sm:$0xf0]  ;;  %v5022_v50 = vld [vmem:[#allocation2 + $0x198] sm:$0xf] }
 0xb35   :  { %v4450_v32 = vor.u32 %v5063_v8, %v4449_v46  ;;  %2512 = vmatpush.bf16.msrb.mxu0 %v4454_v35  ;;  %v5010_v46 = vld [vmem:[#allocation2 + $0x68] sm:$0xf]  ;;  %v4267_v8 = vld [vmem:[#allocation2 + $0xfc] sm:$0xf0]  ;;  %v5083_v44 = vld [vmem:[#allocation2 + $0x790] sm:$0xf] }
 0xb36   :  { %v1793_v41 = vmul.f32 %v5531_v53, %v5531_v53  ;;  %v5090_v48 = vld [vmem:[#allocation2 + $0x828] sm:$0xf0] }
 0xb38   :  { %1796 = vadd.xlane.f32.xlu2 %v1793_v41  ;;  %2487 = vmatpush.bf16.msra.mxu2 %v4302_v14  ;;  %v4497_v41 = vld [vmem:[#allocation2 + $0x64c] sm:$0xf] }
 0xb39   :  { %v4498_v54 = vor.u32 %v5075_v22, %v4497_v41  ;;  %2525 = vmatpush.bf16.msrb.mxu1 %v4506_v40  ;;  %v4401_v14 = vld [vmem:[#allocation2 + $0x3ec] sm:$0xf]  ;;  %2513 = vmatpush.bf16.msrb.mxu0 %v4406_v23  ;;  %v4314_v41 = vor.u32 %v5028_v52, %v4313_v24  ;;  %v5016_v40 = vld [vmem:[#allocation2 + $0xf8] sm:$0xf0]  ;;  %v5084_v24 = vld [vmem:[#allocation2 + $0x798] sm:$0xf] }
 0xb3a   :  { %v4402_v12 = vor.u32 %v5051_v16, %v4401_v14 }
 0xb3b   :  { %2497 = vmatpush.bf16.msra.mxu3 %v4498_v54  ;;  %v5015_v54 = vld [vmem:[#allocation2 + $0xf0] sm:$0xf0] }
 0xb3c   :  { %2488 = vmatpush.bf16.msra.mxu2 %v4254_v11  ;;  %v5039_v11 = vld [vmem:[#allocation2 + $0x350] sm:$0xf0]  ;;  %v4258_v57 = vor.u32 %v5015_v54, %v4257_v55  ;;  %v5071_v54 = vld [vmem:[#allocation2 + $0x660] sm:$0xf] }
 0xb3d   :  { %2526 = vmatpush.bf16.msrb.mxu1 %v4458_v6  ;;  %v4354_v18 = vor.u32 %v5039_v11, %v4353_v28  ;;  %2514 = vmatpush.bf16.msrb.mxu0 %v4358_v10  ;;  %v4609_v11 = vld [vmem:[#allocation2 + $0x8bc] sm:$0xf] }
 0xb3e   :  { %v5102_v10 = vld [vmem:[#allocation2 + $0x958] sm:$0xf0]  ;;  %v4610_v33 = vor.u32 %v5101_v29, %v4609_v11 }
 0xb3f   :  { %2498 = vmatpush.bf16.msra.mxu3 %v4450_v32  ;;  %v4270_v32 = vor.u32 %v5010_v46, %v4267_v8  ;;  %v5065_v46 = vld [vmem:[#allocation2 + $0x5c0] sm:$0xf0] }
 0xb40   :  { %2537 = vmatpush.bf16.msrb.mxu2 %v4606_v39  ;;  %v4305_v39 = vld [vmem:[#allocation2 + $0x18c] sm:$0xf] }
 0xb41   :  { %2527 = vmatpush.bf16.msrb.mxu1 %v4410_v3  ;;  %v4306_v47 = vor.u32 %v5027_v43, %v4305_v39  ;;  %2515 = vmatpush.bf16.msrb.mxu0 %v4310_v51  ;;  %v4618_v39 = vor.u32 %v5102_v10, %v4617_v9  ;;  %v4571_v51 = vld [vmem:[#allocation2 + $0x82c] sm:$0xf0]  ;;  %v4377_v9 = vld [vmem:[#allocation2 + $0x2d4] sm:$0xf]  ;;  %v5042_v10 = vld [vmem:[#allocation2 + $0x368] sm:$0xf0] }
 0xb42   :  { %v4574_v55 = vor.u32 %v5084_v24, %v4571_v51  ;;  %v5024_v24 = vld [vmem:[#allocation2 + $0x1a8] sm:$0xf]  ;;  %v4331_v51 = vld [vmem:[#allocation2 + $0x23c] sm:$0xf0] }
 0xb43   :  { %2499 = vmatpush.bf16.msra.mxu3 %v4402_v12 }
 0xb44   :  { %2538 = vmatpush.bf16.msrb.mxu2 %v4558_v42  ;;  %v4315_v42 = vld [vmem:[#allocation2 + $0x22c] sm:$0xf0] }
 0xb45   :  { %2528 = vmatpush.bf16.msrb.mxu1 %v4362_v19  ;;  %v4318_v22 = vor.u32 %v5022_v50, %v4315_v42  ;;  %2516 = vmatpush.bf16.msrb.mxu0 %v4262_v62  ;;  %v4619_v19 = vld [vmem:[#allocation2 + $0x95c] sm:$0xf0]  ;;  %v4513_v42 = vld [vmem:[#allocation2 + $0x65c] sm:$0xf]  ;;  %v4518_v62 = vor.u32 %v5071_v54, %v4515_v56  ;;  %v5011_v54 = vld [vmem:[#allocation2 + $0x70] sm:$0xf] }
 0xb46   :  { %v4275_v56 = vld [vmem:[#allocation2 + $0x104] sm:$0xf0] }
 0xb47   :  { %2500 = vmatpush.bf16.msra.mxu3 %v4354_v18  ;;  %v5095_v18 = vld [vmem:[#allocation2 + $0x8c0] sm:$0xf] }
 0xb48   :  { %2539 = vmatpush.bf16.msrb.mxu2 %v4510_v2  ;;  %v4266_v2 = vor.u32 %v5016_v40, %v4265_v60  ;;  %v5072_v60 = vld [vmem:[#allocation2 + $0x668] sm:$0xf]  ;;  %v4523_v40 = vld [vmem:[#allocation2 + $0x6fc] sm:$0xf0] }
 0xb49   :  { %2529 = vmatpush.bf16.msrb.mxu1 %v4314_v41  ;;  %v5077_v41 = vld [vmem:[#allocation2 + $0x6f0] sm:$0xf0] }
 0xb4b   :  { %2501 = vmatpush.bf16.msra.mxu3 %v4306_v47  ;;  %v4569_v47 = vld [vmem:[#allocation2 + $0x794] sm:$0xf] }
 0xb4c   :  { %2540 = vmatpush.bf16.msrb.mxu2 %v4462_v36 }
 0xb4d   :  { %2530 = vmatpush.bf16.msrb.mxu1 %v4266_v2  ;;  %v4465_v2 = vld [vmem:[#allocation2 + $0x52c] sm:$0xf] }
 0xb4f   :  { %2502 = vmatpush.bf16.msra.mxu3 %v4258_v57  ;;  %v4521_v57 = vld [vmem:[#allocation2 + $0x664] sm:$0xf] }
 0xb50   :  { %2541 = vmatpush.bf16.msrb.mxu2 %v4414_v27  ;;  %v4522_v8 = vor.u32 %v5078_v58, %v4521_v57  ;;  %v4281_v57 = vld [vmem:[#allocation2 + $0x74] sm:$0xf]  ;;  %v5018_v58 = vld [vmem:[#allocation2 + $0x108] sm:$0xf0] }
 0xb54   :  { %2542 = vmatpush.bf16.msrb.mxu2 %v4366_v38  ;;  %v5089_v38 = vld [vmem:[#allocation2 + $0x820] sm:$0xf0] }
 0xb58   :  { %2543 = vmatpush.bf16.msrb.mxu2 %v4318_v22  ;;  %v4570_v22 = vor.u32 %v5090_v48, %v4569_v47  ;;  %v4329_v47 = vld [vmem:[#allocation2 + $0x1a4] sm:$0xf]  ;;  %v5030_v48 = vld [vmem:[#allocation2 + $0x238] sm:$0xf0] }
 0xb5c   :  { %2544 = vmatpush.bf16.msrb.mxu2 %v4270_v32  ;;  %v5059_v32 = vld [vmem:[#allocation2 + $0x530] sm:$0xf] }
 0xba3   :  { %v1795_v30 = vpop.xlane.xlu1 %1794 }
 0xba4   :  { %v1798_v34 = vmul.f32 0.03125, %v1795_v30 }
 0xba6   :  { %v1800_v45 = vadd.f32 1e-05, %v1798_v34  ;;  %v4614_v34 = vor.u32 %v5095_v18, %v4611_v37  ;;  %v5035_v18 = vld [vmem:[#allocation2 + $0x2d0] sm:$0xf]  ;;  %v4371_v37 = vld [vmem:[#allocation2 + $0x364] sm:$0xf0] }
 0xba8   :  { %5215 = vrsqrt.f32 %v1800_v45  ;;  %vm1808_vm10 = vweird.f32 %v1800_v45 }
 0xbab   :  { %v1797_v61 = vpop.xlane.xlu2 %1796 }
 0xbac   :  { %v1799_v13 = vmul.f32 0.03125, %v1797_v61  ;;  %v4514_v61 = vor.u32 %v5077_v41, %v4513_v42  ;;  %v4273_v42 = vld [vmem:[#allocation2 + $0x6c] sm:$0xf]  ;;  %v5017_v41 = vld [vmem:[#allocation2 + $0x100] sm:$0xf0] }
 0xbae   :  { %v5216_v63 = vpop.eup %5215  ;;  %v1801_v0 = vadd.f32 1e-05, %v1799_v13  ;;  %v4526_v13 = vor.u32 %v5072_v60, %v4523_v40  ;;  %v5012_v60 = vld [vmem:[#allocation2 + $0x78] sm:$0xf]  ;;  %v4283_v40 = vld [vmem:[#allocation2 + $0x10c] sm:$0xf0] }
 0xbaf   :  { %v1803_v1 = vmul.f32 %v5216_v63, %v1800_v45  ;;  %vm1809_vm9 = vweird.f32 %v5216_v63  ;;  %v4563_v45 = vld [vmem:[#allocation2 + $0x824] sm:$0xf0] }
 0xbb0   :  { %5217 = vrsqrt.f32 %v1801_v0  ;;  %vm1810_vm11 = vmor %vm1808_vm10, %vm1809_vm9  ;;  %vm1818_vm13 = vweird.f32 %v1801_v0  ;;  %v4566_v50 = vor.u32 %v5083_v44, %v4563_v45  ;;  %v5023_v44 = vld [vmem:[#allocation2 + $0x1a0] sm:$0xf]  ;;  %v4323_v45 = vld [vmem:[#allocation2 + $0x234] sm:$0xf0] }
 0xbb1   :  { %v1804_v35 = vmul.f32 %v5216_v63, %v1803_v1  ;;  %v5066_v1 = vld [vmem:[#allocation2 + $0x5c8] sm:$0xf0] }
 0xbb3   :  { %v1805_v6 = vmul.f32 0.5, %v1804_v35  ;;  %v5060_v35 = vld [vmem:[#allocation2 + $0x538] sm:$0xf] }
 0xbb5   :  { %v1806_v7 = vsub.f32 1.5, %v1805_v6  ;;  %v4475_v6 = vld [vmem:[#allocation2 + $0x5cc] sm:$0xf0] }
 0xbb6   :  { %v5218_v20 = vpop.eup %5217 }
 0xbb7   :  { %v1807_v36 = vmul.f32 %v5216_v63, %v1806_v7  ;;  %v1813_v14 = vmul.f32 %v5218_v20, %v1801_v0  ;;  %vm1819_vm12 = vweird.f32 %v5218_v20  ;;  %v4473_v0 = vld [vmem:[#allocation2 + $0x534] sm:$0xf]  ;;  %v4466_v7 = vor.u32 %v5065_v46, %v4465_v2 }
 0xbb8   :  { %vm1820_vm14 = vmor %vm1818_vm13, %vm1819_vm12  ;;  %v4282_v2 = vor.u32 %v5018_v58, %v4281_v57  ;;  %v4286_v46 = vor.u32 %v5012_v60, %v4283_v40 }
 0xbb9   :  { %v1814_v16 = vmul.f32 %v5218_v20, %v1813_v14  ;;  %v1811_v4 = vsel %vm1810_vm11, %v5216_v63, %v1807_v36  ;;  %v4467_v63 = vld [vmem:[#allocation2 + $0x5c4] sm:$0xf0]  ;;  %v4417_v36 = vld [vmem:[#allocation2 + $0x3fc] sm:$0xf]  ;;  %v5053_v14 = vld [vmem:[#allocation2 + $0x490] sm:$0xf0] }
 0xbba   :  { %v1822_v21 = vmul.f32 %v1811_v4, %v5525_v49  ;;  %v5096_v49 = vld [vmem:[#allocation2 + $0x8c8] sm:$0xf]  ;;  %v4478_v4 = vor.u32 %v5060_v35, %v4475_v6  ;;  %v4647_v35 = vld [vmem:[#allocation2 + $0x66c] sm:$0xf]  ;;  %v5125_v6 = vld [vmem:[#allocation2 + $0x700] sm:$0xf0] }
 0xbbb   :  { %v1815_v12 = vmul.f32 0.5, %v1814_v16  ;;  %v4622_v43 = vor.u32 %v5096_v49, %v4619_v19  ;;  %v4474_v16 = vor.u32 %v5066_v1, %v4473_v0  ;;  %v5036_v49 = vld [vmem:[#allocation2 + $0x2d8] sm:$0xf]  ;;  %v4379_v19 = vld [vmem:[#allocation2 + $0x36c] sm:$0xf0] }
 0xbbc   :  { %v1827_v26 = vmul.f32 %v5169_v15, %v1822_v21  ;;  %v5054_v21 = vld [vmem:[#allocation2 + $0x498] sm:$0xf0]  ;;  %v5129_v0 = vld [vmem:[#allocation2 + $0x830] sm:$0xf0] }
 0xbbd   :  { %v1816_v5 = vsub.f32 1.5, %v1815_v12  ;;  %v5047_v12 = vld [vmem:[#allocation2 + $0x400] sm:$0xf] }
 0xbbe   :  { %v5537_v17 = vadd.f32 %v5170_v25, %v1827_v26 }
 0xbbf   :  { %v1817_v23 = vmul.f32 %v5218_v20, %v1816_v5  ;;  %v4419_v5 = vld [vmem:[#allocation2 + $0x494] sm:$0xf0] }
 0xbc0   :  { %v4422_v26 = vor.u32 %v5047_v12, %v4419_v5  ;;  %v5113_v5 = vld [vmem:[#allocation2 + $0x370] sm:$0xf0] }
 0xbc1   :  { %v1821_v3 = vsel %vm1820_vm14, %v5218_v20, %v1817_v23  ;;  %v4470_v20 = vor.u32 %v5059_v32, %v4467_v63  ;;  %v5048_v23 = vld [vmem:[#allocation2 + $0x408] sm:$0xf]  ;;  %v4651_v63 = vld [vmem:[#allocation2 + $0x79c] sm:$0xf] }
 0xbc2   :  { %v1823_v27 = vmul.f32 %v1821_v3, %v5531_v53  ;;  %v4561_v53 = vld [vmem:[#allocation2 + $0x78c] sm:$0xf]  ;;  %v4427_v3 = vld [vmem:[#allocation2 + $0x49c] sm:$0xf0]  ;;  %v4652_v1 = vor.u32 %v5129_v0, %v4651_v63  ;;  %v5591_v63 = vld [vmem:[#allocation4 + $0x1c] sm:$0xf] }
 0xbc3   :  { %v4562_v52 = vor.u32 %v5089_v38, %v4561_v53  ;;  %v4430_v29 = vor.u32 %v5048_v23, %v4427_v3  ;;  %v4321_v53 = vld [vmem:[#allocation2 + $0x19c] sm:$0xf]  ;;  %v5029_v38 = vld [vmem:[#allocation2 + $0x230] sm:$0xf0]  ;;  %v5109_v23 = vld [vmem:[#allocation2 + $0x240] sm:$0xf0] }
 0xbc4   :  { %v1828_v28 = vmul.f32 %v5169_v15, %v1823_v27  ;;  %v4425_v15 = vld [vmem:[#allocation2 + $0x404] sm:$0xf]  ;;  %v4369_v27 = vld [vmem:[#allocation2 + $0x2cc] sm:$0xf]  ;;  %v1943_v0 = vperm.slane %v5591_v63, 0 }
 0xbc5   :  { %v4426_v11 = vor.u32 %v5054_v21, %v4425_v15  ;;  %v4631_v21 = vld [vmem:[#allocation2 + $0x1ac] sm:$0xf] }
 0xbc6   :  { %v5539_v30 = vadd.f32 %v5170_v25, %v1828_v28  ;;  %v4418_v25 = vor.u32 %v5053_v14, %v4417_v36  ;;  %v5041_v28 = vld [vmem:[#allocation2 + $0x360] sm:$0xf0]  ;;  %v5121_v36 = vld [vmem:[#allocation2 + $0x5d0] sm:$0xf0]  ;;  %v4632_v3 = vor.u32 %v5109_v23, %v4631_v21 }
 0xbc8   :  { %v5543_v31 = vpack.c.bf16 %v5539_v30, %v5537_v17 }
 0xbca   :  { %2447 = vmatmul.bf16.vlgmr.msrb.gmra.mxu3 %v5543_v31  ;;  %2461 = vmatmul.bf16.vlgmr.msra.gmra.mxu0 %v5543_v31 }
 0xbcb   :  { %2475 = vmatmul.bf16.vlgmr.msra.gmra.mxu1 %v5543_v31  ;;  %2489 = vmatmul.bf16.vlgmr.msra.gmra.mxu2 %v5543_v31 }
 0xbcc   :  { %2551 = vmatpush.bf16.msrb.mxu3 %v4610_v33  ;;  %2565 = vmatpush.bf16.msra.mxu0 %v4614_v34  ;;  %v4370_v33 = vor.u32 %v5041_v28, %v4369_v27  ;;  %v4374_v34 = vor.u32 %v5035_v18, %v4371_v37 }
 0xbcd   :  { %2579 = vmatpush.bf16.msra.mxu1 %v4618_v39  ;;  %2593 = vmatpush.bf16.msra.mxu2 %v4622_v43  ;;  %v4378_v39 = vor.u32 %v5042_v10, %v4377_v9  ;;  %v4382_v43 = vor.u32 %v5036_v49, %v4379_v19 }
 0xbd0   :  { %2552 = vmatpush.bf16.msrb.mxu3 %v4562_v52  ;;  %2566 = vmatpush.bf16.msra.mxu0 %v4566_v50  ;;  %v4322_v52 = vor.u32 %v5029_v38, %v4321_v53  ;;  %v4326_v50 = vor.u32 %v5023_v44, %v4323_v45 }
 0xbd1   :  { %2580 = vmatpush.bf16.msra.mxu1 %v4570_v22  ;;  %2594 = vmatpush.bf16.msra.mxu2 %v4574_v55  ;;  %v4330_v22 = vor.u32 %v5030_v48, %v4329_v47  ;;  %v4334_v55 = vor.u32 %v5024_v24, %v4331_v51 }
 0xbd4   :  { %2553 = vmatpush.bf16.msrb.mxu3 %v4514_v61  ;;  %2567 = vmatpush.bf16.msra.mxu0 %v4518_v62  ;;  %v4274_v61 = vor.u32 %v5017_v41, %v4273_v42  ;;  %v4278_v62 = vor.u32 %v5011_v54, %v4275_v56 }
 0xbd5   :  { %2581 = vmatpush.bf16.msra.mxu1 %v4522_v8  ;;  %2595 = vmatpush.bf16.msra.mxu2 %v4526_v13  ;;  %v4655_v8 = vld [vmem:[#allocation2 + $0x8cc] sm:$0xf]  ;;  %v5133_v13 = vld [vmem:[#allocation2 + $0x960] sm:$0xf0] }
 0xbd6   :  { %v4656_v32 = vor.u32 %v5133_v13, %v4655_v8 }
 0xbd8   :  { %2554 = vmatpush.bf16.msrb.mxu3 %v4466_v7  ;;  %2568 = vmatpush.bf16.msra.mxu0 %v4470_v20  ;;  %v4648_v7 = vor.u32 %v5125_v6, %v4647_v35  ;;  %v4643_v20 = vld [vmem:[#allocation2 + $0x53c] sm:$0xf]  ;;  %v1944_v6 = vperm.slane %v5591_v63, 1 }
 0xbd9   :  { %2582 = vmatpush.bf16.msra.mxu1 %v4474_v16  ;;  %2596 = vmatpush.bf16.msra.mxu2 %v4478_v4  ;;  %v4644_v14 = vor.u32 %v5121_v36, %v4643_v20  ;;  %v4639_v16 = vld [vmem:[#allocation2 + $0x40c] sm:$0xf]  ;;  %v5117_v4 = vld [vmem:[#allocation2 + $0x4a0] sm:$0xf0] }
 0xbda   :  { %2503 = vmatmul.bf16.vlgmr.msra.gmra.mxu3 %v5543_v31  ;;  %2517 = vmatmul.bf16.vlgmr.msrb.gmra.mxu0 %v5543_v31  ;;  %v4640_v12 = vor.u32 %v5117_v4, %v4639_v16 }
 0xbdb   :  { %2531 = vmatmul.bf16.vlgmr.msrb.gmra.mxu1 %v5543_v31  ;;  %2545 = vmatmul.bf16.vlgmr.msrb.gmra.mxu2 %v5543_v31 }
 0xbdc   :  { %2555 = vmatpush.bf16.msrb.mxu3 %v4418_v25  ;;  %2569 = vmatpush.bf16.msra.mxu0 %v4422_v26  ;;  %v4627_v25 = vld [vmem:[#allocation2 + $0x7c] sm:$0xf]  ;;  %v5105_v26 = vld [vmem:[#allocation2 + $0x110] sm:$0xf0] }
 0xbdd   :  { %2583 = vmatpush.bf16.msra.mxu1 %v4426_v11  ;;  %2597 = vmatpush.bf16.msra.mxu2 %v4430_v29  ;;  %v4628_v27 = vor.u32 %v5105_v26, %v4627_v25  ;;  %v5561_v29 = vld [vmem:[#allocation4 + $0x14] sm:$0xff] }
 0xbde   :  { %v1936_v37 = vperm.slane %v5561_v29, 1  ;;  %v1937_v10 = vperm.slane %v5561_v29, 2  ;;  %v1938_v53 = vperm.slane %v5561_v29, 3  ;;  %v1939_v24 = vperm.slane %v5561_v29, 4 }
 0xbdf   :  { %v1942_v51 = vperm.slane %v5561_v29, 7  ;;  %v1935_v41 = vperm.slane %v5561_v29, 0  ;;  %v1940_v57 = vperm.slane %v5561_v29, 5 }
 0xbe0   :  { %2556 = vmatpush.bf16.msrb.mxu3 %v4370_v33  ;;  %2570 = vmatpush.bf16.msra.mxu0 %v4374_v34 }
 0xbe1   :  { %2584 = vmatpush.bf16.msra.mxu1 %v4378_v39  ;;  %2598 = vmatpush.bf16.msra.mxu2 %v4382_v43  ;;  %v1941_v39 = vperm.slane %v5561_v29, 6  ;;  %v4723_v29 = vld [vmem:[#allocation2 + $0x8d4] sm:$0xf] }
 0xbe4   :  { %2557 = vmatpush.bf16.msrb.mxu3 %v4322_v52  ;;  %2571 = vmatpush.bf16.msra.mxu0 %v4326_v50 }
 0xbe5   :  { %2585 = vmatpush.bf16.msra.mxu1 %v4330_v22  ;;  %2599 = vmatpush.bf16.msra.mxu2 %v4334_v55 }
 0xbe8   :  { %2558 = vmatpush.bf16.msrb.mxu3 %v4274_v61  ;;  %2572 = vmatpush.bf16.msra.mxu0 %v4278_v62 }
 0xbe9   :  { %2586 = vmatpush.bf16.msra.mxu1 %v4282_v2  ;;  %2600 = vmatpush.bf16.msra.mxu2 %v4286_v46 }
 0xbeb   :  { %2559 = vmatmul.bf16.vlgmr.msrb.gmra.mxu3 %v5543_v31  ;;  %2573 = vmatmul.bf16.vlgmr.msra.gmra.mxu0 %v5543_v31 }
 0xbec   :  { %2587 = vmatmul.bf16.vlgmr.msra.gmra.mxu1 %v5543_v31  ;;  %2601 = vmatmul.bf16.vlgmr.msra.gmra.mxu2 %v5543_v31  ;;  %v4635_v31 = vld [vmem:[#allocation2 + $0x2dc] sm:$0xf] }
 0xbed   :  { %2783 = vmatpush.bf16.msrb.mxu2 %v4656_v32  ;;  %v4636_v15 = vor.u32 %v5113_v5, %v4635_v31 }
 0xbf1   :  { %2784 = vmatpush.bf16.msrb.mxu2 %v4652_v1 }
 0xbf5   :  { %2785 = vmatpush.bf16.msrb.mxu2 %v4648_v7 }
 0xbf9   :  { %2786 = vmatpush.bf16.msrb.mxu2 %v4644_v14 }
 0xbfd   :  { %2787 = vmatpush.bf16.msrb.mxu2 %v4640_v12 }
 0xc01   :  { %2788 = vmatpush.bf16.msrb.mxu2 %v4636_v15 }
 0xc05   :  { %2789 = vmatpush.bf16.msrb.mxu2 %v4632_v3 }
 0xc09   :  { %2790 = vmatpush.bf16.msrb.mxu2 %v4628_v27 }
 0xc47   :  { %v5557_v28 = vpop.f32.mrf.mxu0 }
 0xc48   :  { %v5559_v11 = vpop.f32.mrf.mxu1 }
 0xc4d   :  { %v2448_v18 = vpop.f32.mrf.mxu3 }
 0xc4e   :  { %v5564_v9 = vpop.f32.mrf.mxu2  ;;  %v2449_v60 = vadd.f32 %v2448_v18, %v1935_v41 }
 0xc4f   :  { %v2464_v49 = vpop.f32.mrf.mxu0 }
 0xc50   :  { %v5569_v19 = vadd.f32 %v2464_v49, %v1936_v37  ;;  %v2478_v33 = vpop.f32.mrf.mxu1  ;;  %v2640_v46 = vpack.c.bf16 %v2449_v60, %v2449_v60  ;;  %v1945_v49 = vperm.slane %v5591_v63, 2 }
 0xc51   :  { %v5573_v34 = vadd.f32 %v2478_v33, %v1937_v10 }
 0xc55   :  { %v2450_v38 = vpop.f32.mrf.mxu3 }
 0xc56   :  { %v2492_v43 = vpop.f32.mrf.mxu2  ;;  %v2451_v16 = vadd.f32 %v2450_v38, %v1935_v41 }
 0xc57   :  { %v5579_v44 = vadd.f32 %v2492_v43, %v1938_v53  ;;  %v2518_v45 = vpop.f32.mrf.mxu0 }
 0xc58   :  { %v2532_v47 = vpop.f32.mrf.mxu1  ;;  %v2519_v61 = vadd.f32 %v2518_v45, %v1940_v57  ;;  %v2641_v21 = vpack.c.bf16 %v2451_v16, %v2451_v16 }
 0xc59   :  { %v5581_v48 = vadd.f32 %v2532_v47, %v1941_v39 }
 0xc5a   :  { %v2804_v32 = vpack.c.bf16 %v2519_v61, %v2519_v61 }
 0xc5d   :  { %v2504_v52 = vpop.f32.mrf.mxu3 }
 0xc5e   :  { %v2505_v50 = vadd.f32 %v2504_v52, %v1939_v24  ;;  %v2546_v42 = vpop.f32.mrf.mxu2 }
 0xc5f   :  { %v5588_v22 = vadd.f32 %v2546_v42, %v1942_v51  ;;  %v2520_v55 = vpop.f32.mrf.mxu0 }
 0xc60   :  { %v2642_v54 = vpack.c.bf16 %v2505_v50, %v2505_v50  ;;  %v2534_v56 = vpop.f32.mrf.mxu1  ;;  %v2521_v35 = vadd.f32 %v2520_v55, %v1940_v57 }
 0xc61   :  { %v2535_v58 = vadd.f32 %v2534_v56, %v1941_v39  ;;  %v2463_v39 = vadd.f32 %v5557_v28, %v1936_v37 }
 0xc62   :  { %2653 = vmatpush.bf16.xpose.msra.mxu3 %v2642_v54  ;;  %v2805_v4 = vpack.c.bf16 %v2521_v35, %v2521_v35 }
 0xc63   :  { %v2948_v40 = vpack.c.bf16 %v2535_v58, %v2535_v58  ;;  %v2802_v45 = vpack.c.bf16 %v2463_v39, %v2463_v39 }
 0xc65   :  { %2971 = vmatpush.bf16.xpose.msra.mxu2 %v2948_v40  ;;  %v2506_v62 = vpop.f32.mrf.mxu3 }
 0xc66   :  { %v2507_v2 = vadd.f32 %v2506_v62, %v1939_v24 }
 0xc68   :  { %v2643_v8 = vpack.c.bf16 %v2507_v2, %v2507_v2  ;;  %v2574_v13 = vpop.f32.mrf.mxu0 }
 0xc69   :  { %2654 = vmatmul.bf16.vlgmr.msra.gmra.mxu3 %v2640_v46  ;;  %v2575_v31 = vadd.f32 %v2574_v13, %v1944_v6  ;;  %v2588_v33 = vpop.f32.mrf.mxu1 }
 0xc6a   :  { %2666 = vmatpush.bf16.xpose.msrb.mxu3 %v2643_v8  ;;  %v2589_v38 = vadd.f32 %v2588_v33, %v1945_v49  ;;  %v4671_v33 = vld [vmem:[#allocation2 + $0x4a4] sm:$0xf0] }
 0xc6b   :  { %v2806_v3 = vpack.c.bf16 %v2575_v31, %v2575_v31  ;;  %v4683_v31 = vld [vmem:[#allocation2 + $0x834] sm:$0xf0] }
 0xc6c   :  { %v2949_v43 = vpack.c.bf16 %v2589_v38, %v2589_v38 }
 0xc6d   :  { %v2862_v18 = vsel %vm1001_vm0, %v2806_v3, 0 }
 0xc6e   :  { %v2560_v1 = vpop.f32.mrf.mxu3  ;;  %v3005_v47 = vsel %vm1001_vm0, %v2949_v43, 0 }
 0xc6f   :  { %v2561_v7 = vadd.f32 %v2560_v1, %v1943_v0 }
 0xc70   :  { %v2576_v20 = vpop.f32.mrf.mxu0 }
 0xc71   :  { %v2644_v36 = vpack.c.bf16 %v2561_v7, %v2561_v7  ;;  %v2577_v14 = vadd.f32 %v2576_v20, %v1944_v6  ;;  %v5131_v7 = vld [vmem:[#allocation2 + $0x8d0] sm:$0xf]  ;;  %v4687_v20 = vld [vmem:[#allocation2 + $0x964] sm:$0xf0] }
 0xc72   :  { %2815 = vmatpush.bf16.xpose.msra.mxu3 %v2804_v32  ;;  %v4690_v16 = vor.u32 %v5131_v7, %v4687_v20 }
 0xc73   :  { %v2700_v12 = vsel %vm1001_vm0, %v2644_v36, 0  ;;  %v2807_v5 = vpack.c.bf16 %v2577_v14, %v2577_v14 }
 0xc74   :  { %2709 = vmatpush.bf16.msrb.mxu0 %v2700_v12  ;;  %v5127_v12 = vld [vmem:[#allocation2 + $0x7a0] sm:$0xf] }
 0xc75   :  { %v2881_v25 = vsel %vm1001_vm0, %v2807_v5, 0  ;;  %v4686_v5 = vor.u32 %v5127_v12, %v4683_v31 }
 0xc76   :  { %v2562_v15 = vpop.f32.mrf.mxu3 }
 0xc77   :  { %v2563_v23 = vadd.f32 %v2562_v15, %v1943_v0  ;;  %v5123_v15 = vld [vmem:[#allocation2 + $0x670] sm:$0xf] }
 0xc78   :  { %2828 = vmatpush.bf16.xpose.msra.mxu0 %v2805_v4 }
 0xc79   :  { %v2645_v26 = vpack.c.bf16 %v2563_v23, %v2563_v23  ;;  %2667 = vmatmul.bf16.vlgmr.msrb.gmra.mxu3 %v2641_v21  ;;  %v4679_v21 = vld [vmem:[#allocation2 + $0x704] sm:$0xf0] }
 0xc7a   :  { %2890 = vmatpush.bf16.msrb.mxu3 %v2881_v25  ;;  %v4682_v3 = vor.u32 %v5123_v15, %v4679_v21  ;;  %v5119_v25 = vld [vmem:[#allocation2 + $0x540] sm:$0xf] }
 0xc7b   :  { %v2719_v27 = vsel %vm1001_vm0, %v2645_v26, 0  ;;  %v4675_v26 = vld [vmem:[#allocation2 + $0x5d4] sm:$0xf0] }
 0xc7c   :  { %2728 = vmatpush.bf16.msrb.mxu1 %v2719_v27  ;;  %v4678_v27 = vor.u32 %v5119_v25, %v4675_v26 }
 0xc80   :  { %2871 = vmatpush.bf16.msra.mxu1 %v2862_v18  ;;  %v5115_v18 = vld [vmem:[#allocation2 + $0x410] sm:$0xf] }
 0xc81   :  { %v4674_v43 = vor.u32 %v5115_v18, %v4671_v33 }
 0xc89   :  { %2816 = vmatmul.bf16.vlgmr.msra.gmra.mxu3 %v2802_v45  ;;  %v2803_v45 = vpack.c.bf16 %v5569_v19, %v5569_v19 }
 0xc8a   :  { %3014 = vmatpush.bf16.msra.mxu3 %v3005_v47 }
 0xcec   :  { %v2655_v24 = vpop.f32.mrf.mxu3 }
 0xced   :  { %v2672_v52 = vsel %vm973_vm1, %v2655_v24, -inf }
 0xcee   :  { %2673 = vmax.xlane.f32.xlu0 %v2672_v52  ;;  %v4667_v52 = vld [vmem:[#allocation2 + $0x374] sm:$0xf0] }
 0xcf4   :  { %v2657_v50 = vpop.f32.mrf.mxu3 }
 0xcf5   :  { %v2947_v50 = vpack.c.bf16 %v5581_v48, %v5581_v48 }
 0xcfc   :  { %v2668_v42 = vpop.f32.mrf.mxu3 }
 0xcfd   :  { %v2675_v41 = vsel %vm973_vm1, %v2668_v42, -inf }
 0xcfe   :  { %2676 = vmax.xlane.f32.xlu2 %v2675_v41  ;;  %v5107_v41 = vld [vmem:[#allocation2 + $0x1b0] sm:$0xf] }
 0xd04   :  { %v2670_v55 = vpop.f32.mrf.mxu3 }
 0xd05   :  { %v4663_v55 = vld [vmem:[#allocation2 + $0x244] sm:$0xf0] }
 0xd06   :  { %v4666_v19 = vor.u32 %v5107_v41, %v4663_v55 }
 0xd0c   :  { %v2817_v54 = vpop.f32.mrf.mxu3 }
 0xd0d   :  { %v2834_v56 = vsel %vm973_vm1, %v2817_v54, -inf }
 0xd0e   :  { %2835 = vmax.xlane.f32.xlu0 %v2834_v56  ;;  %v2548_v56 = vpop.f32.mrf.mxu2 }
 0xd14   :  { %v2819_v28 = vpop.f32.mrf.mxu3 }
 0xd15   :  { %v2590_v28 = vpop.f32.mrf.mxu1 }
 0xd16   :  { %v2591_v48 = vadd.f32 %v2590_v28, %v1945_v49 }
 0xd61   :  { %v2674_v37 = vpop.xlane.xlu0 %2673 }
 0xd62   :  { %v2678_v57 = vsub.f32 %v2655_v24, %v2674_v37  ;;  %v5111_v24 = vld [vmem:[#allocation2 + $0x2e0] sm:$0xf] }
 0xd63   :  { %v5103_v37 = vld [vmem:[#allocation2 + $0x80] sm:$0xf] }
 0xd64   :  { %v2680_v58 = vmul.f32 1.442695, %v2678_v57  ;;  %v4659_v57 = vld [vmem:[#allocation2 + $0x114] sm:$0xf0] }
 0xd66   :  { %5219 = vpow2.f32 %v2680_v58  ;;  %v2549_v58 = vadd.f32 %v2548_v56, %v1942_v51  ;;  %v2602_v51 = vpop.f32.mrf.mxu2  ;;  %v3106_v56 = vpack.c.bf16 %v5588_v22, %v5588_v22 }
 0xd6c   :  { %v5220_v60 = vpop.eup %5219 }
 0xd6d   :  { %v2684_v40 = vsel %vm973_vm1, %v5220_v60, 0.0 }
 0xd6e   :  { %2685 = vadd.xlane.f32.xlu1 %v2684_v40  ;;  %v2604_v26 = vpop.f32.mrf.mxu2 }
 0xd71   :  { %v2677_v61 = vpop.xlane.xlu2 %2676 }
 0xd72   :  { %v2679_v62 = vsub.f32 %v2668_v42, %v2677_v61  ;;  %v4670_v42 = vor.u32 %v5111_v24, %v4667_v52  ;;  %v3107_v61 = vpack.c.bf16 %v2549_v58, %v2549_v58 }
 0xd74   :  { %v2682_v2 = vmul.f32 1.442695, %v2679_v62  ;;  %v2950_v62 = vpack.c.bf16 %v2591_v48, %v2591_v48 }
 0xd76   :  { %5221 = vpow2.f32 %v2682_v2 }
 0xd7c   :  { %v5222_v46 = vpop.eup %5221 }
 0xd7d   :  { %v2687_v8 = vsel %vm973_vm1, %v5222_v46, 0.0 }
 0xd7e   :  { %2688 = vadd.xlane.f32.xlu1 %v2687_v8  ;;  %v3024_v8 = vsel %vm1001_vm0, %v2950_v62, 0 }
 0xd81   :  { %v2836_v13 = vpop.xlane.xlu0 %2835 }
 0xd82   :  { %v2840_v32 = vsub.f32 %v2817_v54, %v2836_v13  ;;  %v1946_v13 = vperm.slane %v5591_v63, 3 }
 0xd84   :  { %v2842_v0 = vmul.f32 1.442695, %v2840_v32  ;;  %v2603_v49 = vadd.f32 %v2602_v51, %v1946_v13  ;;  %v2477_v32 = vadd.f32 %v5559_v11, %v1937_v10  ;;  %v2946_v11 = vpack.c.bf16 %v5573_v34, %v5573_v34 }
 0xd86   :  { %5223 = vpow2.f32 %v2842_v0  ;;  %v3108_v0 = vpack.c.bf16 %v2603_v49, %v2603_v49 }
 0xd8c   :  { %v5224_v1 = vpop.eup %5223 }
 0xd8d   :  { %v2846_v35 = vsel %vm973_vm1, %v5224_v1, 0.0 }
 0xd8e   :  { %2847 = vadd.xlane.f32.xlu2 %v2846_v35  ;;  %v3164_v35 = vsel %vm1001_vm0, %v3108_v0, 0 }
 0xde1   :  { %v2686_v6 = vpop.xlane.xlu1 %2685 }
 0xde2   :  { %5225 = vrcp.f32 %v2686_v6 }
 0xde8   :  { %v5226_v36 = vpop.eup %5225 }
 0xde9   :  { %v2692_v14 = vmul.f32 %v5226_v36, %v5220_v60  ;;  %v4662_v60 = vor.u32 %v5103_v37, %v4659_v57 }
 0xdeb   :  { %v2694_v4 = vpack.c.bf16 %v2692_v14, %v2692_v14 }
 0xded   :  { %4623 = vmatmul.msk.bf16.vlgmr.msrb.gmra.mxu0 %vm973_vm1, %v2694_v4 }
 0xdee   :  { %2929 = vmatpush.bf16.msrb.mxu0 %v4690_v16 }
 0xdf1   :  { %v2689_v23 = vpop.xlane.xlu1 %2688 }
 0xdf2   :  { %2930 = vmatpush.bf16.msrb.mxu0 %v4686_v5  ;;  %5227 = vrcp.f32 %v2689_v23 }
 0xdf6   :  { %2931 = vmatpush.bf16.msrb.mxu0 %v4682_v3 }
 0xdf8   :  { %v5228_v38 = vpop.eup %5227 }
 0xdf9   :  { %v2693_v39 = vmul.f32 %v5228_v38, %v5222_v46 }
 0xdfa   :  { %2932 = vmatpush.bf16.msrb.mxu0 %v4678_v27 }
 0xdfb   :  { %v2695_v47 = vpack.c.bf16 %v2693_v39, %v2693_v39 }
 0xdfd   :  { %4624 = vmatmul.msk.bf16.vlgmr.msrb.gmra.mxu1 %vm973_vm1, %v2695_v47  ;;  %2829 = vmatmul.bf16.vlgmr.msra.gmra.mxu0 %v2803_v45 }
 0xdfe   :  { %2933 = vmatpush.bf16.msrb.mxu0 %v4674_v43  ;;  %2958 = vmatpush.bf16.xpose.msrb.mxu1 %v2947_v50 }
 0xe01   :  { %v2848_v54 = vpop.xlane.xlu2 %2847 }
 0xe02   :  { %2934 = vmatpush.bf16.msrb.mxu0 %v4670_v42  ;;  %5229 = vrcp.f32 %v2848_v54 }
 0xe06   :  { %2935 = vmatpush.bf16.msrb.mxu0 %v4666_v19 }
 0xe08   :  { %v5230_v40 = vpop.eup %5229 }
 0xe09   :  { %v2854_v2 = vmul.f32 %v5230_v40, %v5224_v1  ;;  %v2945_v1 = vpack.c.bf16 %v2477_v32, %v2477_v32 }
 0xe0a   :  { %2936 = vmatpush.bf16.msrb.mxu0 %v4662_v60  ;;  %v2605_v60 = vadd.f32 %v2604_v26, %v1946_v13  ;;  %v5114_v26 = vld [vmem:[#allocation2 + $0x378] sm:$0xf0] }
 0xe0b   :  { %v2856_v46 = vpack.c.bf16 %v2854_v2, %v2854_v2 }
 0xe0d   :  { %4657 = vmatmul.msk.bf16.vlgmr.msra.gmra.mxu1 %vm973_vm1, %v2856_v46  ;;  %v2491_v46 = vadd.f32 %v5564_v9, %v1938_v53  ;;  %v4719_v9 = vld [vmem:[#allocation2 + $0x7a4] sm:$0xf] }
 0xe0e   :  { %3130 = vmatpush.bf16.xpose.msra.mxu0 %v3107_v61  ;;  %3033 = vmatpush.bf16.msra.mxu1 %v3024_v8  ;;  %v3109_v61 = vpack.c.bf16 %v2605_v60, %v2605_v60 }
 0xe0f   :  { %v3104_v8 = vpack.c.bf16 %v2491_v46, %v2491_v46 }
 0xe10   :  { %v3183_v2 = vsel %vm1001_vm0, %v3109_v61, 0 }
 0xe1d   :  { %2959 = vmatmul.bf16.vlgmr.msrb.gmra.mxu1 %v2945_v1  ;;  %v3105_v1 = vpack.c.bf16 %v5579_v44, %v5579_v44 }
 0xe1e   :  { %3173 = vmatpush.bf16.msrb.mxu1 %v3164_v35 }
 0xe6a   :  { %v2711_v6 = vpop.f32.mrf.mxu0 }
 0xe72   :  { %v2713_v7 = vpop.f32.mrf.mxu0 }
 0xe73   :  { %v5130_v7 = vld [vmem:[#allocation2 + $0x838] sm:$0xf0] }
 0xe7a   :  { %v2730_v20 = vpop.f32.mrf.mxu1  ;;  %v2830_v36 = vpop.f32.mrf.mxu0 }
 0xe7b   :  { %v2734_v14 = vpack.c.bf16 %v2730_v20, %v2711_v6  ;;  %v2837_v16 = vsel %vm973_vm1, %v2830_v36, -inf  ;;  %v5134_v6 = vld [vmem:[#allocation2 + $0x968] sm:$0xf0]  ;;  %v4720_v20 = vor.u32 %v5130_v7, %v4719_v9 }
 0xe7c   :  { %2838 = vmax.xlane.f32.xlu0 %v2837_v16  ;;  %v4724_v53 = vor.u32 %v5134_v6, %v4723_v29  ;;  %v4755_v29 = vld [vmem:[#allocation2 + $0x96c] sm:$0xf0]  ;;  %v5128_v6 = vld [vmem:[#allocation2 + $0x7a8] sm:$0xf] }
 0xe7d   :  { %2791 = vmatmul.bf16.vlgmr.msrb.gmra.mxu2 %v2734_v14  ;;  %v5126_v14 = vld [vmem:[#allocation2 + $0x708] sm:$0xf0] }
 0xe7e   :  { %3088 = vmatpush.bf16.msrb.mxu2 %v4724_v53  ;;  %v4751_v53 = vld [vmem:[#allocation2 + $0x83c] sm:$0xf0] }
 0xe7f   :  { %v4754_v7 = vor.u32 %v5128_v6, %v4751_v53  ;;  %v5137_v53 = vld [vmem:[#allocation2 + $0x380] sm:$0xf0] }
 0xe82   :  { %v2732_v4 = vpop.f32.mrf.mxu1  ;;  %v2832_v12 = vpop.f32.mrf.mxu0  ;;  %3089 = vmatpush.bf16.msrb.mxu2 %v4720_v20  ;;  %v5124_v20 = vld [vmem:[#allocation2 + $0x678] sm:$0xf] }
 0xe8a   :  { %v2873_v31 = vpop.f32.mrf.mxu1 }
 0xe8d   :  { %2972 = vmatmul.bf16.vlgmr.msra.gmra.mxu2 %v2946_v11 }
 0xe92   :  { %v2875_v10 = vpop.f32.mrf.mxu1 }
 0xe93   :  { %v4711_v10 = vld [vmem:[#allocation2 + $0x544] sm:$0xf] }
 0xe9a   :  { %v2960_v5 = vpop.f32.mrf.mxu1 }
 0xe9b   :  { %v2977_v15 = vsel %vm973_vm1, %v2960_v5, -inf }
 0xe9c   :  { %2978 = vmax.xlane.f32.xlu2 %v2977_v15 }
 0xea2   :  { %v2962_v21 = vpop.f32.mrf.mxu1 }
 0xea3   :  { %v4707_v21 = vld [vmem:[#allocation2 + $0x414] sm:$0xf] }
 0xeef   :  { %v2839_v23 = vpop.xlane.xlu0 %2838 }
 0xef0   :  { %v2841_v3 = vsub.f32 %v2830_v36, %v2839_v23  ;;  %v4715_v36 = vld [vmem:[#allocation2 + $0x674] sm:$0xf]  ;;  %v5118_v23 = vld [vmem:[#allocation2 + $0x4a8] sm:$0xf0] }
 0xef1   :  { %v4716_v16 = vor.u32 %v5126_v14, %v4715_v36  ;;  %v4747_v36 = vld [vmem:[#allocation2 + $0x70c] sm:$0xf0] }
 0xef2   :  { %v2844_v25 = vmul.f32 1.442695, %v2841_v3  ;;  %v4708_v3 = vor.u32 %v5118_v23, %v4707_v21  ;;  %v4750_v14 = vor.u32 %v5124_v20, %v4747_v36  ;;  %v5108_v21 = vld [vmem:[#allocation2 + $0x1b8] sm:$0xf]  ;;  %v4731_v23 = vld [vmem:[#allocation2 + $0x24c] sm:$0xf0] }
 0xef3   :  { %3090 = vmatpush.bf16.msrb.mxu2 %v4716_v16  ;;  %v5120_v16 = vld [vmem:[#allocation2 + $0x548] sm:$0xf]  ;;  %v4765_v20 = vld [vmem:[#allocation2 + $0x1bc] sm:$0xf]  ;;  %v5136_v36 = vld [vmem:[#allocation2 + $0x250] sm:$0xf0] }
 0xef4   :  { %5231 = vpow2.f32 %v2844_v25  ;;  %v4703_v25 = vld [vmem:[#allocation2 + $0x2e4] sm:$0xf] }
 0xefa   :  { %v5232_v27 = vpop.eup %5231 }
 0xefb   :  { %v2849_v18 = vsel %vm973_vm1, %v5232_v27, 0.0 }
 0xefc   :  { %2850 = vadd.xlane.f32.xlu1 %v2849_v18  ;;  %v4699_v18 = vld [vmem:[#allocation2 + $0x1b4] sm:$0xf] }
 0xf00   :  { %v5636_v33 = vpop.f32.mrf.mxu2 }
 0xf08   :  { %v5638_v38 = vpop.f32.mrf.mxu2 }
 0xf0f   :  { %v2979_v34 = vpop.xlane.xlu2 %2978 }
 0xf10   :  { %v2983_v39 = vsub.f32 %v2960_v5, %v2979_v34  ;;  %v2973_v43 = vpop.f32.mrf.mxu2  ;;  %v5122_v5 = vld [vmem:[#allocation2 + $0x5d8] sm:$0xf0]  ;;  %v5110_v34 = vld [vmem:[#allocation2 + $0x248] sm:$0xf0] }
 0xf11   :  { %v2980_v45 = vsel %vm973_vm1, %v2973_v43, -inf  ;;  %v4712_v15 = vor.u32 %v5122_v5, %v4711_v10  ;;  %v5112_v10 = vld [vmem:[#allocation2 + $0x2e8] sm:$0xf]  ;;  %v4735_v5 = vld [vmem:[#allocation2 + $0x37c] sm:$0xf0] }
 0xf12   :  { %v2985_v47 = vmul.f32 1.442695, %v2983_v39  ;;  %2981 = vmax.xlane.f32.xlu1 %v2980_v45  ;;  %v4700_v39 = vor.u32 %v5110_v34, %v4699_v18  ;;  %v5106_v45 = vld [vmem:[#allocation2 + $0x118] sm:$0xf0]  ;;  %v4727_v18 = vld [vmem:[#allocation2 + $0x11c] sm:$0xf0] }
 0xf13   :  { %3091 = vmatpush.bf16.msrb.mxu2 %v4712_v15  ;;  %v4738_v15 = vor.u32 %v5112_v10, %v4735_v5  ;;  %v4821_v10 = vld [vmem:[#allocation2 + $0x8e0] sm:$0xf]  ;;  %v5150_v5 = vld [vmem:[#allocation2 + $0x974] sm:$0xf0] }
 0xf14   :  { %5233 = vpow2.f32 %v2985_v47 }
 0xf17   :  { %3092 = vmatpush.bf16.msrb.mxu2 %v4708_v3  ;;  %v4734_v3 = vor.u32 %v5108_v21, %v4731_v23  ;;  %v4822_v23 = vor.u32 %v5150_v5, %v4821_v10 }
 0xf18   :  { %v2975_v24 = vpop.f32.mrf.mxu2 }
 0xf19   :  { %v5171_v24 = vld [vmem:[#allocation4 + $0x20] ss:$0 sm:$0xff] }
 0xf1a   :  { %v5234_v52 = vpop.eup %5233 }
 0xf1b   :  { %v2989_v50 = vsel %vm973_vm1, %v5234_v52, 0.0 }
 0xf1c   :  { %2990 = vadd.xlane.f32.xlu0 %v2989_v50 }
 0xf6f   :  { %v2851_v42 = vpop.xlane.xlu1 %2850 }
 0xf70   :  { %5235 = vrcp.f32 %v2851_v42 }
 0xf76   :  { %v5236_v41 = vpop.eup %5235 }
 0xf77   :  { %v2855_v55 = vmul.f32 %v5236_v41, %v5232_v27  ;;  %v4704_v27 = vor.u32 %v5114_v26, %v4703_v25  ;;  %v2801_v41 = vadd.f32 %v5171_v24, %v5638_v38 }
 0xf79   :  { %v2857_v54 = vpack.c.bf16 %v2855_v55, %v2855_v55  ;;  %3093 = vmatpush.bf16.msrb.mxu2 %v4704_v27  ;;  %v5104_v27 = vld [vmem:[#allocation2 + $0x88] sm:$0xf] }
 0xf7a   :  { %v4730_v34 = vor.u32 %v5104_v27, %v4727_v18 }
 0xf7b   :  { %4658 = vmatmul.msk.bf16.vlgmr.msrb.gmra.mxu3 %vm973_vm1, %v2857_v54 }
 0xf7c   :  { %3117 = vmatpush.bf16.xpose.msrb.mxu3 %v3106_v56 }
 0xf7d   :  { %3094 = vmatpush.bf16.msrb.mxu2 %v4700_v39 }
 0xf85   :  { %v2982_v28 = vpop.xlane.xlu1 %2981 }
 0xf86   :  { %v2984_v19 = vsub.f32 %v2973_v43, %v2982_v28  ;;  %v4695_v43 = vld [vmem:[#allocation2 + $0x84] sm:$0xf] }
 0xf87   :  { %v4696_v47 = vor.u32 %v5106_v45, %v4695_v43 }
 0xf88   :  { %v2987_v37 = vmul.f32 1.442695, %v2984_v19 }
 0xf89   :  { %3095 = vmatpush.bf16.msrb.mxu2 %v4696_v47 }
 0xf8a   :  { %5237 = vpow2.f32 %v2987_v37 }
 0xf8d   :  { %3459 = vmatpush.bf16.msra.mxu2 %v4822_v23 }
 0xf8f   :  { %v2991_v57 = vpop.xlane.xlu0 %2990 }
 0xf90   :  { %v5238_v58 = vpop.eup %5237  ;;  %5239 = vrcp.f32 %v2991_v57 }
 0xf91   :  { %v2992_v48 = vsel %vm973_vm1, %v5238_v58, 0.0 }
 0xf92   :  { %2993 = vadd.xlane.f32.xlu1 %v2992_v48 }
 0xf96   :  { %v5240_v40 = vpop.eup %5239 }
 0xf97   :  { %v2997_v62 = vmul.f32 %v5240_v40, %v5234_v52  ;;  %v2800_v52 = vadd.f32 %v5171_v24, %v5636_v33 }
 0xf99   :  { %v2999_v22 = vpack.c.bf16 %v2997_v62, %v2997_v62 }
 0xf9b   :  { %4691 = vmatmul.msk.bf16.vlgmr.msra.gmra.mxu3 %vm973_vm1, %v2999_v22 }
 0xf9c   :  { %3192 = vmatpush.bf16.msra.mxu3 %v3183_v2 }
 0xfab   :  { %3118 = vmatmul.bf16.vlgmr.msrb.gmra.mxu3 %v3104_v8 }
 0xffe   :  { %v2892_v51 = vpop.f32.mrf.mxu3 }
 0xfff   :  { %v2896_v49 = vpack.c.bf16 %v2892_v51, %v2873_v31 }
0x1001   :  { %2937 = vmatmul.bf16.vlgmr.msrb.gmra.mxu0 %v2896_v49 }
0x1005   :  { %v2994_v63 = vpop.xlane.xlu1 %2993 }
0x1006   :  { %5241 = vrcp.f32 %v2994_v63  ;;  %v2894_v13 = vpop.f32.mrf.mxu3 }
0x100c   :  { %v5242_v32 = vpop.eup %5241 }
0x100d   :  { %v2998_v0 = vmul.f32 %v5242_v32, %v5238_v58 }
0x100f   :  { %v3000_v35 = vpack.c.bf16 %v2998_v0, %v2998_v0 }
0x1011   :  { %4692 = vmatmul.msk.bf16.vlgmr.msra.gmra.mxu1 %vm973_vm1, %v3000_v35  ;;  %3131 = vmatmul.bf16.vlgmr.msra.gmra.mxu0 %v3105_v1  ;;  %v5132_v35 = vld [vmem:[#allocation2 + $0x8d8] sm:$0xf] }
0x1012   :  { %v4758_v9 = vor.u32 %v5132_v35, %v4755_v29  ;;  %v4773_v35 = vld [vmem:[#allocation2 + $0x41c] sm:$0xf]  ;;  %v5138_v29 = vld [vmem:[#allocation2 + $0x4b0] sm:$0xf0] }
0x1013   :  { %v4774_v6 = vor.u32 %v5138_v29, %v4773_v35  ;;  %v4793_v35 = vld [vmem:[#allocation2 + $0x90] sm:$0xf]  ;;  %v5143_v29 = vld [vmem:[#allocation2 + $0x124] sm:$0xf0] }
0x1014   :  { %3231 = vmatpush.bf16.msrb.mxu0 %v4758_v9  ;;  %v4769_v9 = vld [vmem:[#allocation2 + $0x2ec] sm:$0xf] }
0x1018   :  { %3232 = vmatpush.bf16.msrb.mxu0 %v4754_v7  ;;  %v4770_v7 = vor.u32 %v5137_v53, %v4769_v9  ;;  %v5174_v9 = vld [vmem:[#allocation4 + $0x21] ss:$0 sm:$0xff] }
0x101c   :  { %3233 = vmatpush.bf16.msrb.mxu0 %v4750_v14 }
0x101e   :  { %v3016_v4 = vpop.f32.mrf.mxu3 }
0x1026   :  { %v3018_v12 = vpop.f32.mrf.mxu3 }
0x102e   :  { %v3119_v31 = vpop.f32.mrf.mxu3 }
0x102f   :  { %v3136_v44 = vsel %vm973_vm1, %v3119_v31, -inf }
0x1030   :  { %3137 = vmax.xlane.f32.xlu0 %v3136_v44  ;;  %v4739_v44 = vld [vmem:[#allocation2 + $0x4ac] sm:$0xf0] }
0x1036   :  { %v3121_v11 = vpop.f32.mrf.mxu3 }
0x107e   :  { %v2938_v50 = vpop.f32.mrf.mxu0 }
0x107f   :  { %v5658_v42 = vadd.f32 %v2938_v50, %v2800_v52 }
0x1086   :  { %v2940_v55 = vpop.f32.mrf.mxu0 }
0x1087   :  { %v5661_v54 = vadd.f32 %v2940_v55, %v2801_v41 }
0x108e   :  { %v3035_v56 = vpop.f32.mrf.mxu1  ;;  %v3132_v28 = vpop.f32.mrf.mxu0 }
0x108f   :  { %v3039_v19 = vpack.c.bf16 %v3035_v56, %v3016_v4  ;;  %v3139_v37 = vsel %vm973_vm1, %v3132_v28, -inf  ;;  %v4743_v4 = vld [vmem:[#allocation2 + $0x5dc] sm:$0xf0] }
0x1090   :  { %3140 = vmax.xlane.f32.xlu2 %v3139_v37  ;;  %v4746_v12 = vor.u32 %v5120_v16, %v4743_v4  ;;  %v4766_v16 = vor.u32 %v5136_v36, %v4765_v20 }
0x1091   :  { %3096 = vmatmul.bf16.vlgmr.msrb.gmra.mxu2 %v3039_v19 }
0x1092   :  { %3234 = vmatpush.bf16.msrb.mxu0 %v4746_v12 }
0x1096   :  { %v3037_v57 = vpop.f32.mrf.mxu1  ;;  %v3134_v58 = vpop.f32.mrf.mxu0 }
0x10a3   :  { %v3138_v48 = vpop.xlane.xlu0 %3137 }
0x10a4   :  { %v3142_v60 = vsub.f32 %v3119_v31, %v3138_v48  ;;  %v5116_v31 = vld [vmem:[#allocation2 + $0x418] sm:$0xf] }
0x10a5   :  { %v4742_v11 = vor.u32 %v5116_v31, %v4739_v44  ;;  %v4761_v31 = vld [vmem:[#allocation2 + $0x8c] sm:$0xf]  ;;  %v5135_v44 = vld [vmem:[#allocation2 + $0x120] sm:$0xf0] }
0x10a6   :  { %v3144_v33 = vmul.f32 1.442695, %v3142_v60 }
0x10a7   :  { %3235 = vmatpush.bf16.msrb.mxu0 %v4742_v11  ;;  %v4762_v11 = vor.u32 %v5135_v44, %v4761_v31 }
0x10a8   :  { %5243 = vpow2.f32 %v3144_v33 }
0x10ab   :  { %3236 = vmatpush.bf16.msrb.mxu0 %v4738_v15  ;;  %v4817_v15 = vld [vmem:[#allocation2 + $0x7b0] sm:$0xf] }
0x10ae   :  { %v5244_v40 = vpop.eup %5243 }
0x10af   :  { %v3148_v61 = vsel %vm973_vm1, %v5244_v40, 0.0  ;;  %3237 = vmatpush.bf16.msrb.mxu0 %v4734_v3  ;;  %v5149_v3 = vld [vmem:[#allocation2 + $0x844] sm:$0xf0] }
0x10b0   :  { %3149 = vadd.xlane.f32.xlu0 %v3148_v61 }
0x10b3   :  { %3238 = vmatpush.bf16.msrb.mxu0 %v4730_v34  ;;  %v4813_v34 = vld [vmem:[#allocation2 + $0x680] sm:$0xf] }
0x1103   :  { %v3141_v38 = vpop.xlane.xlu2 %3140 }
0x1104   :  { %v3143_v62 = vsub.f32 %v3132_v28, %v3141_v38 }
0x1106   :  { %v3146_v22 = vmul.f32 1.442695, %v3143_v62  ;;  %v4789_v62 = vld [vmem:[#allocation2 + $0x8dc] sm:$0xf] }
0x1108   :  { %5245 = vpow2.f32 %v3146_v22  ;;  %v5142_v22 = vld [vmem:[#allocation2 + $0x970] sm:$0xf0] }
0x110e   :  { %v5246_v2 = vpop.eup %5245 }
0x110f   :  { %v3151_v46 = vsel %vm973_vm1, %v5246_v2, 0.0 }
0x1110   :  { %3152 = vadd.xlane.f32.xlu2 %v3151_v46  ;;  %v4785_v46 = vld [vmem:[#allocation2 + $0x7ac] sm:$0xf] }
0x1114   :  { %v3097_v47 = vpop.f32.mrf.mxu2 }
0x1115   :  { %v3102_v24 = vadd.f32 %v3097_v47, %v5658_v42 }
0x111c   :  { %v3099_v55 = vpop.f32.mrf.mxu2 }
0x111d   :  { %v3103_v28 = vadd.f32 %v3099_v55, %v5661_v54 }
0x1123   :  { %v3150_v8 = vpop.xlane.xlu0 %3149 }
0x1124   :  { %5247 = vrcp.f32 %v3150_v8  ;;  %v5141_v8 = vld [vmem:[#allocation2 + $0x840] sm:$0xf0] }
0x112a   :  { %v5248_v51 = vpop.eup %5247 }
0x112b   :  { %v3156_v49 = vmul.f32 %v5248_v51, %v5244_v40  ;;  %v4786_v51 = vor.u32 %v5141_v8, %v4785_v46  ;;  %v4805_v8 = vld [vmem:[#allocation2 + $0x420] sm:$0xf] }
0x112d   :  { %v3158_v63 = vpack.c.bf16 %v3156_v49, %v3156_v49  ;;  %v4781_v49 = vld [vmem:[#allocation2 + $0x67c] sm:$0xf] }
0x112f   :  { %4725 = vmatmul.msk.bf16.vlgmr.msrb.gmra.mxu1 %vm973_vm1, %v3158_v63  ;;  %v5140_v63 = vld [vmem:[#allocation2 + $0x710] sm:$0xf0] }
0x1183   :  { %v3153_v13 = vpop.xlane.xlu2 %3152 }
0x1184   :  { %5249 = vrcp.f32 %v3153_v13  ;;  %v4782_v13 = vor.u32 %v5140_v63, %v4781_v49  ;;  %v4801_v63 = vld [vmem:[#allocation2 + $0x2f0] sm:$0xf] }
0x118a   :  { %v5250_v32 = vpop.eup %5249 }
0x118b   :  { %v3157_v0 = vmul.f32 %v5250_v32, %v5246_v2  ;;  %v4790_v2 = vor.u32 %v5142_v22, %v4789_v62  ;;  %v4777_v32 = vld [vmem:[#allocation2 + $0x54c] sm:$0xf] }
0x118d   :  { %v3159_v1 = vpack.c.bf16 %v3157_v0, %v3157_v0  ;;  %3374 = vmatpush.bf16.msra.mxu1 %v4790_v2  ;;  %v5139_v0 = vld [vmem:[#allocation2 + $0x5e0] sm:$0xf0] }
0x118f   :  { %4726 = vmatmul.msk.bf16.vlgmr.msra.gmra.mxu3 %vm973_vm1, %v3159_v1  ;;  %v4778_v1 = vor.u32 %v5139_v0, %v4777_v32  ;;  %v4797_v32 = vld [vmem:[#allocation2 + $0x1c0] sm:$0xf]  ;;  %v5144_v0 = vld [vmem:[#allocation2 + $0x254] sm:$0xf0] }
0x1191   :  { %3375 = vmatpush.bf16.msra.mxu1 %v4786_v51  ;;  %v5146_v51 = vld [vmem:[#allocation2 + $0x4b4] sm:$0xf0] }
0x1192   :  { %v4806_v49 = vor.u32 %v5146_v51, %v4805_v8  ;;  %v5151_v8 = vld [vmem:[#allocation2 + $0x128] sm:$0xf0] }
0x1195   :  { %3376 = vmatpush.bf16.msra.mxu1 %v4782_v13  ;;  %v5145_v13 = vld [vmem:[#allocation2 + $0x384] sm:$0xf0] }
0x1199   :  { %3377 = vmatpush.bf16.msra.mxu1 %v4778_v1  ;;  %v4798_v1 = vor.u32 %v5144_v0, %v4797_v32 }
0x119d   :  { %3378 = vmatpush.bf16.msra.mxu1 %v4774_v6 }
0x11a1   :  { %3379 = vmatpush.bf16.msra.mxu1 %v4770_v7 }
0x11a5   :  { %3380 = vmatpush.bf16.msra.mxu1 %v4766_v16 }
0x11a9   :  { %3381 = vmatpush.bf16.msra.mxu1 %v4762_v11 }
0x11ac   :  { %v3175_v25 = vpop.f32.mrf.mxu1 }
0x11b4   :  { %v3177_v26 = vpop.f32.mrf.mxu1 }
0x11b5   :  { %v4818_v26 = vor.u32 %v5149_v3, %v4817_v15 }
0x11b7   :  { %3460 = vmatpush.bf16.msra.mxu2 %v4818_v26 }
0x1212   :  { %v3194_v39 = vpop.f32.mrf.mxu3 }
0x1213   :  { %v3198_v43 = vpack.c.bf16 %v3194_v39, %v3175_v25  ;;  %v5148_v39 = vld [vmem:[#allocation2 + $0x714] sm:$0xf0] }
0x1214   :  { %v4814_v47 = vor.u32 %v5148_v39, %v4813_v34 }
0x1215   :  { %3239 = vmatmul.bf16.vlgmr.msrb.gmra.mxu0 %v3198_v43 }
0x1216   :  { %3461 = vmatpush.bf16.msra.mxu2 %v4814_v47  ;;  %v4853_v47 = vld [vmem:[#allocation2 + $0x8e4] sm:$0xf] }
0x121a   :  { %v3196_v45 = vpop.f32.mrf.mxu3 }
0x1292   :  { %v3240_v52 = vpop.f32.mrf.mxu0 }
0x1293   :  { %v3245_v50 = vadd.f32 %v3240_v52, %v3102_v24  ;;  %v4809_v24 = vld [vmem:[#allocation2 + $0x550] sm:$0xf]  ;;  %v5147_v52 = vld [vmem:[#allocation2 + $0x5e4] sm:$0xf0] }
0x1294   :  { %v4810_v55 = vor.u32 %v5147_v52, %v4809_v24  ;;  %v5158_v24 = vld [vmem:[#allocation2 + $0x978] sm:$0xf0] }
0x1295   :  { %v3247_v41 = vadd.f32 %v3245_v50, %v5537_v17  ;;  %v4854_v52 = vor.u32 %v5158_v24, %v4853_v47 }
0x1296   :  { %3462 = vmatpush.bf16.msra.mxu2 %v4810_v55 }
0x1297   :  { %v3251_v56 = vmul.f32 %v5496_v59, %v3247_v41  ;;  %3600 = vmatpush.bf16.msrb.mxu3 %v4854_v52 }
0x1299   :  { %3253 = vadd.xlane.f32.xlu1 %v3251_v56 }
0x129a   :  { %v3242_v19 = vpop.f32.mrf.mxu0  ;;  %3463 = vmatpush.bf16.msra.mxu2 %v4806_v49 }
0x129b   :  { %v3246_v37 = vadd.f32 %v3242_v19, %v3103_v28 }
0x129d   :  { %v3248_v57 = vadd.f32 %v3246_v37, %v5539_v30 }
0x129f   :  { %v3252_v58 = vmul.f32 %v5496_v59, %v3248_v57 }
0x12a1   :  { %3255 = vadd.xlane.f32.xlu2 %v3252_v58 }
0x130c   :  { %v3254_v48 = vpop.xlane.xlu1 %3253 }
0x130d   :  { %v3257_v60 = vmul.f32 0.03125, %v3254_v48 }
0x130f   :  { %v3259_v42 = vsub.f32 %v3247_v41, %v3257_v60  ;;  %v5172_v60 = vld [vmem:[#allocation4 + $0x23] ss:$0 sm:$0xff] }
0x1311   :  { %v5675_v33 = vmul.f32 %v5496_v59, %v3259_v42 }
0x1313   :  { %v3263_v17 = vmul.f32 %v5675_v33, %v5675_v33 }
0x1314   :  { %v3256_v40 = vpop.xlane.xlu2 %3255 }
0x1315   :  { %v3258_v61 = vmul.f32 0.03125, %v3256_v40  ;;  %3265 = vadd.xlane.f32.xlu0 %v3263_v17 }
0x1317   :  { %v3260_v54 = vsub.f32 %v3248_v57, %v3258_v61  ;;  %v5173_v61 = vld [vmem:[#allocation4 + $0x24] ss:$0 sm:$0xff] }
0x1319   :  { %v5680_v38 = vmul.f32 %v5496_v59, %v3260_v54 }
0x131b   :  { %v3264_v30 = vmul.f32 %v5680_v38, %v5680_v38 }
0x131d   :  { %3267 = vadd.xlane.f32.xlu1 %v3264_v30 }
0x1388   :  { %v3266_v14 = vpop.xlane.xlu0 %3265 }
0x1389   :  { %v3269_v4 = vmul.f32 0.03125, %v3266_v14 }
0x138b   :  { %v3271_v12 = vadd.f32 1e-05, %v3269_v4  ;;  %v5175_v4 = vld [vmem:[#allocation4 + $0x22] ss:$0 sm:$0xff] }
0x138d   :  { %5251 = vrsqrt.f32 %v3271_v12  ;;  %vm3279_vm0 = vweird.f32 %v3271_v12 }
0x1390   :  { %v3268_v21 = vpop.xlane.xlu1 %3267 }
0x1391   :  { %v3270_v25 = vmul.f32 0.03125, %v3268_v21 }
0x1393   :  { %v5252_v27 = vpop.eup %5251  ;;  %v3272_v18 = vadd.f32 1e-05, %v3270_v25 }
0x1394   :  { %v3274_v43 = vmul.f32 %v5252_v27, %v3271_v12  ;;  %vm3280_vm15 = vweird.f32 %v5252_v27 }
0x1395   :  { %5253 = vrsqrt.f32 %v3272_v18  ;;  %vm3281_vm1 = vmor %vm3279_vm0, %vm3280_vm15  ;;  %vm3289_vm3 = vweird.f32 %v3272_v18 }
0x1396   :  { %v3275_v45 = vmul.f32 %v5252_v27, %v3274_v43 }
0x1398   :  { %v3276_v50 = vmul.f32 0.5, %v3275_v45 }
0x139a   :  { %v3277_v41 = vsub.f32 1.5, %v3276_v50  ;;  %v4849_v50 = vld [vmem:[#allocation2 + $0x7b4] sm:$0xf] }
0x139b   :  { %v5254_v56 = vpop.eup %5253 }
0x139c   :  { %v3278_v28 = vmul.f32 %v5252_v27, %v3277_v41  ;;  %v3284_v19 = vmul.f32 %v5254_v56, %v3272_v18  ;;  %vm3290_vm2 = vweird.f32 %v5254_v56  ;;  %v5157_v41 = vld [vmem:[#allocation2 + $0x848] sm:$0xf0] }
0x139d   :  { %vm3291_vm4 = vmor %vm3289_vm3, %vm3290_vm2  ;;  %v4850_v55 = vor.u32 %v5157_v41, %v4849_v50 }
0x139e   :  { %v3285_v37 = vmul.f32 %v5254_v56, %v3284_v19  ;;  %v3282_v57 = vsel %vm3281_vm1, %v5252_v27, %v3278_v28  ;;  %v5156_v28 = vld [vmem:[#allocation2 + $0x718] sm:$0xf0] }
0x139f   :  { %v3293_v42 = vmul.f32 %v3282_v57, %v5675_v33  ;;  %v4802_v33 = vor.u32 %v5145_v13, %v4801_v63  ;;  %3601 = vmatpush.bf16.msrb.mxu3 %v4850_v55  ;;  %v5155_v57 = vld [vmem:[#allocation2 + $0x5e8] sm:$0xf0] }
0x13a0   :  { %v3286_v58 = vmul.f32 0.5, %v3285_v37  ;;  %v4841_v37 = vld [vmem:[#allocation2 + $0x554] sm:$0xf] }
0x13a1   :  { %v3298_v54 = vmul.f32 %v5172_v60, %v3293_v42  ;;  %3464 = vmatpush.bf16.msra.mxu2 %v4802_v33  ;;  %v4833_v42 = vld [vmem:[#allocation2 + $0x2f4] sm:$0xf] }
0x13a2   :  { %v3287_v48 = vsub.f32 1.5, %v3286_v58  ;;  %v4837_v58 = vld [vmem:[#allocation2 + $0x424] sm:$0xf] }
0x13a3   :  { %v3303_v22 = vadd.f32 %v5173_v61, %v3298_v54  ;;  %v5152_v54 = vld [vmem:[#allocation2 + $0x258] sm:$0xf0] }
0x13a4   :  { %v3288_v17 = vmul.f32 %v5254_v56, %v3287_v48  ;;  %v5154_v48 = vld [vmem:[#allocation2 + $0x4b8] sm:$0xf0] }
0x13a5   :  { %3465 = vmatpush.bf16.msra.mxu2 %v4798_v1 }
0x13a6   :  { %v3292_v40 = vsel %vm3291_vm4, %v5254_v56, %v3288_v17  ;;  %v4845_v56 = vld [vmem:[#allocation2 + $0x684] sm:$0xf]  ;;  %v5153_v17 = vld [vmem:[#allocation2 + $0x388] sm:$0xf0] }
0x13a7   :  { %v3294_v30 = vmul.f32 %v3292_v40, %v5680_v38  ;;  %v4794_v38 = vor.u32 %v5143_v29, %v4793_v35  ;;  %v4846_v19 = vor.u32 %v5156_v28, %v4845_v56  ;;  %v4834_v40 = vor.u32 %v5153_v17, %v4833_v42 }
0x13a9   :  { %v3299_v62 = vmul.f32 %v5172_v60, %v3294_v30  ;;  %3466 = vmatpush.bf16.msra.mxu2 %v4794_v38  ;;  %3602 = vmatpush.bf16.msrb.mxu3 %v4846_v19  ;;  %v4838_v60 = vor.u32 %v5154_v48, %v4837_v58 }
0x13ab   :  { %v3304_v2 = vadd.f32 %v5173_v61, %v3299_v62  ;;  %v4829_v61 = vld [vmem:[#allocation2 + $0x1c4] sm:$0xf] }
0x13ac   :  { %v4830_v62 = vor.u32 %v5152_v54, %v4829_v61 }
0x13ad   :  { %v3305_v46 = vpack.c.bf16 %v3304_v2, %v3303_v22 }
0x13af   :  { %3382 = vmatmul.bf16.vlgmr.msra.gmra.mxu1 %v3305_v46  ;;  %v4825_v46 = vld [vmem:[#allocation2 + $0x94] sm:$0xf] }
0x13b0   :  { %v4826_v51 = vor.u32 %v5151_v8, %v4825_v46 }
0x142c   :  { %v3383_v6 = vpop.f32.mrf.mxu1 }
0x142d   :  { %v3384_v53 = vadd.f32 %v5174_v9, %v3383_v6 }
0x142f   :  { %v3388_v36 = vmax.f32 %v3384_v53, 0.0 }
0x1434   :  { %v3385_v7 = vpop.f32.mrf.mxu1 }
0x1435   :  { %v3386_v20 = vadd.f32 %v5174_v9, %v3385_v7 }
0x1437   :  { %v3389_v14 = vmax.f32 %v3386_v20, 0.0 }
0x1439   :  { %v3390_v16 = vpack.c.bf16 %v3389_v14, %v3388_v36  ;;  %v5176_v36 = vld [vmem:[#allocation4 + $0x25] ss:$0 sm:$0xff] }
0x143b   :  { %3467 = vmatmul.bf16.vlgmr.msra.gmra.mxu2 %v3390_v16 }
0x14be   :  { %v3468_v12 = vpop.f32.mrf.mxu2 }
0x14bf   :  { %v3469_v31 = vadd.f32 %v5175_v4, %v3468_v12  ;;  %v5177_v12 = vld [vmem:[#allocation4 + $0x26] ss:$0 sm:$0xff] }
0x14c1   :  { %v3473_v44 = vadd.f32 %v3469_v31, %v3303_v22 }
0x14c3   :  { %v3477_v11 = vmul.f32 %v5496_v59, %v3473_v44 }
0x14c5   :  { %3479 = vadd.xlane.f32.xlu2 %v3477_v11 }
0x14c6   :  { %v3470_v10 = vpop.f32.mrf.mxu2 }
0x14c7   :  { %v3471_v5 = vadd.f32 %v5175_v4, %v3470_v10 }
0x14c9   :  { %v3474_v15 = vadd.f32 %v3471_v5, %v3304_v2 }
0x14cb   :  { %v3478_v21 = vmul.f32 %v5496_v59, %v3474_v15 }
0x14cd   :  { %3481 = vadd.xlane.f32.xlu0 %v3478_v21  ;;  %v5178_v21 = vld [vmem:[#allocation4] ss:$0 sm:$0xff] }
0x1538   :  { %v3480_v23 = vpop.xlane.xlu2 %3479 }
0x1539   :  { %v3483_v3 = vmul.f32 0.03125, %v3480_v23 }
0x153b   :  { %v3485_v25 = vsub.f32 %v3473_v44, %v3483_v3 }
0x153d   :  { %v5689_v26 = vmul.f32 %v5496_v59, %v3485_v25 }
0x153f   :  { %v3489_v27 = vmul.f32 %v5689_v26, %v5689_v26 }
0x1540   :  { %v3482_v18 = vpop.xlane.xlu0 %3481 }
0x1541   :  { %v3484_v34 = vmul.f32 0.03125, %v3482_v18  ;;  %3491 = vadd.xlane.f32.xlu1 %v3489_v27 }
0x1543   :  { %v3486_v39 = vsub.f32 %v3474_v15, %v3484_v34 }
0x1545   :  { %v5694_v43 = vmul.f32 %v5496_v59, %v3486_v39  ;;  %v4842_v59 = vor.u32 %v5155_v57, %v4841_v37 }
0x1547   :  { %v3490_v45 = vmul.f32 %v5694_v43, %v5694_v43  ;;  %3603 = vmatpush.bf16.msrb.mxu3 %v4842_v59 }
0x1549   :  { %3493 = vadd.xlane.f32.xlu2 %v3490_v45 }
0x154b   :  { %3604 = vmatpush.bf16.msrb.mxu3 %v4838_v60 }
0x154f   :  { %3605 = vmatpush.bf16.msrb.mxu3 %v4834_v40 }
0x1553   :  { %3606 = vmatpush.bf16.msrb.mxu3 %v4830_v62 }
0x1557   :  { %3607 = vmatpush.bf16.msrb.mxu3 %v4826_v51 }
0x15b4   :  { %v3492_v30 = vpop.xlane.xlu1 %3491 }
0x15b5   :  { %v3495_v22 = vmul.f32 0.03125, %v3492_v30 }
0x15b7   :  { %v3497_v2 = vadd.f32 1e-05, %v3495_v22 }
0x15b9   :  { %5255 = vrsqrt.f32 %v3497_v2  ;;  %vm3505_vm6 = vweird.f32 %v3497_v2 }
0x15bc   :  { %v3494_v49 = vpop.xlane.xlu2 %3493 }
0x15bd   :  { %v3496_v63 = vmul.f32 0.03125, %v3494_v49 }
0x15bf   :  { %v5256_v13 = vpop.eup %5255  ;;  %v3498_v33 = vadd.f32 1e-05, %v3496_v63 }
0x15c0   :  { %v3500_v32 = vmul.f32 %v5256_v13, %v3497_v2  ;;  %vm3506_vm5 = vweird.f32 %v5256_v13 }
0x15c1   :  { %5257 = vrsqrt.f32 %v3498_v33  ;;  %vm3507_vm7 = vmor %vm3505_vm6, %vm3506_vm5  ;;  %vm3515_vm9 = vweird.f32 %v3498_v33 }
0x15c2   :  { %v3501_v0 = vmul.f32 %v5256_v13, %v3500_v32 }
0x15c4   :  { %v3502_v1 = vmul.f32 0.5, %v3501_v0 }
0x15c6   :  { %v3503_v35 = vsub.f32 1.5, %v3502_v1 }
0x15c7   :  { %v5258_v29 = vpop.eup %5257 }
0x15c8   :  { %v3504_v38 = vmul.f32 %v5256_v13, %v3503_v35  ;;  %v3510_v6 = vmul.f32 %v5258_v29, %v3498_v33  ;;  %vm3516_vm8 = vweird.f32 %v5258_v29 }
0x15c9   :  { %vm3517_vm10 = vmor %vm3515_vm9, %vm3516_vm8 }
0x15ca   :  { %v3511_v9 = vmul.f32 %v5258_v29, %v3510_v6  ;;  %v3508_v53 = vsel %vm3507_vm7, %v5256_v13, %v3504_v38 }
0x15cb   :  { %v3519_v14 = vmul.f32 %v3508_v53, %v5689_v26 }
0x15cc   :  { %v3512_v7 = vmul.f32 0.5, %v3511_v9 }
0x15cd   :  { %v3524_v31 = vmul.f32 %v5176_v36, %v3519_v14 }
0x15ce   :  { %v3513_v20 = vsub.f32 1.5, %v3512_v7 }
0x15cf   :  { %v3529_v10 = vadd.f32 %v5177_v12, %v3524_v31 }
0x15d0   :  { %v3514_v16 = vmul.f32 %v5258_v29, %v3513_v20 }
0x15d2   :  { %v3518_v4 = vsel %vm3517_vm10, %v5258_v29, %v3514_v16 }
0x15d3   :  { %v3520_v44 = vmul.f32 %v3518_v4, %v5694_v43 }
0x15d5   :  { %v3525_v11 = vmul.f32 %v5176_v36, %v3520_v44 }
0x15d7   :  { %v3530_v5 = vadd.f32 %v5177_v12, %v3525_v11 }
0x15d9   :  { %v3531_v15 = vpack.c.bf16 %v3530_v5, %v3529_v10 }
0x15db   :  { %3608 = vmatmul.bf16.vlgmr.msrb.gmra.mxu3 %v3531_v15 }
0x165e   :  { %v3609_v23 = vpop.f32.mrf.mxu3 }
0x165f   :  { %v3610_v3 = vadd.f32 %v5178_v21, %v3609_v23 }
0x1661   :  { %3614 = vst [vmem:[%s5710_s4] sm:$0xff] %v3610_v3 }
0x1666   :  { %v3611_v25 = vpop.f32.mrf.mxu3 }
0x1667   :  { %v3612_v26 = vadd.f32 %v5178_v21, %v3611_v25 }
0x1669   :  { %3615 = vst [vmem:[%s5710_s4 + $0x8] sm:$0xff] %v3612_v26 }
0x166a   :  { %3620 = vsyncpa [#allocation3], 1 }
0x166b   :  { %3621 = vsyncpa [#allocation5], 1 }

</bundles_post_ra>
